<compile_context>
chip_gen: v5e
topology: v5e:2x2
jax: 0.10.0
libtpu: 0.0.40
codegen_flags: <defaults>
</compile_context>

<pallas_src>
import math

import jax
import jax.numpy as jnp
from jax.experimental import pallas as pl
from jax.experimental.pallas import tpu as pltpu


# ----------------------------------------------------------------------------
# Pallas kernel: one (C*P, BLK) packed spatial tile of the collapsed denoiser.
#   out[cP+p, :] = z[cP+p, :] + bias[c]
#                  + sum_k ( wz[c,k]*z[kP+p, :] + wcc_c[c,k]*ccc[kP+p, :]
#                            + wcc_u[c,k]*ccu[kP+p, :] )
# with all scale factors (c_out, text/image cfg) pre-folded into the weights.
# ----------------------------------------------------------------------------
def _cfg_denoiser_kernel(wz_ref, wcc_c_ref, wcc_u_ref, bias_ref,   # SMEM scalars
                         z_ref, ccc_ref, ccu_ref,                  # VMEM (C*P, BLK)
                         out_ref):                                 # VMEM (C*P, BLK)
    C = bias_ref.shape[0]
    P = z_ref.shape[0] // C          # sublane pack factor (2 for C=4 -> 8 rows)

    # Full-tile dense loads; explicit f32 upcast (required on v5e, no-op for f32).
    z = z_ref[...].astype(jnp.float32)
    ccc = ccc_ref[...].astype(jnp.float32)
    ccu = ccu_ref[...].astype(jnp.float32)

    pieces = []
    for c in range(C):                                   # unrolled at trace time
        acc = z[c * P:(c + 1) * P, :] + bias_ref[c]      # residual + folded bias
        for k in range(C):
            sl = slice(k * P, (k + 1) * P)
            acc = acc + wz_ref[c * C + k] * z[sl, :]
            acc = acc + wcc_c_ref[c * C + k] * ccc[sl, :]
            acc = acc + wcc_u_ref[c * C + k] * ccu[sl, :]
        pieces.append(acc)

    # Single dense (C*P, BLK) store (fully lane- and sublane-packed).
    out_ref[...] = jnp.concatenate(pieces, axis=0).astype(out_ref.dtype)


def _pack_factor(C: int, HW: int) -> int:
    """Pack factor P so that C*P is a multiple of 8 (full sublane occupancy)."""
    p = 8 // math.gcd(C, 8)
    return p if HW % p == 0 else 1


def _pick_block(width: int, rows: int, itemsize: int,
                vmem_budget: int = 8 << 20) -> int:
    """Largest block width whose double-buffered working set fits the budget.

    bytes/column ~ rows * itemsize * (3 inputs + 1 output) * 2 buffers.
    For the demo (rows=8, f32) that is 256 B/col, so widths up to ~32K columns
    collapse to a single grid step.
    """
    per_col = rows * itemsize * 4 * 2
    max_blk = max(128, vmem_budget // per_col)
    if width <= max_blk:
        return width                       # grid=(1,), full-array block
    blk = (max_blk // 128) * 128
    while blk > 128 and width % blk != 0:
        blk -= 128
    return blk if width % blk == 0 else width


# ----------------------------------------------------------------------------
# JAX wrapper reproducing CFGDenoiser.forward (with the synthetic inner model).
# ----------------------------------------------------------------------------
@jax.jit
def cfg_denoise(z, sigma, cond, uncond, text_cfg_scale, image_cfg_scale, params):
    """z: (1, C, H, W); sigma: (1,); cond/uncond dicts as in the PyTorch module."""
    _, C, H, W = z.shape
    HW = H * W

    t = jnp.asarray(text_cfg_scale, jnp.float32)
    i = jnp.asarray(image_cfg_scale, jnp.float32)
    sig = sigma.reshape(()).astype(jnp.float32)
    c_out = 1.0 / (sig * sig + 1.0)              # sigma-dependent output scale

    # Pre-split the "1x1 conv" weight (no in-kernel concat of [z ; cc]) and fold
    # c_out plus the CFG-scale algebra into the tiny weights.  The exact (linear
    # inner model only!) collapse of the 3-branch CFG combination is
    #   out = z + c_out*( Wz@z + Wcc@(i*cc_c + (1-i)*cc_u)
    #                     + t*proj_c + (1-t)*proj_u + b )
    # with branch coefficients (t, i-t, 1-i) summing to 1.
    w = params['w'].astype(jnp.float32)           # (C, 2C)
    w_z, w_cc = w[:, :C], w[:, C:]                # (C, C) each
    wz_eff = (c_out * w_z).reshape(-1)            # (C*C,) SMEM scalars
    wcc_c_eff = (c_out * i * w_cc).reshape(-1)
    wcc_u_eff = (c_out * (1.0 - i) * w_cc).reshape(-1)

    # Hoisted cross-attn mean-pool + projection, folded with bias + text scale
    # into one (C,) effective bias (already multiplied by c_out).
    ctx_c = jnp.mean(cond['c_crossattn'][0][0].astype(jnp.float32), axis=0)    # (D,)
    ctx_u = jnp.mean(uncond['c_crossattn'][0][0].astype(jnp.float32), axis=0)  # (D,)
    wctx = params['wctx'].astype(jnp.float32)                                  # (C, D)
    proj_c = wctx @ ctx_c                                                      # (C,)
    proj_u = wctx @ ctx_u                                                      # (C,)
    b = params['b'].astype(jnp.float32).reshape(-1)                            # (C,)
    bias_eff = c_out * (t * proj_c + (1.0 - t) * proj_u + b)                   # (C,)
    # TODO(synk): cond['c_crossattn'][1] (extra embedding) is passed through to
    # the real UNet unchanged; the synthetic inner model does not consume it.

    # Sublane repack: (C, HW) -> (C*P, HW/P).  Contiguous (free) reshape: channel
    # c occupies rows c*P .. c*P+P-1 (consecutive spatial chunks of that channel).
    P = _pack_factor(C, HW)
    rows, width = C * P, HW // P

    # Only the UNIQUE big tensors are streamed (no 3x CFG duplication in HBM),
    # in their native dtype.
    z2 = z.reshape(rows, width)
    cc_c = cond['c_concat'][0].reshape(rows, width)
    cc_u = uncond['c_concat'][0].reshape(rows, width)

    blk = _pick_block(width, rows, 4)
    grid = (width // blk,)          # = (1,) for typical latent sizes

    tile = pl.BlockSpec((rows, blk), lambda g: (0, g))
    smem = pl.BlockSpec(memory_space=pltpu.MemorySpace.SMEM)

    out_flat = pl.pallas_call(
        _cfg_denoiser_kernel,
        out_shape=jax.ShapeDtypeStruct((rows, width), z.dtype),
        grid=grid,
        in_specs=[smem, smem, smem, smem, tile, tile, tile],
        out_specs=tile,
        # Single TensorCore: at this size a cross-TC split costs more than the
        # whole kernel.  For very large HW switch to pltpu.CORE_PARALLEL.
        compiler_params=pltpu.CompilerParams(
            dimension_semantics=("arbitrary",)),
    )(wz_eff, wcc_c_eff, wcc_u_eff, bias_eff, z2, cc_c, cc_u)

    return out_flat.reshape(1, C, H, W)


# ----------------------------------------------------------------------------
# Pure-JAX reference: literal 3-branch CFGDenoiser.forward with the same
# synthetic inner model (validates the algebraic collapse + folding exactly).
# ----------------------------------------------------------------------------
def _synthetic_inner_model(cfg_z, cfg_sigma, c_crossattn, c_concat, params):
    w, wctx, b = params['w'], params['wctx'], params['b']
    outs = []
    for n in range(3):
        x = jnp.concatenate([cfg_z[n], c_concat[n]], axis=0)         # (2C, HW)
        h = w @ x                                                     # (C, HW)
        ctx_mean = jnp.mean(c_crossattn[n], axis=0)[:, None]          # (D, 1)
        proj = wctx @ ctx_mean                                        # (C, 1)
        c_out = 1.0 / (cfg_sigma[n] ** 2 + 1.0)
        outs.append(cfg_z[n] + c_out * (h + proj + b))
    return outs


def cfg_denoise_reference(z, sigma, cond, uncond, text_cfg_scale, image_cfg_scale, params):
    _, C, H, W = z.shape
    HW = H * W
    cfg_z = jnp.broadcast_to(z, (3, C, H, W)).reshape(3, C, HW)
    cfg_sigma = jnp.broadcast_to(sigma.reshape(1), (3,)).astype(jnp.float32)
    cfg_crossattn = jnp.concatenate(
        [cond['c_crossattn'][0], uncond['c_crossattn'][0],
         uncond['c_crossattn'][0]], axis=0)                           # (3, T, D)
    cfg_concat = jnp.concatenate(
        [cond['c_concat'][0], cond['c_concat'][0],
         uncond['c_concat'][0]], axis=0).reshape(3, C, HW)            # (3, C, HW)
    out_cond, out_img_cond, out_uncond = _synthetic_inner_model(
        cfg_z, cfg_sigma, cfg_crossattn, cfg_concat, params)
    t, i = text_cfg_scale, image_cfg_scale
    out = out_uncond + t * (out_cond - out_img_cond) + i * (out_img_cond - out_uncond)
    return out.reshape(1, C, H, W)


def make_params(C, D, key):
    k1, k2, k3 = jax.random.split(key, 3)
    return {
        'w':    0.1 * jax.random.normal(k1, (C, 2 * C), dtype=jnp.float32),
        'wctx': 0.1 * jax.random.normal(k2, (C, D), dtype=jnp.float32),
        'b':    0.1 * jax.random.normal(k3, (C, 1), dtype=jnp.float32),
    }


if __name__ == "__main__":
    # Latent (1, 4, 64, 64) (instruct-pix2pix 512x512 image latent), text
    # context (1, 8, 32), extra embedding (1, 32).  HW = 4096 -> packed tile
    # (8, 2048), single grid step.
    C, H, W, T, D = 4, 64, 64, 8, 32
    key = jax.random.PRNGKey(0)
    kz, kc, ku, kcc, kuc, ke, kp = jax.random.split(key, 7)

    z = jax.random.normal(kz, (1, C, H, W), dtype=jnp.float32)
    sigma = jnp.array([1.5], dtype=jnp.float32)
    cond = {
        'c_crossattn': [jax.random.normal(kc, (1, T, D), dtype=jnp.float32),
                        jax.random.normal(ke, (1, D), dtype=jnp.float32)],
        'c_concat':    [jax.random.normal(kcc, (1, C, H, W), dtype=jnp.float32)],
    }
    uncond = {
        'c_crossattn': [jax.random.normal(ku, (1, T, D), dtype=jnp.float32),
                        jnp.zeros((1, D), dtype=jnp.float32)],
        'c_concat':    [jax.random.normal(kuc, (1, C, H, W), dtype=jnp.float32)],
    }
    params = make_params(C, D, kp)

    ref = cfg_denoise_reference(z, sigma, cond, uncond, 7.5, 1.5, params)
    out = cfg_denoise(z, sigma, cond, uncond, 7.5, 1.5, params)
    jax.block_until_ready(out)

    assert out.shape == (1, C, H, W)
    assert out.dtype == z.dtype
    max_err = float(jnp.max(jnp.abs(out.astype(jnp.float32) - ref)))
    assert max_err < 1e-4, f"kernel deviates from 3-branch reference: {max_err}"
    print("KERNEL_OK")
</pallas_src>

<mosaic_0001>
module attributes {stable_mosaic.version = 11 : i64} {
  func.func @_cfg_denoiser_kernel(%arg0: i32, %arg1: memref<16xf32, #tpu.memory_space<smem>>, %arg2: memref<16xf32, #tpu.memory_space<smem>>, %arg3: memref<16xf32, #tpu.memory_space<smem>>, %arg4: memref<4xf32, #tpu.memory_space<smem>>, %arg5: memref<8x2048xf32, #tpu.memory_space<vmem>>, %arg6: memref<8x2048xf32, #tpu.memory_space<vmem>>, %arg7: memref<8x2048xf32, #tpu.memory_space<vmem>>, %arg8: memref<8x2048xf32, #tpu.memory_space<vmem>>) attributes {dimension_semantics = [#tpu.dimension_semantics<arbitrary>], iteration_bounds = array<i64: 1>, scalar_prefetch = 0 : i64, scratch_operands = 0 : i64, tpu.core_type = #tpu.core_type<tc>, window_params = [{transform_indices = @transform_0, window_bounds = array<i64: 16>}, {transform_indices = @transform_1, window_bounds = array<i64: 16>}, {transform_indices = @transform_2, window_bounds = array<i64: 16>}, {transform_indices = @transform_3, window_bounds = array<i64: 4>}, {transform_indices = @transform_4, window_bounds = array<i64: 8, 2048>}, {transform_indices = @transform_5, window_bounds = array<i64: 8, 2048>}, {transform_indices = @transform_6, window_bounds = array<i64: 8, 2048>}, {transform_indices = @transform_7, window_bounds = array<i64: 8, 2048>}]} {
    %c0 = arith.constant 0 : index
    %c0_0 = arith.constant 0 : index
    %0 = vector.load %arg5[%c0, %c0_0] : memref<8x2048xf32, #tpu.memory_space<vmem>>, vector<8x2048xf32>
    %c0_1 = arith.constant 0 : index
    %c0_2 = arith.constant 0 : index
    %1 = vector.load %arg6[%c0_1, %c0_2] : memref<8x2048xf32, #tpu.memory_space<vmem>>, vector<8x2048xf32>
    %c0_3 = arith.constant 0 : index
    %c0_4 = arith.constant 0 : index
    %2 = vector.load %arg7[%c0_3, %c0_4] : memref<8x2048xf32, #tpu.memory_space<vmem>>, vector<8x2048xf32>
    %3 = vector.extract_strided_slice %0 {offsets = [0, 0], sizes = [2, 2048], strides = [1, 1]} : vector<8x2048xf32> to vector<2x2048xf32>
    %c0_5 = arith.constant 0 : index
    %4 = memref.load %arg4[%c0_5] : memref<4xf32, #tpu.memory_space<smem>>
    %5 = vector.broadcast %4 : f32 to vector<2x2048xf32>
    %6 = arith.addf %3, %5 : vector<2x2048xf32>
    %c0_6 = arith.constant 0 : index
    %7 = memref.load %arg1[%c0_6] : memref<16xf32, #tpu.memory_space<smem>>
    %8 = vector.extract_strided_slice %0 {offsets = [0, 0], sizes = [2, 2048], strides = [1, 1]} : vector<8x2048xf32> to vector<2x2048xf32>
    %9 = vector.broadcast %7 : f32 to vector<2x2048xf32>
    %10 = arith.mulf %9, %8 : vector<2x2048xf32>
    %11 = arith.addf %6, %10 : vector<2x2048xf32>
    %c0_7 = arith.constant 0 : index
    %12 = memref.load %arg2[%c0_7] : memref<16xf32, #tpu.memory_space<smem>>
    %13 = vector.extract_strided_slice %1 {offsets = [0, 0], sizes = [2, 2048], strides = [1, 1]} : vector<8x2048xf32> to vector<2x2048xf32>
    %14 = vector.broadcast %12 : f32 to vector<2x2048xf32>
    %15 = arith.mulf %14, %13 : vector<2x2048xf32>
    %16 = arith.addf %11, %15 : vector<2x2048xf32>
    %c0_8 = arith.constant 0 : index
    %17 = memref.load %arg3[%c0_8] : memref<16xf32, #tpu.memory_space<smem>>
    %18 = vector.extract_strided_slice %2 {offsets = [0, 0], sizes = [2, 2048], strides = [1, 1]} : vector<8x2048xf32> to vector<2x2048xf32>
    %19 = vector.broadcast %17 : f32 to vector<2x2048xf32>
    %20 = arith.mulf %19, %18 : vector<2x2048xf32>
    %21 = arith.addf %16, %20 : vector<2x2048xf32>
    %c1 = arith.constant 1 : index
    %22 = memref.load %arg1[%c1] : memref<16xf32, #tpu.memory_space<smem>>
    %23 = vector.extract_strided_slice %0 {offsets = [2, 0], sizes = [2, 2048], strides = [1, 1]} : vector<8x2048xf32> to vector<2x2048xf32>
    %24 = vector.broadcast %22 : f32 to vector<2x2048xf32>
    %25 = arith.mulf %24, %23 : vector<2x2048xf32>
    %26 = arith.addf %21, %25 : vector<2x2048xf32>
    %c1_9 = arith.constant 1 : index
    %27 = memref.load %arg2[%c1_9] : memref<16xf32, #tpu.memory_space<smem>>
    %28 = vector.extract_strided_slice %1 {offsets = [2, 0], sizes = [2, 2048], strides = [1, 1]} : vector<8x2048xf32> to vector<2x2048xf32>
    %29 = vector.broadcast %27 : f32 to vector<2x2048xf32>
    %30 = arith.mulf %29, %28 : vector<2x2048xf32>
    %31 = arith.addf %26, %30 : vector<2x2048xf32>
    %c1_10 = arith.constant 1 : index
    %32 = memref.load %arg3[%c1_10] : memref<16xf32, #tpu.memory_space<smem>>
    %33 = vector.extract_strided_slice %2 {offsets = [2, 0], sizes = [2, 2048], strides = [1, 1]} : vector<8x2048xf32> to vector<2x2048xf32>
    %34 = vector.broadcast %32 : f32 to vector<2x2048xf32>
    %35 = arith.mulf %34, %33 : vector<2x2048xf32>
    %36 = arith.addf %31, %35 : vector<2x2048xf32>
    %c2 = arith.constant 2 : index
    %37 = memref.load %arg1[%c2] : memref<16xf32, #tpu.memory_space<smem>>
    %38 = vector.extract_strided_slice %0 {offsets = [4, 0], sizes = [2, 2048], strides = [1, 1]} : vector<8x2048xf32> to vector<2x2048xf32>
    %39 = vector.broadcast %37 : f32 to vector<2x2048xf32>
    %40 = arith.mulf %39, %38 : vector<2x2048xf32>
    %41 = arith.addf %36, %40 : vector<2x2048xf32>
    %c2_11 = arith.constant 2 : index
    %42 = memref.load %arg2[%c2_11] : memref<16xf32, #tpu.memory_space<smem>>
    %43 = vector.extract_strided_slice %1 {offsets = [4, 0], sizes = [2, 2048], strides = [1, 1]} : vector<8x2048xf32> to vector<2x2048xf32>
    %44 = vector.broadcast %42 : f32 to vector<2x2048xf32>
    %45 = arith.mulf %44, %43 : vector<2x2048xf32>
    %46 = arith.addf %41, %45 : vector<2x2048xf32>
    %c2_12 = arith.constant 2 : index
    %47 = memref.load %arg3[%c2_12] : memref<16xf32, #tpu.memory_space<smem>>
    %48 = vector.extract_strided_slice %2 {offsets = [4, 0], sizes = [2, 2048], strides = [1, 1]} : vector<8x2048xf32> to vector<2x2048xf32>
    %49 = vector.broadcast %47 : f32 to vector<2x2048xf32>
    %50 = arith.mulf %49, %48 : vector<2x2048xf32>
    %51 = arith.addf %46, %50 : vector<2x2048xf32>
    %c3 = arith.constant 3 : index
    %52 = memref.load %arg1[%c3] : memref<16xf32, #tpu.memory_space<smem>>
    %53 = vector.extract_strided_slice %0 {offsets = [6, 0], sizes = [2, 2048], strides = [1, 1]} : vector<8x2048xf32> to vector<2x2048xf32>
    %54 = vector.broadcast %52 : f32 to vector<2x2048xf32>
    %55 = arith.mulf %54, %53 : vector<2x2048xf32>
    %56 = arith.addf %51, %55 : vector<2x2048xf32>
    %c3_13 = arith.constant 3 : index
    %57 = memref.load %arg2[%c3_13] : memref<16xf32, #tpu.memory_space<smem>>
    %58 = vector.extract_strided_slice %1 {offsets = [6, 0], sizes = [2, 2048], strides = [1, 1]} : vector<8x2048xf32> to vector<2x2048xf32>
    %59 = vector.broadcast %57 : f32 to vector<2x2048xf32>
    %60 = arith.mulf %59, %58 : vector<2x2048xf32>
    %61 = arith.addf %56, %60 : vector<2x2048xf32>
    %c3_14 = arith.constant 3 : index
    %62 = memref.load %arg3[%c3_14] : memref<16xf32, #tpu.memory_space<smem>>
    %63 = vector.extract_strided_slice %2 {offsets = [6, 0], sizes = [2, 2048], strides = [1, 1]} : vector<8x2048xf32> to vector<2x2048xf32>
    %64 = vector.broadcast %62 : f32 to vector<2x2048xf32>
    %65 = arith.mulf %64, %63 : vector<2x2048xf32>
    %66 = arith.addf %61, %65 : vector<2x2048xf32>
    %67 = vector.extract_strided_slice %0 {offsets = [2, 0], sizes = [2, 2048], strides = [1, 1]} : vector<8x2048xf32> to vector<2x2048xf32>
    %c1_15 = arith.constant 1 : index
    %68 = memref.load %arg4[%c1_15] : memref<4xf32, #tpu.memory_space<smem>>
    %69 = vector.broadcast %68 : f32 to vector<2x2048xf32>
    %70 = arith.addf %67, %69 : vector<2x2048xf32>
    %c4 = arith.constant 4 : index
    %71 = memref.load %arg1[%c4] : memref<16xf32, #tpu.memory_space<smem>>
    %72 = vector.extract_strided_slice %0 {offsets = [0, 0], sizes = [2, 2048], strides = [1, 1]} : vector<8x2048xf32> to vector<2x2048xf32>
    %73 = vector.broadcast %71 : f32 to vector<2x2048xf32>
    %74 = arith.mulf %73, %72 : vector<2x2048xf32>
    %75 = arith.addf %70, %74 : vector<2x2048xf32>
    %c4_16 = arith.constant 4 : index
    %76 = memref.load %arg2[%c4_16] : memref<16xf32, #tpu.memory_space<smem>>
    %77 = vector.extract_strided_slice %1 {offsets = [0, 0], sizes = [2, 2048], strides = [1, 1]} : vector<8x2048xf32> to vector<2x2048xf32>
    %78 = vector.broadcast %76 : f32 to vector<2x2048xf32>
    %79 = arith.mulf %78, %77 : vector<2x2048xf32>
    %80 = arith.addf %75, %79 : vector<2x2048xf32>
    %c4_17 = arith.constant 4 : index
    %81 = memref.load %arg3[%c4_17] : memref<16xf32, #tpu.memory_space<smem>>
    %82 = vector.extract_strided_slice %2 {offsets = [0, 0], sizes = [2, 2048], strides = [1, 1]} : vector<8x2048xf32> to vector<2x2048xf32>
    %83 = vector.broadcast %81 : f32 to vector<2x2048xf32>
    %84 = arith.mulf %83, %82 : vector<2x2048xf32>
    %85 = arith.addf %80, %84 : vector<2x2048xf32>
    %c5 = arith.constant 5 : index
    %86 = memref.load %arg1[%c5] : memref<16xf32, #tpu.memory_space<smem>>
    %87 = vector.extract_strided_slice %0 {offsets = [2, 0], sizes = [2, 2048], strides = [1, 1]} : vector<8x2048xf32> to vector<2x2048xf32>
    %88 = vector.broadcast %86 : f32 to vector<2x2048xf32>
    %89 = arith.mulf %88, %87 : vector<2x2048xf32>
    %90 = arith.addf %85, %89 : vector<2x2048xf32>
    %c5_18 = arith.constant 5 : index
    %91 = memref.load %arg2[%c5_18] : memref<16xf32, #tpu.memory_space<smem>>
    %92 = vector.extract_strided_slice %1 {offsets = [2, 0], sizes = [2, 2048], strides = [1, 1]} : vector<8x2048xf32> to vector<2x2048xf32>
    %93 = vector.broadcast %91 : f32 to vector<2x2048xf32>
    %94 = arith.mulf %93, %92 : vector<2x2048xf32>
    %95 = arith.addf %90, %94 : vector<2x2048xf32>
    %c5_19 = arith.constant 5 : index
    %96 = memref.load %arg3[%c5_19] : memref<16xf32, #tpu.memory_space<smem>>
    %97 = vector.extract_strided_slice %2 {offsets = [2, 0], sizes = [2, 2048], strides = [1, 1]} : vector<8x2048xf32> to vector<2x2048xf32>
    %98 = vector.broadcast %96 : f32 to vector<2x2048xf32>
    %99 = arith.mulf %98, %97 : vector<2x2048xf32>
    %100 = arith.addf %95, %99 : vector<2x2048xf32>
    %c6 = arith.constant 6 : index
    %101 = memref.load %arg1[%c6] : memref<16xf32, #tpu.memory_space<smem>>
    %102 = vector.extract_strided_slice %0 {offsets = [4, 0], sizes = [2, 2048], strides = [1, 1]} : vector<8x2048xf32> to vector<2x2048xf32>
    %103 = vector.broadcast %101 : f32 to vector<2x2048xf32>
    %104 = arith.mulf %103, %102 : vector<2x2048xf32>
    %105 = arith.addf %100, %104 : vector<2x2048xf32>
    %c6_20 = arith.constant 6 : index
    %106 = memref.load %arg2[%c6_20] : memref<16xf32, #tpu.memory_space<smem>>
    %107 = vector.extract_strided_slice %1 {offsets = [4, 0], sizes = [2, 2048], strides = [1, 1]} : vector<8x2048xf32> to vector<2x2048xf32>
    %108 = vector.broadcast %106 : f32 to vector<2x2048xf32>
    %109 = arith.mulf %108, %107 : vector<2x2048xf32>
    %110 = arith.addf %105, %109 : vector<2x2048xf32>
    %c6_21 = arith.constant 6 : index
    %111 = memref.load %arg3[%c6_21] : memref<16xf32, #tpu.memory_space<smem>>
    %112 = vector.extract_strided_slice %2 {offsets = [4, 0], sizes = [2, 2048], strides = [1, 1]} : vector<8x2048xf32> to vector<2x2048xf32>
    %113 = vector.broadcast %111 : f32 to vector<2x2048xf32>
    %114 = arith.mulf %113, %112 : vector<2x2048xf32>
    %115 = arith.addf %110, %114 : vector<2x2048xf32>
    %c7 = arith.constant 7 : index
    %116 = memref.load %arg1[%c7] : memref<16xf32, #tpu.memory_space<smem>>
    %117 = vector.extract_strided_slice %0 {offsets = [6, 0], sizes = [2, 2048], strides = [1, 1]} : vector<8x2048xf32> to vector<2x2048xf32>
    %118 = vector.broadcast %116 : f32 to vector<2x2048xf32>
    %119 = arith.mulf %118, %117 : vector<2x2048xf32>
    %120 = arith.addf %115, %119 : vector<2x2048xf32>
    %c7_22 = arith.constant 7 : index
    %121 = memref.load %arg2[%c7_22] : memref<16xf32, #tpu.memory_space<smem>>
    %122 = vector.extract_strided_slice %1 {offsets = [6, 0], sizes = [2, 2048], strides = [1, 1]} : vector<8x2048xf32> to vector<2x2048xf32>
    %123 = vector.broadcast %121 : f32 to vector<2x2048xf32>
    %124 = arith.mulf %123, %122 : vector<2x2048xf32>
    %125 = arith.addf %120, %124 : vector<2x2048xf32>
    %c7_23 = arith.constant 7 : index
    %126 = memref.load %arg3[%c7_23] : memref<16xf32, #tpu.memory_space<smem>>
    %127 = vector.extract_strided_slice %2 {offsets = [6, 0], sizes = [2, 2048], strides = [1, 1]} : vector<8x2048xf32> to vector<2x2048xf32>
    %128 = vector.broadcast %126 : f32 to vector<2x2048xf32>
    %129 = arith.mulf %128, %127 : vector<2x2048xf32>
    %130 = arith.addf %125, %129 : vector<2x2048xf32>
    %131 = vector.extract_strided_slice %0 {offsets = [4, 0], sizes = [2, 2048], strides = [1, 1]} : vector<8x2048xf32> to vector<2x2048xf32>
    %c2_24 = arith.constant 2 : index
    %132 = memref.load %arg4[%c2_24] : memref<4xf32, #tpu.memory_space<smem>>
    %133 = vector.broadcast %132 : f32 to vector<2x2048xf32>
    %134 = arith.addf %131, %133 : vector<2x2048xf32>
    %c8 = arith.constant 8 : index
    %135 = memref.load %arg1[%c8] : memref<16xf32, #tpu.memory_space<smem>>
    %136 = vector.extract_strided_slice %0 {offsets = [0, 0], sizes = [2, 2048], strides = [1, 1]} : vector<8x2048xf32> to vector<2x2048xf32>
    %137 = vector.broadcast %135 : f32 to vector<2x2048xf32>
    %138 = arith.mulf %137, %136 : vector<2x2048xf32>
    %139 = arith.addf %134, %138 : vector<2x2048xf32>
    %c8_25 = arith.constant 8 : index
    %140 = memref.load %arg2[%c8_25] : memref<16xf32, #tpu.memory_space<smem>>
    %141 = vector.extract_strided_slice %1 {offsets = [0, 0], sizes = [2, 2048], strides = [1, 1]} : vector<8x2048xf32> to vector<2x2048xf32>
    %142 = vector.broadcast %140 : f32 to vector<2x2048xf32>
    %143 = arith.mulf %142, %141 : vector<2x2048xf32>
    %144 = arith.addf %139, %143 : vector<2x2048xf32>
    %c8_26 = arith.constant 8 : index
    %145 = memref.load %arg3[%c8_26] : memref<16xf32, #tpu.memory_space<smem>>
    %146 = vector.extract_strided_slice %2 {offsets = [0, 0], sizes = [2, 2048], strides = [1, 1]} : vector<8x2048xf32> to vector<2x2048xf32>
    %147 = vector.broadcast %145 : f32 to vector<2x2048xf32>
    %148 = arith.mulf %147, %146 : vector<2x2048xf32>
    %149 = arith.addf %144, %148 : vector<2x2048xf32>
    %c9 = arith.constant 9 : index
    %150 = memref.load %arg1[%c9] : memref<16xf32, #tpu.memory_space<smem>>
    %151 = vector.extract_strided_slice %0 {offsets = [2, 0], sizes = [2, 2048], strides = [1, 1]} : vector<8x2048xf32> to vector<2x2048xf32>
    %152 = vector.broadcast %150 : f32 to vector<2x2048xf32>
    %153 = arith.mulf %152, %151 : vector<2x2048xf32>
    %154 = arith.addf %149, %153 : vector<2x2048xf32>
    %c9_27 = arith.constant 9 : index
    %155 = memref.load %arg2[%c9_27] : memref<16xf32, #tpu.memory_space<smem>>
    %156 = vector.extract_strided_slice %1 {offsets = [2, 0], sizes = [2, 2048], strides = [1, 1]} : vector<8x2048xf32> to vector<2x2048xf32>
    %157 = vector.broadcast %155 : f32 to vector<2x2048xf32>
    %158 = arith.mulf %157, %156 : vector<2x2048xf32>
    %159 = arith.addf %154, %158 : vector<2x2048xf32>
    %c9_28 = arith.constant 9 : index
    %160 = memref.load %arg3[%c9_28] : memref<16xf32, #tpu.memory_space<smem>>
    %161 = vector.extract_strided_slice %2 {offsets = [2, 0], sizes = [2, 2048], strides = [1, 1]} : vector<8x2048xf32> to vector<2x2048xf32>
    %162 = vector.broadcast %160 : f32 to vector<2x2048xf32>
    %163 = arith.mulf %162, %161 : vector<2x2048xf32>
    %164 = arith.addf %159, %163 : vector<2x2048xf32>
    %c10 = arith.constant 10 : index
    %165 = memref.load %arg1[%c10] : memref<16xf32, #tpu.memory_space<smem>>
    %166 = vector.extract_strided_slice %0 {offsets = [4, 0], sizes = [2, 2048], strides = [1, 1]} : vector<8x2048xf32> to vector<2x2048xf32>
    %167 = vector.broadcast %165 : f32 to vector<2x2048xf32>
    %168 = arith.mulf %167, %166 : vector<2x2048xf32>
    %169 = arith.addf %164, %168 : vector<2x2048xf32>
    %c10_29 = arith.constant 10 : index
    %170 = memref.load %arg2[%c10_29] : memref<16xf32, #tpu.memory_space<smem>>
    %171 = vector.extract_strided_slice %1 {offsets = [4, 0], sizes = [2, 2048], strides = [1, 1]} : vector<8x2048xf32> to vector<2x2048xf32>
    %172 = vector.broadcast %170 : f32 to vector<2x2048xf32>
    %173 = arith.mulf %172, %171 : vector<2x2048xf32>
    %174 = arith.addf %169, %173 : vector<2x2048xf32>
    %c10_30 = arith.constant 10 : index
    %175 = memref.load %arg3[%c10_30] : memref<16xf32, #tpu.memory_space<smem>>
    %176 = vector.extract_strided_slice %2 {offsets = [4, 0], sizes = [2, 2048], strides = [1, 1]} : vector<8x2048xf32> to vector<2x2048xf32>
    %177 = vector.broadcast %175 : f32 to vector<2x2048xf32>
    %178 = arith.mulf %177, %176 : vector<2x2048xf32>
    %179 = arith.addf %174, %178 : vector<2x2048xf32>
    %c11 = arith.constant 11 : index
    %180 = memref.load %arg1[%c11] : memref<16xf32, #tpu.memory_space<smem>>
    %181 = vector.extract_strided_slice %0 {offsets = [6, 0], sizes = [2, 2048], strides = [1, 1]} : vector<8x2048xf32> to vector<2x2048xf32>
    %182 = vector.broadcast %180 : f32 to vector<2x2048xf32>
    %183 = arith.mulf %182, %181 : vector<2x2048xf32>
    %184 = arith.addf %179, %183 : vector<2x2048xf32>
    %c11_31 = arith.constant 11 : index
    %185 = memref.load %arg2[%c11_31] : memref<16xf32, #tpu.memory_space<smem>>
    %186 = vector.extract_strided_slice %1 {offsets = [6, 0], sizes = [2, 2048], strides = [1, 1]} : vector<8x2048xf32> to vector<2x2048xf32>
    %187 = vector.broadcast %185 : f32 to vector<2x2048xf32>
    %188 = arith.mulf %187, %186 : vector<2x2048xf32>
    %189 = arith.addf %184, %188 : vector<2x2048xf32>
    %c11_32 = arith.constant 11 : index
    %190 = memref.load %arg3[%c11_32] : memref<16xf32, #tpu.memory_space<smem>>
    %191 = vector.extract_strided_slice %2 {offsets = [6, 0], sizes = [2, 2048], strides = [1, 1]} : vector<8x2048xf32> to vector<2x2048xf32>
    %192 = vector.broadcast %190 : f32 to vector<2x2048xf32>
    %193 = arith.mulf %192, %191 : vector<2x2048xf32>
    %194 = arith.addf %189, %193 : vector<2x2048xf32>
    %195 = vector.extract_strided_slice %0 {offsets = [6, 0], sizes = [2, 2048], strides = [1, 1]} : vector<8x2048xf32> to vector<2x2048xf32>
    %c3_33 = arith.constant 3 : index
    %196 = memref.load %arg4[%c3_33] : memref<4xf32, #tpu.memory_space<smem>>
    %197 = vector.broadcast %196 : f32 to vector<2x2048xf32>
    %198 = arith.addf %195, %197 : vector<2x2048xf32>
    %c12 = arith.constant 12 : index
    %199 = memref.load %arg1[%c12] : memref<16xf32, #tpu.memory_space<smem>>
    %200 = vector.extract_strided_slice %0 {offsets = [0, 0], sizes = [2, 2048], strides = [1, 1]} : vector<8x2048xf32> to vector<2x2048xf32>
    %201 = vector.broadcast %199 : f32 to vector<2x2048xf32>
    %202 = arith.mulf %201, %200 : vector<2x2048xf32>
    %203 = arith.addf %198, %202 : vector<2x2048xf32>
    %c12_34 = arith.constant 12 : index
    %204 = memref.load %arg2[%c12_34] : memref<16xf32, #tpu.memory_space<smem>>
    %205 = vector.extract_strided_slice %1 {offsets = [0, 0], sizes = [2, 2048], strides = [1, 1]} : vector<8x2048xf32> to vector<2x2048xf32>
    %206 = vector.broadcast %204 : f32 to vector<2x2048xf32>
    %207 = arith.mulf %206, %205 : vector<2x2048xf32>
    %208 = arith.addf %203, %207 : vector<2x2048xf32>
    %c12_35 = arith.constant 12 : index
    %209 = memref.load %arg3[%c12_35] : memref<16xf32, #tpu.memory_space<smem>>
    %210 = vector.extract_strided_slice %2 {offsets = [0, 0], sizes = [2, 2048], strides = [1, 1]} : vector<8x2048xf32> to vector<2x2048xf32>
    %211 = vector.broadcast %209 : f32 to vector<2x2048xf32>
    %212 = arith.mulf %211, %210 : vector<2x2048xf32>
    %213 = arith.addf %208, %212 : vector<2x2048xf32>
    %c13 = arith.constant 13 : index
    %214 = memref.load %arg1[%c13] : memref<16xf32, #tpu.memory_space<smem>>
    %215 = vector.extract_strided_slice %0 {offsets = [2, 0], sizes = [2, 2048], strides = [1, 1]} : vector<8x2048xf32> to vector<2x2048xf32>
    %216 = vector.broadcast %214 : f32 to vector<2x2048xf32>
    %217 = arith.mulf %216, %215 : vector<2x2048xf32>
    %218 = arith.addf %213, %217 : vector<2x2048xf32>
    %c13_36 = arith.constant 13 : index
    %219 = memref.load %arg2[%c13_36] : memref<16xf32, #tpu.memory_space<smem>>
    %220 = vector.extract_strided_slice %1 {offsets = [2, 0], sizes = [2, 2048], strides = [1, 1]} : vector<8x2048xf32> to vector<2x2048xf32>
    %221 = vector.broadcast %219 : f32 to vector<2x2048xf32>
    %222 = arith.mulf %221, %220 : vector<2x2048xf32>
    %223 = arith.addf %218, %222 : vector<2x2048xf32>
    %c13_37 = arith.constant 13 : index
    %224 = memref.load %arg3[%c13_37] : memref<16xf32, #tpu.memory_space<smem>>
    %225 = vector.extract_strided_slice %2 {offsets = [2, 0], sizes = [2, 2048], strides = [1, 1]} : vector<8x2048xf32> to vector<2x2048xf32>
    %226 = vector.broadcast %224 : f32 to vector<2x2048xf32>
    %227 = arith.mulf %226, %225 : vector<2x2048xf32>
    %228 = arith.addf %223, %227 : vector<2x2048xf32>
    %c14 = arith.constant 14 : index
    %229 = memref.load %arg1[%c14] : memref<16xf32, #tpu.memory_space<smem>>
    %230 = vector.extract_strided_slice %0 {offsets = [4, 0], sizes = [2, 2048], strides = [1, 1]} : vector<8x2048xf32> to vector<2x2048xf32>
    %231 = vector.broadcast %229 : f32 to vector<2x2048xf32>
    %232 = arith.mulf %231, %230 : vector<2x2048xf32>
    %233 = arith.addf %228, %232 : vector<2x2048xf32>
    %c14_38 = arith.constant 14 : index
    %234 = memref.load %arg2[%c14_38] : memref<16xf32, #tpu.memory_space<smem>>
    %235 = vector.extract_strided_slice %1 {offsets = [4, 0], sizes = [2, 2048], strides = [1, 1]} : vector<8x2048xf32> to vector<2x2048xf32>
    %236 = vector.broadcast %234 : f32 to vector<2x2048xf32>
    %237 = arith.mulf %236, %235 : vector<2x2048xf32>
    %238 = arith.addf %233, %237 : vector<2x2048xf32>
    %c14_39 = arith.constant 14 : index
    %239 = memref.load %arg3[%c14_39] : memref<16xf32, #tpu.memory_space<smem>>
    %240 = vector.extract_strided_slice %2 {offsets = [4, 0], sizes = [2, 2048], strides = [1, 1]} : vector<8x2048xf32> to vector<2x2048xf32>
    %241 = vector.broadcast %239 : f32 to vector<2x2048xf32>
    %242 = arith.mulf %241, %240 : vector<2x2048xf32>
    %243 = arith.addf %238, %242 : vector<2x2048xf32>
    %c15 = arith.constant 15 : index
    %244 = memref.load %arg1[%c15] : memref<16xf32, #tpu.memory_space<smem>>
    %245 = vector.extract_strided_slice %0 {offsets = [6, 0], sizes = [2, 2048], strides = [1, 1]} : vector<8x2048xf32> to vector<2x2048xf32>
    %246 = vector.broadcast %244 : f32 to vector<2x2048xf32>
    %247 = arith.mulf %246, %245 : vector<2x2048xf32>
    %248 = arith.addf %243, %247 : vector<2x2048xf32>
    %c15_40 = arith.constant 15 : index
    %249 = memref.load %arg2[%c15_40] : memref<16xf32, #tpu.memory_space<smem>>
    %250 = vector.extract_strided_slice %1 {offsets = [6, 0], sizes = [2, 2048], strides = [1, 1]} : vector<8x2048xf32> to vector<2x2048xf32>
    %251 = vector.broadcast %249 : f32 to vector<2x2048xf32>
    %252 = arith.mulf %251, %250 : vector<2x2048xf32>
    %253 = arith.addf %248, %252 : vector<2x2048xf32>
    %c15_41 = arith.constant 15 : index
    %254 = memref.load %arg3[%c15_41] : memref<16xf32, #tpu.memory_space<smem>>
    %255 = vector.extract_strided_slice %2 {offsets = [6, 0], sizes = [2, 2048], strides = [1, 1]} : vector<8x2048xf32> to vector<2x2048xf32>
    %256 = vector.broadcast %254 : f32 to vector<2x2048xf32>
    %257 = arith.mulf %256, %255 : vector<2x2048xf32>
    %258 = arith.addf %253, %257 : vector<2x2048xf32>
    %259 = tpu.concatenate %66, %130, %194, %258 in 0 : vector<2x2048xf32>, vector<2x2048xf32>, vector<2x2048xf32>, vector<2x2048xf32> -> vector<8x2048xf32>
    %c0_42 = arith.constant 0 : index
    %c0_43 = arith.constant 0 : index
    %260 = vector.load %arg8[%c0_42, %c0_43] : memref<8x2048xf32, #tpu.memory_space<vmem>>, vector<8x2048xf32>
    tpu.vector_store %arg8[%c0_42, %c0_43], %259 {strides = array<i32>} : memref<8x2048xf32, #tpu.memory_space<vmem>>, vector<8x2048xf32>,
    return
  }
  func.func @transform_0(%arg0: i32) -> i32 {
    %c0_i32 = arith.constant 0 : i32
    %c0_i32_0 = arith.constant 0 : i32
    return %c0_i32 : i32
  }
  func.func @transform_1(%arg0: i32) -> i32 {
    %c0_i32 = arith.constant 0 : i32
    %c0_i32_0 = arith.constant 0 : i32
    return %c0_i32 : i32
  }
  func.func @transform_2(%arg0: i32) -> i32 {
    %c0_i32 = arith.constant 0 : i32
    %c0_i32_0 = arith.constant 0 : i32
    return %c0_i32 : i32
  }
  func.func @transform_3(%arg0: i32) -> i32 {
    %c0_i32 = arith.constant 0 : i32
    %c0_i32_0 = arith.constant 0 : i32
    return %c0_i32 : i32
  }
  func.func @transform_4(%arg0: i32) -> (i32, i32) {
    %c0_i32 = arith.constant 0 : i32
    %c0_i32_0 = arith.constant 0 : i32
    return %c0_i32, %arg0 : i32, i32
  }
  func.func @transform_5(%arg0: i32) -> (i32, i32) {
    %c0_i32 = arith.constant 0 : i32
    %c0_i32_0 = arith.constant 0 : i32
    return %c0_i32, %arg0 : i32, i32
  }
  func.func @transform_6(%arg0: i32) -> (i32, i32) {
    %c0_i32 = arith.constant 0 : i32
    %c0_i32_0 = arith.constant 0 : i32
    return %c0_i32, %arg0 : i32, i32
  }
  func.func @transform_7(%arg0: i32) -> (i32, i32) {
    %c0_i32 = arith.constant 0 : i32
    %c0_i32_0 = arith.constant 0 : i32
    return %c0_i32, %arg0 : i32, i32
  }
}

</mosaic_0001>

<bundles_post_ra>
// kernel: cfg_denoise.1
= control target key start
LH: loop header
LB: loop body
LE: loop exit
PB: predicated region body
PF: predicated region fallthrough
CT: control target
= control target key end

     0   :  { %12 = vsyncpa [#allocation3], 0  ;;  %s7013_s0 = inlined_call_operand.vmem [shape: f32[16], index: 0, kind: input, shape index: {}]   ;;  %s7014_s1 = inlined_call_operand.vmem [shape: f32[16], index: 1, kind: input, shape index: {}]   ;;  %s7015_s2 = inlined_call_operand.vmem [shape: f32[16], index: 2, kind: input, shape index: {}]   ;;  %s7016_s3 = inlined_call_operand.vmem [shape: f32[4], index: 3, kind: input, shape index: {}]   ;;  %s7017_s4 = inlined_call_operand.vmem [shape: f32[8,2048], index: 4, kind: input, shape index: {}]   ;;  %s7018_s5 = inlined_call_operand.vmem [shape: f32[8,2048], index: 5, kind: input, shape index: {}]   ;;  %s7019_s6 = inlined_call_operand.vmem [shape: f32[8,2048], index: 6, kind: input, shape index: {}]   ;;  %s7020_s7 = inlined_call_operand.vmem [shape: f32[8,2048], index: 7, kind: output, shape index: {}]  }
   0x1   :  { %13 = vsyncpa [#allocation5], 0  ;;  %s29_s26 = sshll.u32 %s7014_s1, 4  ;;  %s30_s26 = int_to_ptr.vmem [resolvable:$true] %s29_s26 }
   0x2   :  { %14 = vsyncpa [#allocation8], 0  ;;  %s20_s29 = sshll.u32 %s7013_s0, 4  ;;  %s3878_s30 = smov [#allocation4]   ;;  %s21_s29 = int_to_ptr.vmem [resolvable:$true] %s20_s29 }
   0x3   :  { %32 = dma.vmem_to_smem %s30_s26, 16, %s3878_s30, [#allocation5]  }
   0x4   :  { %s3879_s8 = smov [#allocation2]   ;;  %s38_s11 = sshll.u32 %s7015_s2, 4  ;;  %s39_s11 = int_to_ptr.vmem [resolvable:$true] %s38_s11 }
   0x5   :  { %23 = dma.vmem_to_smem %s21_s29, 16, %s3879_s8, [#allocation3]  }
   0x6   :  { %s47_s1 = sshll.u32 %s7016_s3, 4  ;;  %s3880_s14 = smov [#allocation6]   ;;  %s48_s1 = int_to_ptr.vmem [resolvable:$true] %s47_s1 }
   0x7   :  { %41 = dma.vmem_to_smem %s39_s11, 16, %s3880_s14, [#allocation5]  }
   0x8   :  { %s3881_s15 = smov [#allocation7]  }
   0x9   :  { %50 = dma.vmem_to_smem %s48_s1, 16, %s3881_s15, [#allocation8]  }
   0xa   :  { %3872 = dma.done.wait [#allocation3], 16  }
   0xb   :  { %3873 = vsyncadd [#allocation3], 4294967280 }
   0xc   :  { %3874 = dma.done.wait [#allocation5], 32  }
   0xd   :  { %3875 = vsyncadd [#allocation5], 4294967264 }
   0xe   :  { %3876 = dma.done.wait [#allocation8], 16  }
   0xf   :  { %3877 = vsyncadd [#allocation8], 4294967280 }
  0x10   :  { %73 = sfence }
  0x11   :  { %s122_s0 = sld [smem:[#allocation7]]  ;;  %v3937_v1 = vld [vmem:[%s7017_s4] sm:$0xff]  ;;  %v3942_v2 = vld [vmem:[%s7017_s4 + $0x8] sm:$0xff]  ;;  %v3947_v3 = vld [vmem:[%s7017_s4 + $0x10] sm:$0xff]  ;;  %vm3554_vm0 = vcmask 1041408   ;;  %vm3571_vm1 = vcmask 1043456  }
  0x12   :  { %s140_s16 = sld [smem:[#allocation2]]  ;;  %v3952_v4 = vld [vmem:[%s7017_s4 + $0x18] sm:$0xff]  ;;  %v3957_v5 = vld [vmem:[%s7017_s4 + $0x20] sm:$0xff]  ;;  %v3962_v6 = vld [vmem:[%s7017_s4 + $0x28] sm:$0xff]  ;;  %vm3588_vm2 = vcmask 1045504  }
  0x13   :  { %v3967_v7 = vld [vmem:[%s7017_s4 + $0x30] sm:$0xff]  ;;  %v3974_v10 = vld [vmem:[%s7017_s4 + $0x38] sm:$0xff]  ;;  %v3979_v11 = vld [vmem:[%s7017_s4 + $0x40] sm:$0xff]  ;;  %s4029_s21 = sld [smem:[#allocation6]] }
  0x14   :  { %v3984_v12 = vld [vmem:[%s7017_s4 + $0x48] sm:$0xff]  ;;  %v3992_v17 = vld [vmem:[%s7017_s4 + $0x50] sm:$0xff]  ;;  %v3997_v18 = vld [vmem:[%s7017_s4 + $0x58] sm:$0xff]  ;;  %s4035_s22 = sld [smem:[#allocation2 + $0x1]] }
  0x15   :  { %7342 = vst [vmem:[#allocation12_spill] sm:$0xff] %v3992_v17  ;;  %v4002_v19 = vld [vmem:[%s7017_s4 + $0x60] sm:$0xff]  ;;  %v4013_v24 = vld [vmem:[%s7017_s4 + $0x68] sm:$0xff]  ;;  %v4018_v25 = vld [vmem:[%s7017_s4 + $0x70] sm:$0xff]  ;;  %s4041_s23 = sld [smem:[#allocation4 + $0x1]] }
  0x16   :  { %7343 = vst [vmem:[#allocation13_spill] sm:$0xff] %v3997_v18  ;;  %v4023_v26 = vld [vmem:[%s7017_s4 + $0x78] sm:$0xff]  ;;  %v4058_v59 = vld [vmem:[%s7018_s5] sm:$0xff]  ;;  %v4063_v60 = vld [vmem:[%s7018_s5 + $0x8] sm:$0xff]  ;;  %s4322_s11 = sld [smem:[#allocation6 + $0x1]] }
  0x17   :  { %v123_v0 = vstv %s122_s0  ;;  %7344 = vst [vmem:[#allocation14_spill] sm:$0xff] %v4002_v19  ;;  %v4068_v61 = vld [vmem:[%s7018_s5 + $0x10] sm:$0xff]  ;;  %s4338_s12 = sld [smem:[#allocation2 + $0x2]] }
  0x18   :  { %v124_v8 = vadd.f32 %v123_v0, %v3937_v1  ;;  %v125_v9 = vadd.f32 %v123_v0, %v3942_v2  ;;  %v126_v13 = vadd.f32 %v123_v0, %v3947_v3  ;;  %v127_v14 = vadd.f32 %v123_v0, %v3952_v4  ;;  %7345 = vst [vmem:[#allocation15_spill] sm:$0xff] %v4013_v24  ;;  %s4340_s13 = sld [smem:[#allocation4 + $0x2]] }
  0x19   :  { %v128_v15 = vadd.f32 %v123_v0, %v3957_v5  ;;  %v141_v16 = vstv %s140_s16  ;;  %v129_v20 = vadd.f32 %v123_v0, %v3962_v6  ;;  %v130_v21 = vadd.f32 %v123_v0, %v3967_v7  ;;  %s4008_s16 = sld [smem:[#allocation4]]  ;;  %7346 = vst [vmem:[#allocation16_spill] sm:$0xff] %v4018_v25 }
  0x1a   :  { %v131_v22 = vadd.f32 %v123_v0, %v3974_v10  ;;  %v132_v23 = vadd.f32 %v123_v0, %v3979_v11  ;;  %7347 = vst [vmem:[#allocation17_spill] sm:$0xff] %v4023_v26  ;;  %v133_v27 = vadd.f32 %v123_v0, %v3984_v12  ;;  %v134_v28 = vadd.f32 %v123_v0, %v3992_v17  ;;  %s4417_s1 = sld [smem:[#allocation6 + $0x2]] }
  0x1b   :  { %v135_v29 = vadd.f32 %v123_v0, %v3997_v18  ;;  %v136_v30 = vadd.f32 %v123_v0, %v4002_v19  ;;  %v137_v31 = vadd.f32 %v123_v0, %v4013_v24  ;;  %v138_v32 = vadd.f32 %v123_v0, %v4018_v25  ;;  %7348 = vst [vmem:[#allocation18_spill] sm:$0xff] %v4058_v59  ;;  %s4427_s14 = sld [smem:[#allocation2 + $0x3]] }
  0x1c   :  { %v139_v33 = vadd.f32 %v123_v0, %v4023_v26  ;;  %v142_v34 = vmul.f32 %v141_v16, %v3937_v1  ;;  %v143_v35 = vmul.f32 %v141_v16, %v3942_v2  ;;  %v144_v36 = vmul.f32 %v141_v16, %v3947_v3  ;;  %7349 = vst [vmem:[#allocation19_spill] sm:$0xff] %v4063_v60  ;;  %s4433_s15 = sld [smem:[#allocation4 + $0x3]] }
  0x1d   :  { %v145_v37 = vmul.f32 %v141_v16, %v3952_v4  ;;  %v146_v38 = vmul.f32 %v141_v16, %v3957_v5  ;;  %v147_v39 = vmul.f32 %v141_v16, %v3962_v6  ;;  %v148_v40 = vmul.f32 %v141_v16, %v3967_v7  ;;  %7350 = vst [vmem:[#allocation20_spill] sm:$0xff] %v4068_v61  ;;  %s4435_s0 = sld [smem:[#allocation7 + $0x1]] }
  0x1e   :  { %v149_v41 = vmul.f32 %v141_v16, %v3974_v10  ;;  %v150_v42 = vmul.f32 %v141_v16, %v3979_v11  ;;  %v151_v43 = vmul.f32 %v141_v16, %v3984_v12  ;;  %v152_v44 = vmul.f32 %v141_v16, %v3992_v17  ;;  %s5023_s30 = sld [smem:[#allocation4 + $0x5]] }
  0x1f   :  { %v153_v45 = vmul.f32 %v141_v16, %v3997_v18  ;;  %v154_v46 = vmul.f32 %v141_v16, %v4002_v19  ;;  %v155_v47 = vmul.f32 %v141_v16, %v4013_v24  ;;  %v156_v48 = vmul.f32 %v141_v16, %v4018_v25  ;;  %s5260_s2 = sld [smem:[#allocation6 + $0x7]] }
  0x20   :  { %v157_v49 = vmul.f32 %v141_v16, %v4023_v26  ;;  %v158_v50 = vadd.f32 %v142_v34, %v124_v8  ;;  %v159_v51 = vadd.f32 %v143_v35, %v125_v9  ;;  %v160_v52 = vadd.f32 %v144_v36, %v126_v13  ;;  %v4073_v9 = vld [vmem:[%s7018_s5 + $0x18] sm:$0xff]  ;;  %v4078_v13 = vld [vmem:[%s7018_s5 + $0x20] sm:$0xff]  ;;  %s5262_s17 = sld [smem:[#allocation2 + $0x8]] }
  0x21   :  { %v161_v53 = vadd.f32 %v145_v37, %v127_v14  ;;  %v162_v54 = vadd.f32 %v146_v38, %v128_v15  ;;  %v163_v55 = vadd.f32 %v147_v39, %v129_v20  ;;  %v164_v56 = vadd.f32 %v148_v40, %v130_v21  ;;  %7351 = vst [vmem:[#allocation21_spill] sm:$0xff] %v4073_v9  ;;  %v4083_v14 = vld [vmem:[%s7018_s5 + $0x28] sm:$0xff]  ;;  %v4122_v37 = vld [vmem:[%s7018_s5 + $0x50] sm:$0xff]  ;;  %v4127_v38 = vld [vmem:[%s7018_s5 + $0x58] sm:$0xff]  ;;  %s5496_s24 = sld [smem:[#allocation4 + $0x8]] }
  0x22   :  { %v165_v57 = vadd.f32 %v149_v41, %v131_v22  ;;  %v175_v58 = vstv %s4008_s16  ;;  %v166_v62 = vadd.f32 %v150_v42, %v132_v23  ;;  %v167_v63 = vadd.f32 %v151_v43, %v133_v27  ;;  %7352 = vst [vmem:[#allocation22_spill] sm:$0xff] %v4078_v13  ;;  %v4088_v22 = vld [vmem:[%s7018_s5 + $0x30] sm:$0xff]  ;;  %v4132_v39 = vld [vmem:[%s7018_s5 + $0x60] sm:$0xff]  ;;  %s4515_s16 = sld [smem:[#allocation6 + $0x3]] }
  0x23   :  { %v168_v0 = vadd.f32 %v152_v44, %v134_v28  ;;  %v169_v8 = vadd.f32 %v153_v45, %v135_v29  ;;  %7353 = vst [vmem:[#allocation23_spill] sm:$0xff] %v4083_v14  ;;  %v170_v15 = vadd.f32 %v154_v46, %v136_v30  ;;  %v171_v16 = vadd.f32 %v155_v47, %v137_v31  ;;  %v4103_v30 = vld [vmem:[%s7018_s5 + $0x38] sm:$0xff]  ;;  %v4108_v31 = vld [vmem:[%s7018_s5 + $0x40] sm:$0xff]  ;;  %v4141_v44 = vld [vmem:[%s7018_s5 + $0x68] sm:$0xff]  ;;  %s6095_s3 = sld [smem:[#allocation2 + $0xc]] }
  0x24   :  { %v172_v20 = vadd.f32 %v156_v48, %v138_v32  ;;  %v173_v21 = vadd.f32 %v157_v49, %v139_v33  ;;  %7354 = vst [vmem:[#allocation24_spill] sm:$0xff] %v4088_v22  ;;  %v176_v23 = vmul.f32 %v175_v58, %v4058_v59  ;;  %v4092_v27 = vstv %s4029_s21  ;;  %v4113_v32 = vld [vmem:[%s7018_s5 + $0x48] sm:$0xff]  ;;  %v4146_v45 = vld [vmem:[%s7018_s5 + $0x70] sm:$0xff]  ;;  %v4151_v46 = vld [vmem:[%s7018_s5 + $0x78] sm:$0xff]  ;;  %s4573_s21 = sld [smem:[#allocation2 + $0x4]] }
  0x25   :  { %v4095_v28 = vstv %s4035_s22  ;;  %v4098_v29 = vstv %s4041_s23  ;;  %7356 = vst [vmem:[#allocation26_spill] sm:$0xff] %v4103_v30  ;;  %v177_v33 = vmul.f32 %v175_v58, %v4063_v60  ;;  %v178_v34 = vmul.f32 %v175_v58, %v4068_v61  ;;  %s4575_s22 = sld [smem:[#allocation4 + $0x4]] }
  0x26   :  { %7355 = vst [vmem:[#allocation25_spill] sm:$0xff] %v4098_v29  ;;  %v179_v35 = vmul.f32 %v175_v58, %v4073_v9  ;;  %v180_v36 = vmul.f32 %v175_v58, %v4078_v13  ;;  %v181_v40 = vmul.f32 %v175_v58, %v4083_v14  ;;  %v182_v41 = vmul.f32 %v175_v58, %v4088_v22  ;;  %s4581_s23 = sld [smem:[#allocation6 + $0x4]] }
  0x27   :  { %7357 = vst [vmem:[#allocation27_spill] sm:$0xff] %v4108_v31  ;;  %v183_v42 = vmul.f32 %v175_v58, %v4103_v30  ;;  %v184_v43 = vmul.f32 %v175_v58, %v4108_v31  ;;  %v185_v47 = vmul.f32 %v175_v58, %v4113_v32  ;;  %v186_v48 = vmul.f32 %v175_v58, %v4122_v37  ;;  %s6105_s18 = sld [smem:[#allocation4 + $0xc]] }
  0x28   :  { %7358 = vst [vmem:[#allocation28_spill] sm:$0xff] %v4113_v32  ;;  %v187_v49 = vmul.f32 %v175_v58, %v4127_v38  ;;  %v188_v31 = vmul.f32 %v175_v58, %v4132_v39  ;;  %v189_v30 = vmul.f32 %v175_v58, %v4141_v44  ;;  %v190_v22 = vmul.f32 %v175_v58, %v4146_v45  ;;  %v4163_v32 = vld [vmem:[%s7019_s6] sm:$0xff]  ;;  %s6107_s19 = sld [smem:[#allocation6 + $0xc]] }
  0x29   :  { %7359 = vst [vmem:[#allocation29_spill] sm:$0xff] %v4122_v37  ;;  %v191_v14 = vmul.f32 %v175_v58, %v4151_v46  ;;  %v192_v13 = vadd.f32 %v176_v23, %v158_v50  ;;  %v193_v9 = vadd.f32 %v177_v33, %v159_v51  ;;  %v194_v61 = vadd.f32 %v178_v34, %v160_v52  ;;  %v4173_v50 = vld [vmem:[%s7019_s6 + $0x10] sm:$0xff]  ;;  %v4178_v51 = vld [vmem:[%s7019_s6 + $0x18] sm:$0xff]  ;;  %v4205_v23 = vld [vmem:[%s7019_s6 + $0x40] sm:$0xff]  ;;  %s6570_s8 = sld [smem:[#allocation4 + $0xd]] }
  0x2a   :  { %7360 = vst [vmem:[#allocation30_spill] sm:$0xff] %v4127_v38  ;;  %v195_v60 = vadd.f32 %v179_v35, %v161_v53  ;;  %v196_v29 = vadd.f32 %v180_v36, %v162_v54  ;;  %v197_v37 = vadd.f32 %v181_v40, %v163_v55  ;;  %v198_v38 = vadd.f32 %v182_v41, %v164_v56  ;;  %v4183_v56 = vld [vmem:[%s7019_s6 + $0x20] sm:$0xff]  ;;  %v4193_v58 = vld [vmem:[%s7019_s6 + $0x30] sm:$0xff]  ;;  %v4246_v41 = vld [vmem:[%s7019_s6 + $0x68] sm:$0xff]  ;;  %s6572_s9 = sld [smem:[#allocation6 + $0xd]] }
  0x2b   :  { %7361 = vst [vmem:[#allocation31_spill] sm:$0xff] %v4132_v39  ;;  %v199_v59 = vadd.f32 %v183_v42, %v165_v57  ;;  %v200_v39 = vadd.f32 %v184_v43, %v166_v62  ;;  %v201_v52 = vadd.f32 %v185_v47, %v167_v63  ;;  %v202_v53 = vadd.f32 %v186_v48, %v168_v0  ;;  %v4188_v57 = vld [vmem:[%s7019_s6 + $0x28] sm:$0xff]  ;;  %v4233_v33 = vld [vmem:[%s7019_s6 + $0x60] sm:$0xff]  ;;  %v4251_v42 = vld [vmem:[%s7019_s6 + $0x70] sm:$0xff]  ;;  %s6679_s10 = sld [smem:[#allocation4 + $0xe]] }
  0x2c   :  { %7362 = vst [vmem:[#allocation32_spill] sm:$0xff] %v4141_v44  ;;  %v203_v54 = vadd.f32 %v187_v49, %v169_v8  ;;  %v204_v55 = vadd.f32 %v188_v31, %v170_v15  ;;  %v205_v62 = vadd.f32 %v189_v30, %v171_v16  ;;  %v206_v63 = vadd.f32 %v190_v22, %v172_v20  ;;  %v4200_v15 = vld [vmem:[%s7019_s6 + $0x38] sm:$0xff]  ;;  %v4210_v31 = vld [vmem:[%s7019_s6 + $0x48] sm:$0xff]  ;;  %v4223_v22 = vld [vmem:[%s7019_s6 + $0x50] sm:$0xff] }
  0x2d   :  { %7363 = vst [vmem:[#allocation33_spill] sm:$0xff] %v4146_v45  ;;  %v4168_v45 = vld [vmem:[%s7019_s6 + $0x8] sm:$0xff]  ;;  %v207_v0 = vadd.f32 %v191_v14, %v173_v21  ;;  %v210_v8 = vmul.f32 %v4092_v27, %v4163_v32  ;;  %v212_v16 = vmul.f32 %v4092_v27, %v4173_v50  ;;  %v213_v20 = vmul.f32 %v4092_v27, %v4178_v51  ;;  %v4228_v30 = vld [vmem:[%s7019_s6 + $0x58] sm:$0xff] }
  0x2e   :  { %7364 = vst [vmem:[#allocation34_spill] sm:$0xff] %v4151_v46  ;;  %v211_v14 = vmul.f32 %v4092_v27, %v4168_v45  ;;  %v214_v21 = vmul.f32 %v4092_v27, %v4183_v56  ;;  %v215_v34 = vmul.f32 %v4092_v27, %v4188_v57  ;;  %v216_v35 = vmul.f32 %v4092_v27, %v4193_v58  ;;  %v4256_v43 = vld [vmem:[%s7019_s6 + $0x78] sm:$0xff] }
  0x2f   :  { %7365 = vst [vmem:[#allocation35_spill] sm:$0xff] %v4163_v32  ;;  %v217_v36 = vmul.f32 %v4092_v27, %v4200_v15  ;;  %v218_v40 = vmul.f32 %v4092_v27, %v4205_v23  ;;  %v219_v47 = vmul.f32 %v4092_v27, %v4210_v31  ;;  %v220_v48 = vmul.f32 %v4092_v27, %v4223_v22 }
  0x30   :  { %7366 = vst [vmem:[#allocation36_spill] sm:$0xff] %v4168_v45  ;;  %v221_v49 = vmul.f32 %v4092_v27, %v4228_v30  ;;  %v231_v45 = vadd.f32 %v215_v34, %v197_v37  ;;  %v232_v32 = vadd.f32 %v216_v35, %v198_v38  ;;  %v252_v37 = vmul.f32 %v4095_v28, %v3979_v11 }
  0x31   :  { %7367 = vst [vmem:[#allocation37_spill] sm:$0xff] %v4173_v50  ;;  %v229_v50 = vadd.f32 %v213_v20, %v195_v60  ;;  %v234_v46 = vadd.f32 %v218_v40, %v200_v39  ;;  %v235_v44 = vadd.f32 %v219_v47, %v201_v52  ;;  %v246_v60 = vmul.f32 %v4095_v28, %v3947_v3 }
  0x32   :  { %7368 = vst [vmem:[#allocation38_spill] sm:$0xff] %v4178_v51  ;;  %v228_v51 = vadd.f32 %v212_v16, %v194_v61  ;;  %v237_v26 = vadd.f32 %v221_v49, %v203_v54  ;;  %v248_v61 = vmul.f32 %v4095_v28, %v3957_v5  ;;  %v253_v38 = vmul.f32 %v4095_v28, %v3984_v12 }
  0x33   :  { %7369 = vst [vmem:[#allocation39_spill] sm:$0xff] %v4183_v56  ;;  %v226_v56 = vadd.f32 %v210_v8, %v192_v13  ;;  %v249_v13 = vmul.f32 %v4095_v28, %v3962_v6  ;;  %v254_v39 = vmul.f32 %v4095_v28, %v3992_v17  ;;  %v255_v52 = vmul.f32 %v4095_v28, %v3997_v18 }
  0x34   :  { %7370 = vst [vmem:[#allocation40_spill] sm:$0xff] %v4188_v57  ;;  %v225_v57 = vmul.f32 %v4092_v27, %v4256_v43  ;;  %v280_v16 = vrot.slane %v248_v61, 2  ;;  %v284_v35 = vrot.slane %v252_v37, 2 }
  0x35   :  { %7371 = vst [vmem:[#allocation41_spill] sm:$0xff] %v4193_v58  ;;  %v224_v58 = vmul.f32 %v4092_v27, %v4251_v42  ;;  %v281_v20 = vrot.slane %v249_v13, 2  ;;  %v286_v40 = vrot.slane %v254_v39, 2  ;;  %v287_v47 = vrot.slane %v255_v52, 2 }
  0x36   :  { %7372 = vst [vmem:[#allocation42_spill] sm:$0xff] %v4200_v15  ;;  %v223_v15 = vmul.f32 %v4092_v27, %v4246_v41  ;;  %v241_v19 = vadd.f32 %v225_v57, %v207_v0  ;;  %v316_v61 = vadd.f32 %v284_v35, %v234_v46  ;;  %v7389_v46 = vld [vmem:[#allocation22_spill] sm:$0xff] }
  0x37   :  { %7373 = vst [vmem:[#allocation43_spill] sm:$0xff] %v4205_v23  ;;  %v222_v23 = vmul.f32 %v4092_v27, %v4233_v33  ;;  %v240_v24 = vadd.f32 %v224_v58, %v206_v63  ;;  %v250_v27 = vmul.f32 %v4095_v28, %v3967_v7  ;;  %v7382_v58 = vld [vmem:[#allocation16_spill] sm:$0xff]  ;;  %v7383_v63 = vld [vmem:[#allocation17_spill] sm:$0xff] }
  0x38   :  { %7374 = vst [vmem:[#allocation44_spill] sm:$0xff] %v4210_v31  ;;  %v227_v31 = vadd.f32 %v211_v14, %v193_v9  ;;  %v245_v9 = vmul.f32 %v4095_v28, %v3942_v2  ;;  %v259_v0 = vmul.f32 %v4095_v28, %v7383_v63 }
  0x39   :  { %7375 = vst [vmem:[#allocation45_spill] sm:$0xff] %v4223_v22  ;;  %v230_v22 = vadd.f32 %v214_v21, %v196_v29  ;;  %v238_v25 = vadd.f32 %v222_v23, %v204_v55  ;;  %v251_v29 = vmul.f32 %v4095_v28, %v3974_v10  ;;  %v7381_v55 = vld [vmem:[#allocation15_spill] sm:$0xff]  ;;  %v278_v23 = vrot.slane %v246_v60, 2 }
  0x3a   :  { %7376 = vst [vmem:[#allocation46_spill] sm:$0xff] %v4228_v30  ;;  %v233_v30 = vadd.f32 %v217_v36, %v199_v59  ;;  %v247_v59 = vmul.f32 %v4095_v28, %v3952_v4  ;;  %v257_v57 = vmul.f32 %v4095_v28, %v7381_v55  ;;  %v282_v21 = vrot.slane %v250_v27, 2 }
  0x3b   :  { %7377 = vst [vmem:[#allocation47_spill] sm:$0xff] %v4233_v33  ;;  %v236_v33 = vadd.f32 %v220_v48, %v202_v53  ;;  %v7380_v53 = vld [vmem:[#allocation14_spill] sm:$0xff]  ;;  %v283_v34 = vrot.slane %v251_v29, 2  ;;  %v285_v36 = vrot.slane %v253_v38, 2  ;;  %v310_v17 = vadd.f32 %v278_v23, %v228_v51  ;;  %v7387_v51 = vld [vmem:[#allocation20_spill] sm:$0xff] }
  0x3c   :  { %7378 = vst [vmem:[#allocation48_spill] sm:$0xff] %v4246_v41  ;;  %v239_v41 = vadd.f32 %v223_v15, %v205_v62  ;;  %v256_v54 = vmul.f32 %v4095_v28, %v7380_v53  ;;  %v258_v62 = vmul.f32 %v4095_v28, %v7382_v58  ;;  %v277_v15 = vrot.slane %v245_v9, 2 }
  0x3d   :  { %7379 = vst [vmem:[#allocation49_spill] sm:$0xff] %v4251_v42  ;;  %v244_v42 = vmul.f32 %v4095_v28, %v3937_v1  ;;  %v279_v14 = vrot.slane %v247_v59, 2  ;;  %v289_v49 = vrot.slane %v257_v57, 2  ;;  %v291_v53 = vrot.slane %v259_v0, 2  ;;  %v7385_v57 = vld [vmem:[#allocation25_spill] sm:$0xff]  ;;  %v7386_v0 = vld [vmem:[#allocation19_spill] sm:$0xff] }
  0x3e   :  { %v288_v48 = vrot.slane %v256_v54, 2  ;;  %v290_v55 = vrot.slane %v258_v62, 2  ;;  %v309_v18 = vadd.f32 %v277_v15, %v227_v31  ;;  %v313_v9 = vadd.f32 %v281_v20, %v231_v45  ;;  %v7384_v54 = vld [vmem:[#allocation18_spill] sm:$0xff]  ;;  %v7388_v45 = vld [vmem:[#allocation21_spill] sm:$0xff]  ;;  %v7398_v20 = vld [vmem:[#allocation32_spill] sm:$0xff] }
  0x3f   :  { %v276_v8 = vrot.slane %v244_v42, 2  ;;  %v311_v28 = vadd.f32 %v279_v14, %v229_v50  ;;  %v312_v42 = vadd.f32 %v280_v16, %v230_v22  ;;  %v314_v60 = vadd.f32 %v282_v21, %v232_v32  ;;  %v7392_v31 = vld [vmem:[#allocation26_spill] sm:$0xff]  ;;  %v7397_v14 = vld [vmem:[#allocation31_spill] sm:$0xff] }
  0x40   :  { %v315_v59 = vadd.f32 %v283_v34, %v233_v30  ;;  %v317_v13 = vadd.f32 %v285_v36, %v235_v44  ;;  %v318_v27 = vadd.f32 %v286_v40, %v236_v33  ;;  %v319_v29 = vadd.f32 %v287_v47, %v237_v26  ;;  %v7390_v26 = vld [vmem:[#allocation23_spill] sm:$0xff]  ;;  %v7396_v15 = vld [vmem:[#allocation30_spill] sm:$0xff]  ;;  %v7399_v34 = vld [vmem:[#allocation33_spill] sm:$0xff] }
  0x41   :  { %v308_v58 = vadd.f32 %v276_v8, %v226_v56  ;;  %v320_v37 = vadd.f32 %v288_v48, %v238_v25  ;;  %v321_v38 = vadd.f32 %v289_v49, %v239_v41  ;;  %v322_v39 = vadd.f32 %v290_v55, %v240_v24  ;;  %v7391_v24 = vld [vmem:[#allocation24_spill] sm:$0xff]  ;;  %v7393_v30 = vld [vmem:[#allocation27_spill] sm:$0xff]  ;;  %v7395_v55 = vld [vmem:[#allocation29_spill] sm:$0xff] }
  0x42   :  { %v323_v52 = vadd.f32 %v291_v53, %v241_v19  ;;  %v326_v62 = vmul.f32 %v7385_v57, %v7384_v54  ;;  %v327_v56 = vmul.f32 %v7385_v57, %v7386_v0  ;;  %v328_v50 = vmul.f32 %v7385_v57, %v7387_v51  ;;  %v7394_v41 = vld [vmem:[#allocation28_spill] sm:$0xff]  ;;  %v7400_v36 = vld [vmem:[#allocation34_spill] sm:$0xff] }
  0x43   :  { %v329_v32 = vmul.f32 %v7385_v57, %v7388_v45  ;;  %v330_v44 = vmul.f32 %v7385_v57, %v7389_v46  ;;  %v331_v25 = vmul.f32 %v7385_v57, %v7390_v26  ;;  %v332_v19 = vmul.f32 %v7385_v57, %v7391_v24 }
  0x44   :  { %v333_v22 = vmul.f32 %v7385_v57, %v7392_v31  ;;  %v334_v33 = vmul.f32 %v7385_v57, %v7393_v30  ;;  %v335_v53 = vmul.f32 %v7385_v57, %v7394_v41  ;;  %v336_v8 = vmul.f32 %v7385_v57, %v7395_v55 }
  0x45   :  { %v337_v23 = vmul.f32 %v7385_v57, %v7396_v15  ;;  %v338_v16 = vmul.f32 %v7385_v57, %v7397_v14  ;;  %v339_v21 = vmul.f32 %v7385_v57, %v7398_v20  ;;  %v340_v35 = vmul.f32 %v7385_v57, %v7399_v34 }
  0x46   :  { %v341_v40 = vmul.f32 %v7385_v57, %v7400_v36  ;;  %v358_v47 = vrot.slane %v326_v62, 2  ;;  %v359_v48 = vrot.slane %v327_v56, 2  ;;  %v360_v49 = vrot.slane %v328_v50, 2 }
  0x47   :  { %v361_v55 = vrot.slane %v329_v32, 2  ;;  %v362_v41 = vrot.slane %v330_v44, 2  ;;  %v363_v15 = vrot.slane %v331_v25, 2  ;;  %v364_v14 = vrot.slane %v332_v19, 2 }
  0x48   :  { %v365_v30 = vrot.slane %v333_v22, 2  ;;  %v366_v31 = vrot.slane %v334_v33, 2  ;;  %v367_v20 = vrot.slane %v335_v53, 2  ;;  %v368_v24 = vrot.slane %v336_v8, 2 }
  0x49   :  { %v369_v34 = vrot.slane %v337_v23, 2  ;;  %v370_v26 = vrot.slane %v338_v16, 2  ;;  %v371_v46 = vrot.slane %v339_v21, 2  ;;  %v372_v57 = vrot.slane %v340_v35, 2 }
  0x4a   :  { %v373_v62 = vrot.slane %v341_v40, 2  ;;  %v390_v36 = vadd.f32 %v358_v47, %v308_v58  ;;  %v391_v45 = vadd.f32 %v359_v48, %v309_v18  ;;  %v392_v56 = vadd.f32 %v360_v49, %v310_v17  ;;  %v7401_v40 = vld [vmem:[#allocation35_spill] sm:$0xff]  ;;  %v7402_v18 = vld [vmem:[#allocation36_spill] sm:$0xff]  ;;  %v7416_v49 = vld [vmem:[#allocation49_spill] sm:$0xff] }
  0x4b   :  { %v393_v50 = vadd.f32 %v361_v55, %v311_v28  ;;  %v394_v32 = vadd.f32 %v362_v41, %v312_v42  ;;  %v395_v44 = vadd.f32 %v363_v15, %v313_v9  ;;  %v396_v25 = vadd.f32 %v364_v14, %v314_v60  ;;  %v7404_v9 = vld [vmem:[#allocation37_spill] sm:$0xff]  ;;  %v7413_v15 = vld [vmem:[#allocation46_spill] sm:$0xff]  ;;  %v7415_v47 = vld [vmem:[#allocation48_spill] sm:$0xff] }
  0x4c   :  { %v397_v19 = vadd.f32 %v365_v30, %v315_v59  ;;  %v407_v22 = vstv %s4322_s11  ;;  %v398_v33 = vadd.f32 %v366_v31, %v316_v61  ;;  %v399_v51 = vadd.f32 %v367_v20, %v317_v13  ;;  %v7405_v59 = vld [vmem:[#allocation38_spill] sm:$0xff]  ;;  %v7406_v61 = vld [vmem:[#allocation39_spill] sm:$0xff]  ;;  %v7412_v41 = vld [vmem:[#allocation45_spill] sm:$0xff]  ;;  %s6681_s11 = sld [smem:[#allocation6 + $0xe]] }
  0x4d   :  { %v400_v53 = vadd.f32 %v368_v24, %v318_v27  ;;  %v401_v8 = vadd.f32 %v369_v34, %v319_v29  ;;  %v402_v23 = vadd.f32 %v370_v26, %v320_v37  ;;  %v403_v16 = vadd.f32 %v371_v46, %v321_v38  ;;  %v7407_v27 = vld [vmem:[#allocation40_spill] sm:$0xff]  ;;  %v7408_v37 = vld [vmem:[#allocation41_spill] sm:$0xff]  ;;  %v7410_v46 = vld [vmem:[#allocation43_spill] sm:$0xff] }
  0x4e   :  { %v404_v21 = vadd.f32 %v372_v57, %v322_v39  ;;  %v405_v35 = vadd.f32 %v373_v62, %v323_v52  ;;  %v408_v58 = vmul.f32 %v407_v22, %v7401_v40  ;;  %v409_v17 = vmul.f32 %v407_v22, %v7402_v18  ;;  %v7409_v39 = vld [vmem:[#allocation42_spill] sm:$0xff]  ;;  %v7411_v24 = vld [vmem:[#allocation44_spill] sm:$0xff]  ;;  %v7414_v20 = vld [vmem:[#allocation47_spill] sm:$0xff] }
  0x4f   :  { %v4346_v28 = vstv %s4338_s12  ;;  %v4349_v42 = vstv %s4340_s13  ;;  %v410_v60 = vmul.f32 %v407_v22, %v7404_v9  ;;  %v411_v30 = vmul.f32 %v407_v22, %v7405_v59  ;;  %s5039_s12 = sld [smem:[#allocation6 + $0x5]] }
  0x50   :  { %7403 = vst [vmem:[#allocation25_spill] sm:$0xff] %v4349_v42  ;;  %v412_v13 = vmul.f32 %v407_v22, %v7406_v61  ;;  %v413_v29 = vmul.f32 %v407_v22, %v7407_v27  ;;  %v414_v38 = vmul.f32 %v407_v22, %v7408_v37  ;;  %v415_v52 = vmul.f32 %v407_v22, %v7409_v39  ;;  %s5041_s13 = sld [smem:[#allocation2 + $0x6]] }
  0x51   :  { %v416_v26 = vmul.f32 %v407_v22, %v7410_v46  ;;  %v417_v31 = vmul.f32 %v407_v22, %v7411_v24  ;;  %v418_v55 = vmul.f32 %v407_v22, %v7412_v41  ;;  %v419_v14 = vmul.f32 %v407_v22, %v7413_v15 }
  0x52   :  { %v420_v34 = vmul.f32 %v407_v22, %v7414_v20  ;;  %v421_v48 = vmul.f32 %v407_v22, %v7415_v47  ;;  %v422_v57 = vmul.f32 %v407_v22, %v7416_v49  ;;  %v423_v62 = vmul.f32 %v407_v22, %v4256_v43 }
  0x53   :  { %v440_v27 = vrot.slane %v408_v58, 2  ;;  %v441_v37 = vrot.slane %v409_v17, 2  ;;  %v442_v61 = vrot.slane %v410_v60, 2  ;;  %v443_v39 = vrot.slane %v411_v30, 2 }
  0x54   :  { %v444_v59 = vrot.slane %v412_v13, 2  ;;  %v445_v46 = vrot.slane %v413_v29, 2  ;;  %v446_v9 = vrot.slane %v414_v38, 2  ;;  %v447_v24 = vrot.slane %v415_v52, 2 }
  0x55   :  { %v448_v18 = vrot.slane %v416_v26, 2  ;;  %v449_v41 = vrot.slane %v417_v31, 2  ;;  %v450_v40 = vrot.slane %v418_v55, 2  ;;  %v451_v15 = vrot.slane %v419_v14, 2 }
  0x56   :  { %v452_v0 = vrot.slane %v420_v34, 2  ;;  %v453_v20 = vrot.slane %v421_v48, 2  ;;  %v454_v42 = vrot.slane %v422_v57, 2  ;;  %v455_v47 = vrot.slane %v423_v62, 2 }
  0x57   :  { %v472_v54 = vadd.f32 %v440_v27, %v390_v36  ;;  %v473_v49 = vadd.f32 %v441_v37, %v391_v45  ;;  %v474_v63 = vadd.f32 %v442_v61, %v392_v56  ;;  %v475_v22 = vadd.f32 %v443_v39, %v393_v50 }
  0x58   :  { %v476_v58 = vadd.f32 %v444_v59, %v394_v32  ;;  %v477_v17 = vadd.f32 %v445_v46, %v395_v44  ;;  %v478_v60 = vadd.f32 %v446_v9, %v396_v25  ;;  %v479_v30 = vadd.f32 %v447_v24, %v397_v19  ;;  %v7417_v19 = vld [vmem:[#allocation12_spill] sm:$0xff] }
  0x59   :  { %v480_v13 = vadd.f32 %v448_v18, %v398_v33  ;;  %v481_v29 = vadd.f32 %v449_v41, %v399_v51  ;;  %v482_v38 = vadd.f32 %v450_v40, %v400_v53  ;;  %v483_v52 = vadd.f32 %v451_v15, %v401_v8  ;;  %v7418_v53 = vld [vmem:[#allocation13_spill] sm:$0xff]  ;;  %v7421_v40 = vld [vmem:[#allocation16_spill] sm:$0xff] }
  0x5a   :  { %v484_v26 = vadd.f32 %v452_v0, %v402_v23  ;;  %v485_v31 = vadd.f32 %v453_v20, %v403_v16  ;;  %v486_v55 = vadd.f32 %v454_v42, %v404_v21  ;;  %v487_v14 = vadd.f32 %v455_v47, %v405_v35  ;;  %v7419_v23 = vld [vmem:[#allocation14_spill] sm:$0xff]  ;;  %v7420_v21 = vld [vmem:[#allocation15_spill] sm:$0xff]  ;;  %v7422_v42 = vld [vmem:[#allocation17_spill] sm:$0xff] }
  0x5b   :  { %v490_v34 = vmul.f32 %v4346_v28, %v3937_v1  ;;  %v491_v45 = vmul.f32 %v4346_v28, %v3942_v2  ;;  %v492_v36 = vmul.f32 %v4346_v28, %v3947_v3  ;;  %v493_v56 = vmul.f32 %v4346_v28, %v3952_v4 }
  0x5c   :  { %v494_v51 = vmul.f32 %v4346_v28, %v3957_v5  ;;  %v495_v0 = vmul.f32 %v4346_v28, %v3962_v6  ;;  %v496_v50 = vmul.f32 %v4346_v28, %v3967_v7  ;;  %v497_v32 = vmul.f32 %v4346_v28, %v3974_v10 }
  0x5d   :  { %v498_v44 = vmul.f32 %v4346_v28, %v3979_v11  ;;  %v499_v25 = vmul.f32 %v4346_v28, %v3984_v12  ;;  %v500_v33 = vmul.f32 %v4346_v28, %v7417_v19  ;;  %v501_v8 = vmul.f32 %v4346_v28, %v7418_v53 }
  0x5e   :  { %v502_v16 = vmul.f32 %v4346_v28, %v7419_v23  ;;  %v503_v35 = vmul.f32 %v4346_v28, %v7420_v21  ;;  %v504_v18 = vmul.f32 %v4346_v28, %v7421_v40  ;;  %v505_v9 = vmul.f32 %v4346_v28, %v7422_v42 }
  0x5f   :  { %v522_v59 = vrot.slane %v490_v34, 4  ;;  %v523_v61 = vrot.slane %v491_v45, 4  ;;  %v524_v27 = vrot.slane %v492_v36, 4  ;;  %v525_v37 = vrot.slane %v493_v56, 4 }
  0x60   :  { %v526_v39 = vrot.slane %v494_v51, 4  ;;  %v527_v46 = vrot.slane %v495_v0, 4  ;;  %v528_v24 = vrot.slane %v496_v50, 4  ;;  %v529_v41 = vrot.slane %v497_v32, 4 }
  0x61   :  { %v530_v15 = vrot.slane %v498_v44, 4  ;;  %v531_v20 = vrot.slane %v499_v25, 4  ;;  %v532_v47 = vrot.slane %v500_v33, 4  ;;  %v533_v48 = vrot.slane %v501_v8, 4 }
  0x62   :  { %v534_v57 = vrot.slane %v502_v16, 4  ;;  %v535_v62 = vrot.slane %v503_v35, 4  ;;  %v536_v21 = vrot.slane %v504_v18, 4  ;;  %v537_v23 = vrot.slane %v505_v9, 4  ;;  %v7423_v16 = vld [vmem:[#allocation18_spill] sm:$0xff]  ;;  %v7424_v35 = vld [vmem:[#allocation25_spill] sm:$0xff] }
  0x63   :  { %v554_v40 = vadd.f32 %v522_v59, %v472_v54  ;;  %v555_v53 = vadd.f32 %v523_v61, %v473_v49  ;;  %v556_v19 = vadd.f32 %v524_v27, %v474_v63  ;;  %v557_v28 = vadd.f32 %v525_v37, %v475_v22  ;;  %v7425_v9 = vld [vmem:[#allocation19_spill] sm:$0xff]  ;;  %v7426_v63 = vld [vmem:[#allocation20_spill] sm:$0xff]  ;;  %v7427_v22 = vld [vmem:[#allocation21_spill] sm:$0xff] }
  0x64   :  { %v558_v34 = vadd.f32 %v526_v39, %v476_v58  ;;  %v559_v45 = vadd.f32 %v527_v46, %v477_v17  ;;  %v560_v36 = vadd.f32 %v528_v24, %v478_v60  ;;  %v561_v56 = vadd.f32 %v529_v41, %v479_v30  ;;  %v7428_v17 = vld [vmem:[#allocation22_spill] sm:$0xff]  ;;  %v7429_v30 = vld [vmem:[#allocation23_spill] sm:$0xff]  ;;  %v7437_v46 = vld [vmem:[#allocation32_spill] sm:$0xff] }
  0x65   :  { %v562_v51 = vadd.f32 %v530_v15, %v480_v13  ;;  %v563_v0 = vadd.f32 %v531_v20, %v481_v29  ;;  %v564_v50 = vadd.f32 %v532_v47, %v482_v38  ;;  %v565_v32 = vadd.f32 %v533_v48, %v483_v52  ;;  %v7430_v29 = vld [vmem:[#allocation24_spill] sm:$0xff]  ;;  %v7431_v52 = vld [vmem:[#allocation26_spill] sm:$0xff]  ;;  %v7436_v37 = vld [vmem:[#allocation31_spill] sm:$0xff] }
  0x66   :  { %v566_v44 = vadd.f32 %v534_v57, %v484_v26  ;;  %v567_v25 = vadd.f32 %v535_v62, %v485_v31  ;;  %v568_v33 = vadd.f32 %v536_v21, %v486_v55  ;;  %v569_v8 = vadd.f32 %v537_v23, %v487_v14  ;;  %v7432_v31 = vld [vmem:[#allocation27_spill] sm:$0xff]  ;;  %v7433_v14 = vld [vmem:[#allocation28_spill] sm:$0xff]  ;;  %v7434_v21 = vld [vmem:[#allocation29_spill] sm:$0xff] }
  0x67   :  { %v572_v18 = vmul.f32 %v7424_v35, %v7423_v16  ;;  %v573_v54 = vmul.f32 %v7424_v35, %v7425_v9  ;;  %v574_v49 = vmul.f32 %v7424_v35, %v7426_v63  ;;  %v575_v58 = vmul.f32 %v7424_v35, %v7427_v22  ;;  %v7435_v61 = vld [vmem:[#allocation30_spill] sm:$0xff]  ;;  %v7438_v41 = vld [vmem:[#allocation33_spill] sm:$0xff] }
  0x68   :  { %v576_v60 = vmul.f32 %v7424_v35, %v7428_v17  ;;  %v577_v13 = vmul.f32 %v7424_v35, %v7429_v30  ;;  %v578_v38 = vmul.f32 %v7424_v35, %v7430_v29  ;;  %v579_v26 = vmul.f32 %v7424_v35, %v7431_v52  ;;  %v7439_v20 = vld [vmem:[#allocation34_spill] sm:$0xff] }
  0x69   :  { %v580_v55 = vmul.f32 %v7424_v35, %v7432_v31  ;;  %v581_v23 = vmul.f32 %v7424_v35, %v7433_v14  ;;  %v582_v59 = vmul.f32 %v7424_v35, %v7434_v21  ;;  %v583_v27 = vmul.f32 %v7424_v35, %v7435_v61 }
  0x6a   :  { %v584_v39 = vmul.f32 %v7424_v35, %v7436_v37  ;;  %v585_v24 = vmul.f32 %v7424_v35, %v7437_v46  ;;  %v586_v15 = vmul.f32 %v7424_v35, %v7438_v41  ;;  %v587_v47 = vmul.f32 %v7424_v35, %v7439_v20 }
  0x6b   :  { %v604_v48 = vrot.slane %v572_v18, 4  ;;  %v605_v57 = vrot.slane %v573_v54, 4  ;;  %v606_v62 = vrot.slane %v574_v49, 4  ;;  %v607_v61 = vrot.slane %v575_v58, 4 }
  0x6c   :  { %v608_v21 = vrot.slane %v576_v60, 4  ;;  %v609_v14 = vrot.slane %v577_v13, 4  ;;  %v610_v37 = vrot.slane %v578_v38, 4  ;;  %v611_v46 = vrot.slane %v579_v26, 4 }
  0x6d   :  { %v612_v31 = vrot.slane %v580_v55, 4  ;;  %v613_v52 = vrot.slane %v581_v23, 4  ;;  %v614_v29 = vrot.slane %v582_v59, 4  ;;  %v615_v41 = vrot.slane %v583_v27, 4 }
  0x6e   :  { %v616_v30 = vrot.slane %v584_v39, 4  ;;  %v617_v17 = vrot.slane %v585_v24, 4  ;;  %v618_v35 = vrot.slane %v586_v15, 4  ;;  %v619_v18 = vrot.slane %v587_v47, 4 }
  0x6f   :  { %v636_v54 = vadd.f32 %v604_v48, %v554_v40  ;;  %v637_v20 = vadd.f32 %v605_v57, %v555_v53  ;;  %v638_v49 = vadd.f32 %v606_v62, %v556_v19  ;;  %v639_v58 = vadd.f32 %v607_v61, %v557_v28  ;;  %v7440_v53 = vld [vmem:[#allocation35_spill] sm:$0xff]  ;;  %v7441_v28 = vld [vmem:[#allocation36_spill] sm:$0xff]  ;;  %v7452_v61 = vld [vmem:[#allocation45_spill] sm:$0xff] }
  0x70   :  { %v640_v60 = vadd.f32 %v608_v21, %v558_v34  ;;  %v641_v13 = vadd.f32 %v609_v14, %v559_v45  ;;  %v642_v38 = vadd.f32 %v610_v37, %v560_v36  ;;  %v643_v26 = vadd.f32 %v611_v46, %v561_v56  ;;  %v7444_v36 = vld [vmem:[#allocation37_spill] sm:$0xff]  ;;  %v7453_v46 = vld [vmem:[#allocation46_spill] sm:$0xff]  ;;  %v7454_v48 = vld [vmem:[#allocation47_spill] sm:$0xff] }
  0x71   :  { %v644_v55 = vadd.f32 %v612_v31, %v562_v51  ;;  %v653_v23 = vstv %s4417_s1  ;;  %v645_v22 = vadd.f32 %v613_v52, %v563_v0  ;;  %v646_v59 = vadd.f32 %v614_v29, %v564_v50  ;;  %v7445_v51 = vld [vmem:[#allocation38_spill] sm:$0xff]  ;;  %v7446_v50 = vld [vmem:[#allocation39_spill] sm:$0xff]  ;;  %v7451_v31 = vld [vmem:[#allocation44_spill] sm:$0xff]  ;;  %s5151_s1 = sld [smem:[#allocation4 + $0x6]] }
  0x72   :  { %v647_v27 = vadd.f32 %v615_v41, %v565_v32  ;;  %v648_v39 = vadd.f32 %v616_v30, %v566_v44  ;;  %v649_v24 = vadd.f32 %v617_v17, %v567_v25  ;;  %v650_v15 = vadd.f32 %v618_v35, %v568_v33  ;;  %v7447_v44 = vld [vmem:[#allocation40_spill] sm:$0xff]  ;;  %v7448_v33 = vld [vmem:[#allocation41_spill] sm:$0xff]  ;;  %v7449_v17 = vld [vmem:[#allocation42_spill] sm:$0xff] }
  0x73   :  { %v651_v47 = vadd.f32 %v619_v18, %v569_v8  ;;  %v4439_v40 = vstv %s4427_s14  ;;  %v654_v19 = vmul.f32 %v653_v23, %v7440_v53  ;;  %v655_v34 = vmul.f32 %v653_v23, %v7441_v28  ;;  %v7450_v29 = vld [vmem:[#allocation43_spill] sm:$0xff]  ;;  %v7455_v62 = vld [vmem:[#allocation48_spill] sm:$0xff]  ;;  %v7456_v18 = vld [vmem:[#allocation49_spill] sm:$0xff]  ;;  %s5165_s14 = sld [smem:[#allocation6 + $0x6]] }
  0x74   :  { %v4444_v21 = vstv %s4433_s15  ;;  %v4447_v45 = vstv %s4435_s0  ;;  %v656_v56 = vmul.f32 %v653_v23, %v7444_v36  ;;  %v657_v0 = vmul.f32 %v653_v23, %v7445_v51  ;;  %s5167_s15 = sld [smem:[#allocation2 + $0x7]] }
  0x75   :  { %7442 = vst [vmem:[#allocation25_spill] sm:$0xff] %v4444_v21  ;;  %v658_v32 = vmul.f32 %v653_v23, %v7446_v50  ;;  %v659_v25 = vmul.f32 %v653_v23, %v7447_v44  ;;  %v660_v8 = vmul.f32 %v653_v23, %v7448_v33  ;;  %v661_v30 = vmul.f32 %v653_v23, %v7449_v17  ;;  %s5246_s0 = sld [smem:[#allocation4 + $0x7]] }
  0x76   :  { %7443 = vst [vmem:[#allocation50_spill] sm:$0xff] %v4447_v45  ;;  %v662_v52 = vmul.f32 %v653_v23, %v7450_v29  ;;  %v663_v14 = vmul.f32 %v653_v23, %v7451_v31  ;;  %v664_v37 = vmul.f32 %v653_v23, %v7452_v61  ;;  %v665_v41 = vmul.f32 %v653_v23, %v7453_v46 }
  0x77   :  { %v666_v57 = vmul.f32 %v653_v23, %v7454_v48  ;;  %v667_v35 = vmul.f32 %v653_v23, %v7455_v62  ;;  %v668_v50 = vmul.f32 %v653_v23, %v7456_v18  ;;  %v669_v44 = vmul.f32 %v653_v23, %v4256_v43 }
  0x78   :  { %v686_v51 = vrot.slane %v654_v19, 4  ;;  %v687_v33 = vrot.slane %v655_v34, 4  ;;  %v688_v36 = vrot.slane %v656_v56, 4  ;;  %v689_v17 = vrot.slane %v657_v0, 4 }
  0x79   :  { %v690_v28 = vrot.slane %v658_v32, 4  ;;  %v691_v29 = vrot.slane %v659_v25, 4  ;;  %v692_v53 = vrot.slane %v660_v8, 4  ;;  %v693_v31 = vrot.slane %v661_v30, 4 }
  0x7a   :  { %v694_v45 = vrot.slane %v662_v52, 4  ;;  %v695_v61 = vrot.slane %v663_v14, 4  ;;  %v696_v63 = vrot.slane %v664_v37, 4  ;;  %v697_v46 = vrot.slane %v665_v41, 4 }
  0x7b   :  { %v698_v9 = vrot.slane %v666_v57, 4  ;;  %v699_v48 = vrot.slane %v667_v35, 4  ;;  %v700_v21 = vrot.slane %v668_v50, 4  ;;  %v701_v62 = vrot.slane %v669_v44, 4 }
  0x7c   :  { %v718_v16 = vadd.f32 %v686_v51, %v636_v54  ;;  %v719_v18 = vadd.f32 %v687_v33, %v637_v20  ;;  %v720_v42 = vadd.f32 %v688_v36, %v638_v49  ;;  %v721_v23 = vadd.f32 %v689_v17, %v639_v58  ;;  %v7457_v58 = vld [vmem:[#allocation12_spill] sm:$0xff] }
  0x7d   :  { %v722_v19 = vadd.f32 %v690_v28, %v640_v60  ;;  %v723_v34 = vadd.f32 %v691_v29, %v641_v13  ;;  %v724_v56 = vadd.f32 %v692_v53, %v642_v38  ;;  %v725_v0 = vadd.f32 %v693_v31, %v643_v26  ;;  %v7458_v60 = vld [vmem:[#allocation13_spill] sm:$0xff]  ;;  %v7459_v13 = vld [vmem:[#allocation14_spill] sm:$0xff]  ;;  %v7460_v38 = vld [vmem:[#allocation15_spill] sm:$0xff] }
  0x7e   :  { %v726_v32 = vadd.f32 %v694_v45, %v644_v55  ;;  %v727_v25 = vadd.f32 %v695_v61, %v645_v22  ;;  %v728_v8 = vadd.f32 %v696_v63, %v646_v59  ;;  %v729_v30 = vadd.f32 %v697_v46, %v647_v27  ;;  %v7461_v26 = vld [vmem:[#allocation16_spill] sm:$0xff]  ;;  %v7462_v55 = vld [vmem:[#allocation17_spill] sm:$0xff] }
  0x7f   :  { %v730_v52 = vadd.f32 %v698_v9, %v648_v39  ;;  %v731_v14 = vadd.f32 %v699_v48, %v649_v24  ;;  %v732_v37 = vadd.f32 %v700_v21, %v650_v15  ;;  %v733_v41 = vadd.f32 %v701_v62, %v651_v47 }
  0x80   :  { %v736_v50 = vmul.f32 %v4439_v40, %v3937_v1  ;;  %v737_v20 = vmul.f32 %v4439_v40, %v3942_v2  ;;  %v738_v54 = vmul.f32 %v4439_v40, %v3947_v3  ;;  %v739_v49 = vmul.f32 %v4439_v40, %v3952_v4 }
  0x81   :  { %v740_v63 = vmul.f32 %v4439_v40, %v3957_v5  ;;  %v741_v9 = vmul.f32 %v4439_v40, %v3962_v6  ;;  %v742_v22 = vmul.f32 %v4439_v40, %v3967_v7  ;;  %v743_v1 = vmul.f32 %v4439_v40, %v3974_v10 }
  0x82   :  { %v744_v2 = vmul.f32 %v4439_v40, %v3979_v11  ;;  %v745_v3 = vmul.f32 %v4439_v40, %v3984_v12  ;;  %v746_v4 = vmul.f32 %v4439_v40, %v7457_v58  ;;  %v747_v5 = vmul.f32 %v4439_v40, %v7458_v60  ;;  %v7465_v58 = vld [vmem:[#allocation19_spill] sm:$0xff]  ;;  %v7474_v60 = vld [vmem:[#allocation29_spill] sm:$0xff] }
  0x83   :  { %v748_v6 = vmul.f32 %v4439_v40, %v7459_v13  ;;  %v749_v7 = vmul.f32 %v4439_v40, %v7460_v38  ;;  %v750_v10 = vmul.f32 %v4439_v40, %v7461_v26  ;;  %v751_v11 = vmul.f32 %v4439_v40, %v7462_v55  ;;  %v7475_v13 = vld [vmem:[#allocation30_spill] sm:$0xff]  ;;  %v7476_v38 = vld [vmem:[#allocation31_spill] sm:$0xff]  ;;  %v7477_v26 = vld [vmem:[#allocation32_spill] sm:$0xff] }
  0x84   :  { %v768_v59 = vrot.slane %v736_v50, 6  ;;  %v769_v12 = vrot.slane %v737_v20, 6  ;;  %v770_v27 = vrot.slane %v738_v54, 6  ;;  %v771_v39 = vrot.slane %v739_v49, 6  ;;  %v7478_v55 = vld [vmem:[#allocation33_spill] sm:$0xff] }
  0x85   :  { %v772_v24 = vrot.slane %v740_v63, 6  ;;  %v773_v15 = vrot.slane %v741_v9, 6  ;;  %v774_v47 = vrot.slane %v742_v22, 6  ;;  %v775_v53 = vrot.slane %v743_v1, 6  ;;  %v7463_v1 = vld [vmem:[#allocation18_spill] sm:$0xff] }
  0x86   :  { %v776_v28 = vrot.slane %v744_v2, 6  ;;  %v777_v21 = vrot.slane %v745_v3, 6  ;;  %v778_v45 = vrot.slane %v746_v4, 6  ;;  %v779_v36 = vrot.slane %v747_v5, 6  ;;  %v7464_v2 = vld [vmem:[#allocation25_spill] sm:$0xff] }
  0x87   :  { %v780_v51 = vrot.slane %v748_v6, 6  ;;  %v781_v44 = vrot.slane %v749_v7, 6  ;;  %v782_v33 = vrot.slane %v750_v10, 6  ;;  %v783_v17 = vrot.slane %v751_v11, 6 }
  0x88   :  { %v800_v29 = vadd.f32 %v768_v59, %v718_v16  ;;  %v801_v31 = vadd.f32 %v769_v12, %v719_v18  ;;  %v802_v61 = vadd.f32 %v770_v27, %v720_v42  ;;  %v803_v40 = vadd.f32 %v771_v39, %v721_v23  ;;  %v7466_v42 = vld [vmem:[#allocation20_spill] sm:$0xff]  ;;  %v7467_v23 = vld [vmem:[#allocation21_spill] sm:$0xff]  ;;  %v7479_v59 = vld [vmem:[#allocation34_spill] sm:$0xff] }
  0x89   :  { %v804_v46 = vadd.f32 %v772_v24, %v722_v19  ;;  %v805_v48 = vadd.f32 %v773_v15, %v723_v34  ;;  %v806_v57 = vadd.f32 %v774_v47, %v724_v56  ;;  %v807_v62 = vadd.f32 %v775_v53, %v725_v0  ;;  %v7468_v34 = vld [vmem:[#allocation22_spill] sm:$0xff]  ;;  %v7469_v0 = vld [vmem:[#allocation23_spill] sm:$0xff] }
  0x8a   :  { %v808_v35 = vadd.f32 %v776_v28, %v726_v32  ;;  %v809_v50 = vadd.f32 %v777_v21, %v727_v25  ;;  %v810_v20 = vadd.f32 %v778_v45, %v728_v8  ;;  %v811_v54 = vadd.f32 %v779_v36, %v729_v30  ;;  %v7470_v25 = vld [vmem:[#allocation24_spill] sm:$0xff]  ;;  %v7471_v30 = vld [vmem:[#allocation26_spill] sm:$0xff] }
  0x8b   :  { %v812_v49 = vadd.f32 %v780_v51, %v730_v52  ;;  %v813_v63 = vadd.f32 %v781_v44, %v731_v14  ;;  %v814_v9 = vadd.f32 %v782_v33, %v732_v37  ;;  %v815_v22 = vadd.f32 %v783_v17, %v733_v41  ;;  %v7472_v14 = vld [vmem:[#allocation27_spill] sm:$0xff]  ;;  %v7473_v41 = vld [vmem:[#allocation28_spill] sm:$0xff] }
  0x8c   :  { %v818_v3 = vmul.f32 %v7464_v2, %v7463_v1  ;;  %v819_v16 = vmul.f32 %v7464_v2, %v7465_v58  ;;  %v820_v18 = vmul.f32 %v7464_v2, %v7466_v42  ;;  %v821_v19 = vmul.f32 %v7464_v2, %v7467_v23 }
  0x8d   :  { %v822_v56 = vmul.f32 %v7464_v2, %v7468_v34  ;;  %v823_v32 = vmul.f32 %v7464_v2, %v7469_v0  ;;  %v824_v8 = vmul.f32 %v7464_v2, %v7470_v25  ;;  %v825_v52 = vmul.f32 %v7464_v2, %v7471_v30 }
  0x8e   :  { %v826_v37 = vmul.f32 %v7464_v2, %v7472_v14  ;;  %v827_v4 = vmul.f32 %v7464_v2, %v7473_v41  ;;  %v828_v5 = vmul.f32 %v7464_v2, %v7474_v60  ;;  %v829_v6 = vmul.f32 %v7464_v2, %v7475_v13 }
  0x8f   :  { %v830_v7 = vmul.f32 %v7464_v2, %v7476_v38  ;;  %v831_v10 = vmul.f32 %v7464_v2, %v7477_v26  ;;  %v832_v11 = vmul.f32 %v7464_v2, %v7478_v55  ;;  %v833_v12 = vmul.f32 %v7464_v2, %v7479_v59 }
  0x90   :  { %v850_v27 = vrot.slane %v818_v3, 6  ;;  %v851_v39 = vrot.slane %v819_v16, 6  ;;  %v852_v24 = vrot.slane %v820_v18, 6  ;;  %v853_v15 = vrot.slane %v821_v19, 6 }
  0x91   :  { %v854_v47 = vrot.slane %v822_v56, 6  ;;  %v855_v53 = vrot.slane %v823_v32, 6  ;;  %v856_v28 = vrot.slane %v824_v8, 6  ;;  %v857_v21 = vrot.slane %v825_v52, 6 }
  0x92   :  { %v858_v45 = vrot.slane %v826_v37, 6  ;;  %v859_v36 = vrot.slane %v827_v4, 6  ;;  %v860_v51 = vrot.slane %v828_v5, 6  ;;  %v861_v44 = vrot.slane %v829_v6, 6  ;;  %v7486_v4 = vld [vmem:[#allocation40_spill] sm:$0xff]  ;;  %v7487_v5 = vld [vmem:[#allocation41_spill] sm:$0xff] }
  0x93   :  { %v862_v33 = vrot.slane %v830_v7, 6  ;;  %v863_v17 = vrot.slane %v831_v10, 6  ;;  %v864_v1 = vrot.slane %v832_v11, 6  ;;  %v865_v58 = vrot.slane %v833_v12, 6  ;;  %v7488_v6 = vld [vmem:[#allocation42_spill] sm:$0xff]  ;;  %v7489_v7 = vld [vmem:[#allocation43_spill] sm:$0xff] }
  0x94   :  { %v882_v42 = vadd.f32 %v850_v27, %v800_v29  ;;  %v883_v23 = vadd.f32 %v851_v39, %v801_v31  ;;  %v884_v2 = vadd.f32 %v852_v24, %v802_v61  ;;  %v885_v3 = vadd.f32 %v853_v15, %v803_v40  ;;  %v4533_v29 = vld [vmem:[%s7017_s4] sm:$0xff]  ;;  %v7480_v31 = vld [vmem:[#allocation50_spill] sm:$0xff]  ;;  %v7481_v40 = vld [vmem:[#allocation35_spill] sm:$0xff] }
  0x95   :  { %v886_v16 = vadd.f32 %v854_v47, %v804_v46  ;;  %v887_v18 = vadd.f32 %v855_v53, %v805_v48  ;;  %v888_v19 = vadd.f32 %v856_v28, %v806_v57  ;;  %v889_v34 = vadd.f32 %v857_v21, %v807_v62  ;;  %v7482_v48 = vld [vmem:[#allocation36_spill] sm:$0xff]  ;;  %v4544_v62 = vld [vmem:[%s7017_s4 + $0x8] sm:$0xff]  ;;  %v7492_v12 = vld [vmem:[#allocation46_spill] sm:$0xff] }
  0x96   :  { %v890_v56 = vadd.f32 %v858_v45, %v808_v35  ;;  %v899_v0 = vstv %s4515_s16  ;;  %v891_v32 = vadd.f32 %v859_v36, %v809_v50  ;;  %v892_v25 = vadd.f32 %v860_v51, %v810_v20  ;;  %v4553_v50 = vld [vmem:[%s7017_s4 + $0x10] sm:$0xff]  ;;  %v7490_v10 = vld [vmem:[#allocation44_spill] sm:$0xff]  ;;  %v7491_v11 = vld [vmem:[#allocation45_spill] sm:$0xff]  ;;  %s5256_s16 = sld [smem:[#allocation7 + $0x2]] }
  0x97   :  { %v893_v8 = vadd.f32 %v861_v44, %v811_v54  ;;  %v894_v30 = vadd.f32 %v862_v33, %v812_v49  ;;  %v895_v52 = vadd.f32 %v863_v17, %v813_v63  ;;  %v896_v14 = vadd.f32 %v864_v1, %v814_v9  ;;  %v7483_v54 = vld [vmem:[#allocation37_spill] sm:$0xff]  ;;  %v7484_v63 = vld [vmem:[#allocation38_spill] sm:$0xff]  ;;  %v7493_v39 = vld [vmem:[#allocation47_spill] sm:$0xff] }
  0x98   :  { %v897_v37 = vadd.f32 %v865_v58, %v815_v22  ;;  %v4537_v61 = vadd.f32 %v4533_v29, %v7480_v31  ;;  %v900_v46 = vmul.f32 %v899_v0, %v7481_v40  ;;  %v901_v57 = vmul.f32 %v899_v0, %v7482_v48  ;;  %v7485_v22 = vld [vmem:[#allocation39_spill] sm:$0xff]  ;;  %v7494_v15 = vld [vmem:[#allocation48_spill] sm:$0xff]  ;;  %v7495_v53 = vld [vmem:[#allocation49_spill] sm:$0xff] }
  0x99   :  { %v4548_v35 = vadd.f32 %v4544_v62, %v7480_v31  ;;  %v4557_v20 = vadd.f32 %v4553_v50, %v7480_v31  ;;  %v902_v49 = vmul.f32 %v899_v0, %v7483_v54  ;;  %v903_v9 = vmul.f32 %v899_v0, %v7484_v63 }
  0x9a   :  { %v904_v41 = vmul.f32 %v899_v0, %v7485_v22  ;;  %v905_v60 = vmul.f32 %v899_v0, %v7486_v4  ;;  %v906_v13 = vmul.f32 %v899_v0, %v7487_v5  ;;  %v907_v38 = vmul.f32 %v899_v0, %v7488_v6 }
  0x9b   :  { %v908_v26 = vmul.f32 %v899_v0, %v7489_v7  ;;  %v909_v55 = vmul.f32 %v899_v0, %v7490_v10  ;;  %v910_v59 = vmul.f32 %v899_v0, %v7491_v11  ;;  %v911_v27 = vmul.f32 %v899_v0, %v7492_v12 }
  0x9c   :  { %v912_v24 = vmul.f32 %v899_v0, %v7493_v39  ;;  %v913_v47 = vmul.f32 %v899_v0, %v7494_v15  ;;  %v914_v28 = vmul.f32 %v899_v0, %v7495_v53  ;;  %v915_v21 = vmul.f32 %v899_v0, %v4256_v43 }
  0x9d   :  { %v932_v45 = vrot.slane %v900_v46, 6  ;;  %v933_v36 = vrot.slane %v901_v57, 6  ;;  %v934_v51 = vrot.slane %v902_v49, 6  ;;  %v935_v44 = vrot.slane %v903_v9, 6 }
  0x9e   :  { %v936_v33 = vrot.slane %v904_v41, 6  ;;  %v937_v17 = vrot.slane %v905_v60, 6  ;;  %v938_v1 = vrot.slane %v906_v13, 6  ;;  %v939_v58 = vrot.slane %v907_v38, 6 }
  0x9f   :  { %v940_v40 = vrot.slane %v908_v26, 6  ;;  %v941_v48 = vrot.slane %v909_v55, 6  ;;  %v942_v54 = vrot.slane %v910_v59, 6  ;;  %v943_v63 = vrot.slane %v911_v27, 6  ;;  %v4652_v26 = vld [vmem:[%s7017_s4 + $0x40] sm:$0xff]  ;;  %v4659_v55 = vld [vmem:[%s7017_s4 + $0x48] sm:$0xff] }
  0xa0   :  { %v944_v22 = vrot.slane %v912_v24, 6  ;;  %v945_v4 = vrot.slane %v913_v47, 6  ;;  %v946_v5 = vrot.slane %v914_v28, 6  ;;  %v947_v43 = vrot.slane %v915_v21, 6  ;;  %7517 = vst [vmem:[#allocation33_spill] sm:$0xff] %v4652_v26  ;;  %v4666_v59 = vld [vmem:[%s7017_s4 + $0x50] sm:$0xff] }
  0xa1   :  { %v4577_v0 = vadd.f32 %v932_v45, %v882_v42  ;;  %v4579_v46 = vadd.f32 %v933_v36, %v883_v23  ;;  %v4583_v57 = vadd.f32 %v934_v51, %v884_v2  ;;  %v4585_v49 = vadd.f32 %v935_v44, %v885_v3  ;;  %7518 = vst [vmem:[#allocation34_spill] sm:$0xff] %v4659_v55  ;;  %v4673_v27 = vld [vmem:[%s7017_s4 + $0x58] sm:$0xff]  ;;  %v4680_v24 = vld [vmem:[%s7017_s4 + $0x60] sm:$0xff]  ;;  %v4687_v47 = vld [vmem:[%s7017_s4 + $0x68] sm:$0xff] }
  0xa2   :  { %v4587_v9 = vadd.f32 %v936_v33, %v886_v16  ;;  %v4589_v41 = vadd.f32 %v937_v17, %v887_v18  ;;  %v4591_v60 = vadd.f32 %v938_v1, %v888_v19  ;;  %v4593_v13 = vadd.f32 %v939_v58, %v889_v34  ;;  %v4614_v19 = vld [vmem:[%s7017_s4 + $0x18] sm:$0xff]  ;;  %7519 = vst [vmem:[#allocation50_spill] sm:$0xff] %v4666_v59  ;;  %v4694_v28 = vld [vmem:[%s7017_s4 + $0x70] sm:$0xff] }
  0xa3   :  { %7496 = vst [vmem:[#allocation12_spill] sm:$0xff] %v4577_v0  ;;  %v4595_v6 = vadd.f32 %v940_v40, %v890_v56  ;;  %v4597_v42 = vadd.f32 %v941_v48, %v891_v32  ;;  %v4599_v23 = vadd.f32 %v942_v54, %v892_v25  ;;  %v4601_v38 = vadd.f32 %v943_v63, %v893_v8  ;;  %v4623_v56 = vld [vmem:[%s7017_s4 + $0x20] sm:$0xff]  ;;  %v4630_v25 = vld [vmem:[%s7017_s4 + $0x28] sm:$0xff]  ;;  %v4701_v45 = vld [vmem:[%s7017_s4 + $0x78] sm:$0xff] }
  0xa4   :  { %7497 = vst [vmem:[#allocation13_spill] sm:$0xff] %v4579_v46  ;;  %v4603_v2 = vadd.f32 %v944_v22, %v894_v30  ;;  %v4605_v3 = vadd.f32 %v945_v4, %v895_v52  ;;  %v4607_v16 = vadd.f32 %v946_v5, %v896_v14  ;;  %v4609_v18 = vadd.f32 %v947_v43, %v897_v37  ;;  %v4637_v30 = vld [vmem:[%s7017_s4 + $0x30] sm:$0xff]  ;;  %v4644_v14 = vld [vmem:[%s7017_s4 + $0x38] sm:$0xff] }
  0xa5   :  { %7498 = vst [vmem:[#allocation14_spill] sm:$0xff] %v4583_v57  ;;  %v4618_v34 = vadd.f32 %v4614_v19, %v7480_v31  ;;  %v986_v32 = vadd.f32 %v4623_v56, %v7480_v31  ;;  %v987_v8 = vadd.f32 %v4630_v25, %v7480_v31  ;;  %v988_v52 = vadd.f32 %v4637_v30, %v7480_v31 }
  0xa6   :  { %7499 = vst [vmem:[#allocation15_spill] sm:$0xff] %v4585_v49  ;;  %v989_v37 = vadd.f32 %v4644_v14, %v7480_v31  ;;  %v999_v7 = vstv %s4573_s21  ;;  %v990_v10 = vadd.f32 %v4652_v26, %v7480_v31  ;;  %v991_v11 = vadd.f32 %v4659_v55, %v7480_v31  ;;  %s4993_s21 = sld [smem:[#allocation2 + $0x5]] }
  0xa7   :  { %7500 = vst [vmem:[#allocation16_spill] sm:$0xff] %v4587_v9  ;;  %v992_v12 = vadd.f32 %v4666_v59, %v7480_v31  ;;  %v993_v39 = vadd.f32 %v4673_v27, %v7480_v31  ;;  %v994_v15 = vadd.f32 %v4680_v24, %v7480_v31  ;;  %v995_v53 = vadd.f32 %v4687_v47, %v7480_v31 }
  0xa8   :  { %7501 = vst [vmem:[#allocation17_spill] sm:$0xff] %v4589_v41  ;;  %v996_v21 = vadd.f32 %v4694_v28, %v7480_v31  ;;  %v997_v36 = vadd.f32 %v4701_v45, %v7480_v31  ;;  %v1000_v51 = vmul.f32 %v4533_v29, %v999_v7  ;;  %v1001_v44 = vmul.f32 %v4544_v62, %v999_v7 }
  0xa9   :  { %7502 = vst [vmem:[#allocation18_spill] sm:$0xff] %v4591_v60  ;;  %v4708_v33 = vstv %s4575_s22  ;;  %v4711_v17 = vstv %s4581_s23  ;;  %v1002_v1 = vmul.f32 %v4553_v50, %v999_v7  ;;  %v1003_v58 = vmul.f32 %v4614_v19, %v999_v7  ;;  %s5506_s22 = sld [smem:[#allocation6 + $0x8]] }
  0xaa   :  { %7503 = vst [vmem:[#allocation25_spill] sm:$0xff] %v4593_v13  ;;  %v1004_v40 = vmul.f32 %v4623_v56, %v999_v7  ;;  %v1005_v48 = vmul.f32 %v4630_v25, %v999_v7  ;;  %v1006_v54 = vmul.f32 %v4637_v30, %v999_v7  ;;  %v1007_v31 = vmul.f32 %v4644_v14, %v999_v7  ;;  %s5510_s23 = sld [smem:[#allocation2 + $0x9]] }
  0xab   :  { %7504 = vst [vmem:[#allocation19_spill] sm:$0xff] %v4595_v6  ;;  %v1008_v63 = vmul.f32 %v4652_v26, %v999_v7  ;;  %v1009_v22 = vmul.f32 %v4659_v55, %v999_v7  ;;  %v1010_v4 = vmul.f32 %v4666_v59, %v999_v7  ;;  %v1011_v5 = vmul.f32 %v4673_v27, %v999_v7 }
  0xac   :  { %7505 = vst [vmem:[#allocation20_spill] sm:$0xff] %v4597_v42  ;;  %v1012_v43 = vmul.f32 %v4680_v24, %v999_v7  ;;  %v1035_v42 = vrot.slane %v1003_v58, 6  ;;  %v1036_v6 = vrot.slane %v1004_v40, 6  ;;  %v1037_v13 = vrot.slane %v1005_v48, 6  ;;  %v4857_v48 = vld [vmem:[%s7018_s5 + $0x68] sm:$0xff] }
  0xad   :  { %7506 = vst [vmem:[#allocation21_spill] sm:$0xff] %v4599_v23  ;;  %v1034_v23 = vrot.slane %v1002_v1, 6  ;;  %v1038_v60 = vrot.slane %v1006_v54, 6  ;;  %v1039_v41 = vrot.slane %v1007_v31, 6  ;;  %v1040_v9 = vrot.slane %v1008_v63, 6  ;;  %v4864_v31 = vld [vmem:[%s7018_s5 + $0x70] sm:$0xff] }
  0xae   :  { %7507 = vst [vmem:[#allocation22_spill] sm:$0xff] %v4601_v38  ;;  %v1033_v38 = vrot.slane %v1001_v44, 6  ;;  %v1041_v49 = vrot.slane %v1009_v22, 6  ;;  %v1042_v57 = vrot.slane %v1010_v4, 6  ;;  %v1043_v46 = vrot.slane %v1011_v5, 6  ;;  %v4871_v22 = vld [vmem:[%s7018_s5 + $0x78] sm:$0xff] }
  0xaf   :  { %7508 = vst [vmem:[#allocation23_spill] sm:$0xff] %v4603_v2  ;;  %v1032_v2 = vrot.slane %v1000_v51, 6  ;;  %v1044_v0 = vrot.slane %v1012_v43, 6  ;;  %v4734_v51 = vadd.f32 %v1034_v23, %v4557_v20  ;;  %v4737_v44 = vadd.f32 %v1035_v42, %v4618_v34  ;;  %v4801_v34 = vld [vmem:[%s7018_s5 + $0x28] sm:$0xff] }
  0xb0   :  { %7509 = vst [vmem:[#allocation24_spill] sm:$0xff] %v4605_v3  ;;  %v1015_v3 = vmul.f32 %v4701_v45, %v999_v7  ;;  %v4739_v1 = vadd.f32 %v1036_v6, %v986_v32  ;;  %v4741_v58 = vadd.f32 %v1037_v13, %v987_v8  ;;  %v4743_v40 = vadd.f32 %v1038_v60, %v988_v52  ;;  %v4787_v60 = vld [vmem:[%s7018_s5 + $0x18] sm:$0xff]  ;;  %v4808_v8 = vld [vmem:[%s7018_s5 + $0x30] sm:$0xff] }
  0xb1   :  { %7510 = vst [vmem:[#allocation26_spill] sm:$0xff] %v4607_v16  ;;  %v1014_v16 = vmul.f32 %v4694_v28, %v999_v7  ;;  %v4755_v20 = vadd.f32 %v1044_v0, %v994_v15  ;;  %v1085_v23 = vmul.f32 %v4787_v60, %v4708_v33  ;;  %v1087_v32 = vmul.f32 %v4801_v34, %v4708_v33 }
  0xb2   :  { %7511 = vst [vmem:[#allocation27_spill] sm:$0xff] %v4609_v18  ;;  %v1013_v18 = vmul.f32 %v4687_v47, %v999_v7  ;;  %v4731_v7 = vadd.f32 %v1033_v38, %v4548_v35  ;;  %v4751_v35 = vadd.f32 %v1042_v57, %v992_v12  ;;  %v4753_v38 = vadd.f32 %v1043_v46, %v993_v39  ;;  %v4773_v46 = vld [vmem:[%s7018_s5 + $0x8] sm:$0xff]  ;;  %v4780_v57 = vld [vmem:[%s7018_s5 + $0x10] sm:$0xff] }
  0xb3   :  { %7512 = vst [vmem:[#allocation28_spill] sm:$0xff] %v4614_v19  ;;  %v1083_v0 = vmul.f32 %v4773_v46, %v4708_v33  ;;  %v1088_v52 = vmul.f32 %v4808_v8, %v4708_v33  ;;  %v1095_v54 = vmul.f32 %v4857_v48, %v4708_v33  ;;  %v1096_v63 = vmul.f32 %v4864_v31, %v4708_v33 }
  0xb4   :  { %7513 = vst [vmem:[#allocation29_spill] sm:$0xff] %v4623_v56  ;;  %v1097_v4 = vmul.f32 %v4871_v22, %v4708_v33 }
  0xb5   :  { %7514 = vst [vmem:[#allocation30_spill] sm:$0xff] %v4630_v25  ;;  %v1115_v43 = vrot.slane %v1083_v0, 6 }
  0xb6   :  { %7515 = vst [vmem:[#allocation31_spill] sm:$0xff] %v4637_v30 }
  0xb7   :  { %7516 = vst [vmem:[#allocation32_spill] sm:$0xff] %v4644_v14 }
  0xb8   :  { %7520 = vst [vmem:[#allocation35_spill] sm:$0xff] %v4673_v27  ;;  %v1046_v27 = vrot.slane %v1014_v16, 6  ;;  %v4745_v16 = vadd.f32 %v1039_v41, %v989_v37  ;;  %v4766_v41 = vld [vmem:[%s7018_s5] sm:$0xff]  ;;  %v4815_v37 = vld [vmem:[%s7018_s5 + $0x38] sm:$0xff] }
  0xb9   :  { %7521 = vst [vmem:[#allocation36_spill] sm:$0xff] %v4680_v24  ;;  %v1045_v24 = vrot.slane %v1013_v18, 6 }
  0xba   :  { %7522 = vst [vmem:[#allocation37_spill] sm:$0xff] %v4687_v47  ;;  %v1047_v47 = vrot.slane %v1015_v3, 6  ;;  %v4747_v3 = vadd.f32 %v1040_v9, %v990_v10  ;;  %v4759_v6 = vadd.f32 %v1046_v27, %v996_v21  ;;  %v1084_v9 = vmul.f32 %v4780_v57, %v4708_v33  ;;  %v4829_v27 = vld [vmem:[%s7018_s5 + $0x48] sm:$0xff]  ;;  %v4850_v21 = vld [vmem:[%s7018_s5 + $0x60] sm:$0xff] }
  0xbb   :  { %7523 = vst [vmem:[#allocation38_spill] sm:$0xff] %v4694_v28  ;;  %v4728_v28 = vadd.f32 %v1032_v2, %v4537_v61  ;;  %v4749_v61 = vadd.f32 %v1041_v49, %v991_v11  ;;  %v4757_v42 = vadd.f32 %v1045_v24, %v995_v53  ;;  %v1082_v49 = vmul.f32 %v4766_v41, %v4708_v33  ;;  %v4794_v2 = vld [vmem:[%s7018_s5 + $0x20] sm:$0xff]  ;;  %v4836_v24 = vld [vmem:[%s7018_s5 + $0x50] sm:$0xff] }
  0xbc   :  { %7524 = vst [vmem:[#allocation39_spill] sm:$0xff] %v4701_v45  ;;  %v4761_v13 = vadd.f32 %v1047_v47, %v997_v36  ;;  %v1086_v18 = vmul.f32 %v4794_v2, %v4708_v33  ;;  %v1089_v10 = vmul.f32 %v4815_v37, %v4708_v33  ;;  %v4822_v11 = vld [vmem:[%s7018_s5 + $0x40] sm:$0xff]  ;;  %v1091_v39 = vmul.f32 %v4829_v27, %v4708_v33  ;;  %v4843_v47 = vld [vmem:[%s7018_s5 + $0x58] sm:$0xff] }
  0xbd   :  { %7525 = vst [vmem:[#allocation40_spill] sm:$0xff] %v4766_v41  ;;  %v1090_v12 = vmul.f32 %v4822_v11, %v4708_v33  ;;  %v1092_v15 = vmul.f32 %v4836_v24, %v4708_v33  ;;  %v1093_v53 = vmul.f32 %v4843_v47, %v4708_v33  ;;  %v1094_v36 = vmul.f32 %v4850_v21, %v4708_v33 }
  0xbe   :  { %7526 = vst [vmem:[#allocation41_spill] sm:$0xff] %v4773_v46  ;;  %v1114_v5 = vrot.slane %v1082_v49, 6  ;;  %v1129_v46 = vrot.slane %v1097_v4, 6  ;;  %v4879_v33 = vadd.f32 %v1115_v43, %v4731_v7 }
  0xbf   :  { %7527 = vst [vmem:[#allocation42_spill] sm:$0xff] %v4780_v57  ;;  %v1128_v57 = vrot.slane %v1096_v63, 6  ;;  %v5035_v63 = vld [vmem:[%s7019_s6 + $0x78] sm:$0xff] }
  0xc0   :  { %7528 = vst [vmem:[#allocation43_spill] sm:$0xff] %v4787_v60  ;;  %v1127_v60 = vrot.slane %v1095_v54, 6  ;;  %v4876_v41 = vadd.f32 %v1114_v5, %v4728_v28  ;;  %v5028_v54 = vld [vmem:[%s7019_s6 + $0x70] sm:$0xff]  ;;  %v1179_v4 = vmul.f32 %v5035_v63, %v4711_v17 }
  0xc1   :  { %7529 = vst [vmem:[#allocation44_spill] sm:$0xff] %v4794_v2  ;;  %v1126_v2 = vrot.slane %v1094_v36, 6  ;;  %v5019_v36 = vld [vmem:[%s7019_s6 + $0x68] sm:$0xff] }
  0xc2   :  { %7530 = vst [vmem:[#allocation45_spill] sm:$0xff] %v4801_v34  ;;  %v1124_v34 = vrot.slane %v1092_v15, 6  ;;  %v5005_v15 = vld [vmem:[%s7019_s6 + $0x58] sm:$0xff] }
  0xc3   :  { %7531 = vst [vmem:[#allocation46_spill] sm:$0xff] %v4808_v8  ;;  %v1123_v8 = vrot.slane %v1091_v39, 6  ;;  %v4998_v39 = vld [vmem:[%s7019_s6 + $0x50] sm:$0xff] }
  0xc4   :  { %7532 = vst [vmem:[#allocation47_spill] sm:$0xff] %v4815_v37  ;;  %v1122_v37 = vrot.slane %v1090_v12, 6  ;;  %v4989_v12 = vld [vmem:[%s7019_s6 + $0x48] sm:$0xff] }
  0xc5   :  { %7533 = vst [vmem:[#allocation48_spill] sm:$0xff] %v4822_v11  ;;  %v1121_v11 = vrot.slane %v1089_v10, 6  ;;  %v4982_v10 = vld [vmem:[%s7019_s6 + $0x40] sm:$0xff] }
  0xc6   :  { %7534 = vst [vmem:[#allocation49_spill] sm:$0xff] %v4829_v27  ;;  %v1120_v27 = vrot.slane %v1088_v52, 6  ;;  %v4900_v7 = vadd.f32 %v1122_v37, %v4747_v3  ;;  %v4921_v3 = vadd.f32 %v1129_v46, %v4761_v13  ;;  %v4947_v13 = vld [vmem:[%s7019_s6 + $0x18] sm:$0xff] }
  0xc7   :  { %7535 = vst [vmem:[#allocation51_spill] sm:$0xff] %v4836_v24  ;;  %v1119_v24 = vrot.slane %v1087_v32, 6  ;;  %v4897_v28 = vadd.f32 %v1121_v11, %v4745_v16  ;;  %v4918_v16 = vadd.f32 %v1128_v57, %v4759_v6  ;;  %v1167_v46 = vmul.f32 %v4947_v13, %v4711_v17  ;;  %v4954_v57 = vld [vmem:[%s7019_s6 + $0x20] sm:$0xff]  ;;  %v4968_v32 = vld [vmem:[%s7019_s6 + $0x30] sm:$0xff]  ;;  %v4975_v52 = vld [vmem:[%s7019_s6 + $0x38] sm:$0xff] }
  0xc8   :  { %7536 = vst [vmem:[#allocation52_spill] sm:$0xff] %v4843_v47  ;;  %v1118_v47 = vrot.slane %v1086_v18, 6  ;;  %v4894_v18 = vadd.f32 %v1120_v27, %v4743_v40  ;;  %v4915_v40 = vadd.f32 %v1127_v60, %v4757_v42  ;;  %v4940_v42 = vld [vmem:[%s7019_s6 + $0x10] sm:$0xff]  ;;  %v1168_v60 = vmul.f32 %v4954_v57, %v4711_v17 }
  0xc9   :  { %7537 = vst [vmem:[#allocation53_spill] sm:$0xff] %v4850_v21  ;;  %v1116_v21 = vrot.slane %v1084_v9, 6  ;;  %v1166_v6 = vmul.f32 %v4940_v42, %v4711_v17  ;;  %v1171_v37 = vmul.f32 %v4975_v52, %v4711_v17  ;;  %v1172_v11 = vmul.f32 %v4982_v10, %v4711_v17 }
  0xca   :  { %7538 = vst [vmem:[#allocation54_spill] sm:$0xff] %v4857_v48  ;;  %v1117_v48 = vrot.slane %v1085_v23, 6  ;;  %v4888_v9 = vadd.f32 %v1118_v47, %v4739_v1  ;;  %v4891_v23 = vadd.f32 %v1119_v24, %v4741_v58  ;;  %v4912_v58 = vadd.f32 %v1126_v2, %v4755_v20  ;;  %v4961_v2 = vld [vmem:[%s7019_s6 + $0x28] sm:$0xff] }
  0xcb   :  { %7539 = vst [vmem:[#allocation55_spill] sm:$0xff] %v4864_v31  ;;  %v1125_v31 = vrot.slane %v1093_v53, 6  ;;  %v4882_v49 = vadd.f32 %v1116_v21, %v4734_v51  ;;  %v4903_v51 = vadd.f32 %v1123_v8, %v4749_v61  ;;  %v4926_v61 = vld [vmem:[%s7019_s6] sm:$0xff]  ;;  %v1170_v8 = vmul.f32 %v4968_v32, %v4711_v17 }
  0xcc   :  { %v4885_v0 = vadd.f32 %v1117_v48, %v4737_v44  ;;  %v4906_v44 = vadd.f32 %v1124_v34, %v4751_v35  ;;  %v1164_v35 = vmul.f32 %v4926_v61, %v4711_v17  ;;  %7540 = vst [vmem:[#allocation56_spill] sm:$0xff] %v4947_v13  ;;  %v1169_v34 = vmul.f32 %v4961_v2, %v4711_v17  ;;  %v5012_v53 = vld [vmem:[%s7019_s6 + $0x60] sm:$0xff] }
  0xcd   :  { %v4909_v1 = vadd.f32 %v1125_v31, %v4753_v38  ;;  %v4933_v38 = vld [vmem:[%s7019_s6 + $0x8] sm:$0xff]  ;;  %7541 = vst [vmem:[#allocation57_spill] sm:$0xff] %v4954_v57  ;;  %v1173_v27 = vmul.f32 %v4989_v12, %v4711_v17  ;;  %v1174_v24 = vmul.f32 %v4998_v39, %v4711_v17  ;;  %v1175_v47 = vmul.f32 %v5005_v15, %v4711_v17 }
  0xce   :  { %v1165_v20 = vmul.f32 %v4933_v38, %v4711_v17  ;;  %7542 = vst [vmem:[#allocation58_spill] sm:$0xff] %v4961_v2  ;;  %v1176_v21 = vmul.f32 %v5012_v53, %v4711_v17  ;;  %v1177_v48 = vmul.f32 %v5019_v36, %v4711_v17  ;;  %v1178_v31 = vmul.f32 %v5028_v54, %v4711_v17 }
  0xcf   :  { %7543 = vst [vmem:[#allocation59_spill] sm:$0xff] %v4968_v32  ;;  %v1196_v5 = vrot.slane %v1164_v35, 6  ;;  %v1206_v32 = vrot.slane %v1174_v24, 6  ;;  %v1207_v2 = vrot.slane %v1175_v47, 6  ;;  %v1211_v35 = vrot.slane %v1179_v4, 6  ;;  %v7554_v47 = vld [vmem:[#allocation37_spill] sm:$0xff] }
  0xd0   :  { %7544 = vst [vmem:[#allocation60_spill] sm:$0xff] %v4975_v52  ;;  %v1197_v43 = vrot.slane %v1165_v20, 6  ;;  %v1205_v52 = vrot.slane %v1173_v27, 6  ;;  %v1208_v57 = vrot.slane %v1176_v21, 6  ;;  %v1209_v13 = vrot.slane %v1177_v48, 6  ;;  %v7555_v21 = vld [vmem:[#allocation38_spill] sm:$0xff] }
  0xd1   :  { %7545 = vst [vmem:[#allocation61_spill] sm:$0xff] %v4982_v10  ;;  %v1204_v10 = vrot.slane %v1172_v11, 6  ;;  %v1210_v17 = vrot.slane %v1178_v31, 6  ;;  %v1228_v20 = vadd.f32 %v1196_v5, %v4876_v41  ;;  %v1245_v41 = vstv %s4993_s21 }
  0xd2   :  { %7546 = vst [vmem:[#allocation62_spill] sm:$0xff] %v4989_v12  ;;  %v1202_v12 = vrot.slane %v1170_v8, 6  ;;  %v1238_v24 = vadd.f32 %v1206_v32, %v4906_v44  ;;  %v1248_v44 = vmul.f32 %v4553_v50, %v1245_v41  ;;  %v7552_v32 = vld [vmem:[#allocation35_spill] sm:$0xff]  ;;  %v1261_v48 = vmul.f32 %v4701_v45, %v1245_v41 }
  0xd3   :  { %7547 = vst [vmem:[#allocation63_spill] sm:$0xff] %v4998_v39  ;;  %v1201_v39 = vrot.slane %v1169_v34, 6  ;;  %v1236_v27 = vadd.f32 %v1204_v10, %v4900_v7  ;;  %v1247_v7 = vmul.f32 %v4544_v62, %v1245_v41  ;;  %v5064_v10 = vstv %s5039_s12  ;;  %s5843_s12 = sld [smem:[#allocation4 + $0x9]] }
  0xd4   :  { %7548 = vst [vmem:[#allocation64_spill] sm:$0xff] %v5005_v15  ;;  %v1200_v15 = vrot.slane %v1168_v60, 6 }
  0xd5   :  { %7549 = vst [vmem:[#allocation65_spill] sm:$0xff] %v5012_v53  ;;  %v1199_v53 = vrot.slane %v1167_v46, 6  ;;  %v1233_v8 = vadd.f32 %v1201_v39, %v4891_v23  ;;  %v1242_v23 = vadd.f32 %v1210_v17, %v4918_v16  ;;  %v1243_v39 = vadd.f32 %v1211_v35, %v4921_v3 }
  0xd6   :  { %7550 = vst [vmem:[#allocation66_spill] sm:$0xff] %v5019_v36  ;;  %v1198_v36 = vrot.slane %v1166_v6, 6  ;;  %v1229_v6 = vadd.f32 %v1197_v43, %v4879_v33  ;;  %v1232_v34 = vadd.f32 %v1200_v15, %v4888_v9  ;;  %v1237_v33 = vadd.f32 %v1205_v52, %v4903_v51 }
  0xd7   :  { %7551 = vst [vmem:[#allocation67_spill] sm:$0xff] %v5028_v54  ;;  %v1203_v54 = vrot.slane %v1171_v37, 6  ;;  %v1231_v60 = vadd.f32 %v1199_v53, %v4885_v0  ;;  %v1234_v37 = vadd.f32 %v1202_v12, %v4894_v18  ;;  %v1240_v0 = vadd.f32 %v1208_v57, %v4912_v58  ;;  %v7553_v12 = vld [vmem:[#allocation36_spill] sm:$0xff] }
  0xd8   :  { %v1230_v46 = vadd.f32 %v1198_v36, %v4882_v49  ;;  %v1239_v49 = vadd.f32 %v1207_v2, %v4909_v1  ;;  %v1241_v9 = vadd.f32 %v1209_v13, %v4915_v40  ;;  %v1279_v18 = vstv %s5023_s30 }
  0xd9   :  { %v1235_v11 = vadd.f32 %v1203_v54, %v4897_v28  ;;  %v1246_v28 = vmul.f32 %v4533_v29, %v1245_v41  ;;  %v5067_v51 = vstv %s5041_s13  ;;  %v1249_v1 = vmul.f32 %v4614_v19, %v1245_v41  ;;  %v7557_v19 = vld [vmem:[#allocation41_spill] sm:$0xff]  ;;  %s5853_s13 = sld [smem:[#allocation6 + $0x9]] }
  0xda   :  { %v1250_v58 = vmul.f32 %v4623_v56, %v1245_v41  ;;  %v1251_v40 = vmul.f32 %v4630_v25, %v1245_v41  ;;  %v1252_v16 = vmul.f32 %v4637_v30, %v1245_v41  ;;  %v1253_v3 = vmul.f32 %v4644_v14, %v1245_v41  ;;  %v7556_v56 = vld [vmem:[#allocation40_spill] sm:$0xff] }
  0xdb   :  { %v1254_v13 = vmul.f32 %v4652_v26, %v1245_v41  ;;  %v1255_v57 = vmul.f32 %v4659_v55, %v1245_v41  ;;  %v1256_v2 = vmul.f32 %v4666_v59, %v1245_v41  ;;  %v1257_v52 = vmul.f32 %v7552_v32, %v1245_v41 }
  0xdc   :  { %v1258_v15 = vmul.f32 %v7553_v12, %v1245_v41  ;;  %v1259_v53 = vmul.f32 %v7554_v47, %v1245_v41  ;;  %v1260_v36 = vmul.f32 %v7555_v21, %v1245_v41  ;;  %v1262_v54 = vadd.f32 %v1246_v28, %v1228_v20  ;;  %v7558_v20 = vld [vmem:[#allocation42_spill] sm:$0xff]  ;;  %v7566_v28 = vld [vmem:[#allocation51_spill] sm:$0xff] }
  0xdd   :  { %v1263_v31 = vadd.f32 %v1247_v7, %v1229_v6  ;;  %v1264_v4 = vadd.f32 %v1248_v44, %v1230_v46  ;;  %v1265_v5 = vadd.f32 %v1249_v1, %v1231_v60  ;;  %v1266_v43 = vadd.f32 %v1250_v58, %v1232_v34  ;;  %v7559_v46 = vld [vmem:[#allocation43_spill] sm:$0xff]  ;;  %v7560_v34 = vld [vmem:[#allocation44_spill] sm:$0xff]  ;;  %v7568_v58 = vld [vmem:[#allocation53_spill] sm:$0xff] }
  0xde   :  { %v1267_v17 = vadd.f32 %v1251_v40, %v1233_v8  ;;  %v1268_v35 = vadd.f32 %v1252_v16, %v1234_v37  ;;  %v1269_v55 = vadd.f32 %v1253_v3, %v1235_v11  ;;  %v1270_v26 = vadd.f32 %v1254_v13, %v1236_v27  ;;  %v7561_v37 = vld [vmem:[#allocation45_spill] sm:$0xff]  ;;  %v7562_v27 = vld [vmem:[#allocation46_spill] sm:$0xff]  ;;  %v7567_v44 = vld [vmem:[#allocation52_spill] sm:$0xff] }
  0xdf   :  { %v1271_v59 = vadd.f32 %v1255_v57, %v1237_v33  ;;  %v1272_v14 = vadd.f32 %v1256_v2, %v1238_v24  ;;  %v1273_v32 = vadd.f32 %v1257_v52, %v1239_v49  ;;  %v1274_v30 = vadd.f32 %v1258_v15, %v1240_v0  ;;  %v7563_v24 = vld [vmem:[#allocation47_spill] sm:$0xff]  ;;  %v7564_v0 = vld [vmem:[#allocation48_spill] sm:$0xff]  ;;  %v7569_v16 = vld [vmem:[#allocation54_spill] sm:$0xff] }
  0xe0   :  { %v1275_v12 = vadd.f32 %v1259_v53, %v1241_v9  ;;  %v1276_v25 = vadd.f32 %v1260_v36, %v1242_v23  ;;  %v1277_v47 = vadd.f32 %v1261_v48, %v1243_v39  ;;  %v1280_v21 = vmul.f32 %v7556_v56, %v1279_v18  ;;  %v7565_v23 = vld [vmem:[#allocation49_spill] sm:$0xff]  ;;  %v7570_v13 = vld [vmem:[#allocation55_spill] sm:$0xff] }
  0xe1   :  { %v1281_v41 = vmul.f32 %v7557_v19, %v1279_v18  ;;  %v1282_v6 = vmul.f32 %v7558_v20, %v1279_v18  ;;  %v1283_v60 = vmul.f32 %v7559_v46, %v1279_v18  ;;  %v1284_v8 = vmul.f32 %v7560_v34, %v1279_v18 }
  0xe2   :  { %v1285_v11 = vmul.f32 %v7561_v37, %v1279_v18  ;;  %v1286_v33 = vmul.f32 %v7562_v27, %v1279_v18  ;;  %v1287_v49 = vmul.f32 %v7563_v24, %v1279_v18  ;;  %v1288_v9 = vmul.f32 %v7564_v0, %v1279_v18 }
  0xe3   :  { %v1289_v39 = vmul.f32 %v7565_v23, %v1279_v18  ;;  %v1290_v7 = vmul.f32 %v7566_v28, %v1279_v18  ;;  %v1291_v1 = vmul.f32 %v7567_v44, %v1279_v18  ;;  %v1292_v40 = vmul.f32 %v7568_v58, %v1279_v18 }
  0xe4   :  { %v1293_v3 = vmul.f32 %v7569_v16, %v1279_v18  ;;  %v1294_v57 = vmul.f32 %v7570_v13, %v1279_v18  ;;  %v1295_v2 = vmul.f32 %v4871_v22, %v1279_v18  ;;  %v1296_v52 = vadd.f32 %v1280_v21, %v1262_v54  ;;  %v7571_v54 = vld [vmem:[#allocation56_spill] sm:$0xff] }
  0xe5   :  { %v1297_v15 = vadd.f32 %v1281_v41, %v1263_v31  ;;  %v1298_v53 = vadd.f32 %v1282_v6, %v1264_v4  ;;  %v1299_v36 = vadd.f32 %v1283_v60, %v1265_v5  ;;  %v1300_v48 = vadd.f32 %v1284_v8, %v1266_v43  ;;  %v7576_v31 = vld [vmem:[#allocation61_spill] sm:$0xff]  ;;  %v7577_v5 = vld [vmem:[#allocation62_spill] sm:$0xff]  ;;  %v7579_v41 = vld [vmem:[#allocation64_spill] sm:$0xff] }
  0xe6   :  { %v1301_v0 = vadd.f32 %v1285_v11, %v1267_v17  ;;  %v1302_v24 = vadd.f32 %v1286_v33, %v1268_v35  ;;  %v1303_v23 = vadd.f32 %v1287_v49, %v1269_v55  ;;  %v1304_v27 = vadd.f32 %v1288_v9, %v1270_v26  ;;  %v7572_v26 = vld [vmem:[#allocation57_spill] sm:$0xff]  ;;  %v7578_v17 = vld [vmem:[#allocation63_spill] sm:$0xff]  ;;  %v7581_v11 = vld [vmem:[#allocation66_spill] sm:$0xff] }
  0xe7   :  { %v1305_v28 = vadd.f32 %v1289_v39, %v1271_v59  ;;  %v1306_v37 = vadd.f32 %v1290_v7, %v1272_v14  ;;  %v1307_v44 = vadd.f32 %v1291_v1, %v1273_v32  ;;  %v1308_v34 = vadd.f32 %v1292_v40, %v1274_v30  ;;  %v7573_v30 = vld [vmem:[#allocation58_spill] sm:$0xff]  ;;  %v7580_v60 = vld [vmem:[#allocation65_spill] sm:$0xff]  ;;  %v7582_v49 = vld [vmem:[#allocation67_spill] sm:$0xff] }
  0xe8   :  { %v1309_v58 = vadd.f32 %v1293_v3, %v1275_v12  ;;  %v1310_v46 = vadd.f32 %v1294_v57, %v1276_v25  ;;  %v1311_v16 = vadd.f32 %v1295_v2, %v1277_v47  ;;  %v1314_v13 = vmul.f32 %v4926_v61, %v5064_v10  ;;  %v7574_v25 = vld [vmem:[#allocation59_spill] sm:$0xff]  ;;  %v7575_v12 = vld [vmem:[#allocation60_spill] sm:$0xff] }
  0xe9   :  { %v1315_v18 = vmul.f32 %v4933_v38, %v5064_v10  ;;  %v1316_v21 = vmul.f32 %v4940_v42, %v5064_v10  ;;  %v1317_v55 = vmul.f32 %v7571_v54, %v5064_v10  ;;  %v1318_v14 = vmul.f32 %v7572_v26, %v5064_v10 }
  0xea   :  { %v1319_v59 = vmul.f32 %v7573_v30, %v5064_v10  ;;  %v1320_v32 = vmul.f32 %v7574_v25, %v5064_v10  ;;  %v1321_v47 = vmul.f32 %v7575_v12, %v5064_v10  ;;  %v1322_v4 = vmul.f32 %v7576_v31, %v5064_v10 }
  0xeb   :  { %v1323_v43 = vmul.f32 %v7577_v5, %v5064_v10  ;;  %v1324_v35 = vmul.f32 %v7578_v17, %v5064_v10  ;;  %v1325_v6 = vmul.f32 %v7579_v41, %v5064_v10  ;;  %v1326_v8 = vmul.f32 %v7580_v60, %v5064_v10 }
  0xec   :  { %v1327_v33 = vmul.f32 %v7581_v11, %v5064_v10  ;;  %v1328_v9 = vmul.f32 %v7582_v49, %v5064_v10  ;;  %v1329_v39 = vmul.f32 %v5035_v63, %v5064_v10  ;;  %v1330_v7 = vadd.f32 %v1314_v13, %v1296_v52 }
  0xed   :  { %v1331_v1 = vadd.f32 %v1315_v18, %v1297_v15  ;;  %v1332_v40 = vadd.f32 %v1316_v21, %v1298_v53  ;;  %v1333_v3 = vadd.f32 %v1317_v55, %v1299_v36  ;;  %v1334_v57 = vadd.f32 %v1318_v14, %v1300_v48  ;;  %v7589_v15 = vld [vmem:[#allocation34_spill] sm:$0xff]  ;;  %v7591_v18 = vld [vmem:[#allocation35_spill] sm:$0xff]  ;;  %v7592_v55 = vld [vmem:[#allocation36_spill] sm:$0xff] }
  0xee   :  { %v1335_v2 = vadd.f32 %v1319_v59, %v1301_v0  ;;  %v1336_v17 = vadd.f32 %v1320_v32, %v1302_v24  ;;  %v1337_v41 = vadd.f32 %v1321_v47, %v1303_v23  ;;  %v1338_v5 = vadd.f32 %v1322_v4, %v1304_v27  ;;  %v7583_v24 = vld [vmem:[#allocation28_spill] sm:$0xff]  ;;  %v7584_v27 = vld [vmem:[#allocation29_spill] sm:$0xff]  ;;  %v7590_v36 = vld [vmem:[#allocation50_spill] sm:$0xff] }
  0xef   :  { %v1339_v31 = vadd.f32 %v1323_v43, %v1305_v28  ;;  %v1340_v60 = vadd.f32 %v1324_v35, %v1306_v37  ;;  %v1341_v12 = vadd.f32 %v1325_v6, %v1307_v44  ;;  %v1342_v25 = vadd.f32 %v1326_v8, %v1308_v34  ;;  %v7585_v34 = vld [vmem:[#allocation30_spill] sm:$0xff]  ;;  %v7587_v44 = vld [vmem:[#allocation32_spill] sm:$0xff]  ;;  %v7593_v59 = vld [vmem:[#allocation37_spill] sm:$0xff] }
  0xf0   :  { %v1343_v11 = vadd.f32 %v1327_v33, %v1309_v58  ;;  %v1344_v30 = vadd.f32 %v1328_v9, %v1310_v46  ;;  %v1345_v26 = vadd.f32 %v1329_v39, %v1311_v16  ;;  %v1348_v49 = vmul.f32 %v4533_v29, %v5067_v51  ;;  %v7586_v46 = vld [vmem:[#allocation31_spill] sm:$0xff]  ;;  %v7588_v16 = vld [vmem:[#allocation33_spill] sm:$0xff]  ;;  %v7594_v47 = vld [vmem:[#allocation38_spill] sm:$0xff] }
  0xf1   :  { %v1349_v10 = vmul.f32 %v4544_v62, %v5067_v51  ;;  %v1350_v13 = vmul.f32 %v4553_v50, %v5067_v51  ;;  %v1351_v0 = vmul.f32 %v7583_v24, %v5067_v51  ;;  %v1352_v37 = vmul.f32 %v7584_v27, %v5067_v51 }
  0xf2   :  { %v1353_v23 = vmul.f32 %v7585_v34, %v5067_v51  ;;  %v1354_v28 = vmul.f32 %v7586_v46, %v5067_v51  ;;  %v1355_v58 = vmul.f32 %v7587_v44, %v5067_v51  ;;  %v1356_v52 = vmul.f32 %v7588_v16, %v5067_v51 }
  0xf3   :  { %v1357_v53 = vmul.f32 %v7589_v15, %v5067_v51  ;;  %v1358_v48 = vmul.f32 %v7590_v36, %v5067_v51  ;;  %v1359_v21 = vmul.f32 %v7591_v18, %v5067_v51  ;;  %v1360_v14 = vmul.f32 %v7592_v55, %v5067_v51 }
  0xf4   :  { %v1361_v32 = vmul.f32 %v7593_v59, %v5067_v51  ;;  %v1362_v4 = vmul.f32 %v7594_v47, %v5067_v51  ;;  %v1363_v43 = vmul.f32 %v4701_v45, %v5067_v51  ;;  %v1380_v35 = vrot.slane %v1348_v49, 2 }
  0xf5   :  { %v1381_v6 = vrot.slane %v1349_v10, 2  ;;  %v1382_v8 = vrot.slane %v1350_v13, 2  ;;  %v1383_v33 = vrot.slane %v1351_v0, 2  ;;  %v1384_v9 = vrot.slane %v1352_v37, 2 }
  0xf6   :  { %v1385_v39 = vrot.slane %v1353_v23, 2  ;;  %v1386_v55 = vrot.slane %v1354_v28, 2  ;;  %v1387_v18 = vrot.slane %v1355_v58, 2  ;;  %v1388_v36 = vrot.slane %v1356_v52, 2 }
  0xf7   :  { %v1389_v59 = vrot.slane %v1357_v53, 2  ;;  %v1390_v15 = vrot.slane %v1358_v48, 2  ;;  %v1391_v47 = vrot.slane %v1359_v21, 2  ;;  %v1392_v16 = vrot.slane %v1360_v14, 2 }
  0xf8   :  { %v1393_v44 = vrot.slane %v1361_v32, 2  ;;  %v1394_v51 = vrot.slane %v1362_v4, 2  ;;  %v1395_v49 = vrot.slane %v1363_v43, 2  ;;  %v1412_v10 = vadd.f32 %v1380_v35, %v1330_v7  ;;  %v7605_v35 = vld [vmem:[#allocation54_spill] sm:$0xff] }
  0xf9   :  { %v1413_v45 = vadd.f32 %v1381_v6, %v1331_v1  ;;  %v1414_v13 = vadd.f32 %v1382_v8, %v1332_v40  ;;  %v1415_v0 = vadd.f32 %v1383_v33, %v1333_v3  ;;  %v1416_v37 = vadd.f32 %v1384_v9, %v1334_v57  ;;  %v7600_v57 = vld [vmem:[#allocation48_spill] sm:$0xff]  ;;  %v7606_v8 = vld [vmem:[#allocation55_spill] sm:$0xff] }
  0xfa   :  { %v1417_v23 = vadd.f32 %v1385_v39, %v1335_v2  ;;  %v1418_v46 = vadd.f32 %v1386_v55, %v1336_v17  ;;  %v1419_v28 = vadd.f32 %v1387_v18, %v1337_v41  ;;  %v1420_v58 = vadd.f32 %v1388_v36, %v1338_v5  ;;  %v7595_v17 = vld [vmem:[#allocation43_spill] sm:$0xff]  ;;  %v7596_v41 = vld [vmem:[#allocation44_spill] sm:$0xff] }
  0xfb   :  { %v1429_v52 = vstv %s5151_s1  ;;  %v1421_v53 = vadd.f32 %v1389_v59, %v1339_v31  ;;  %v1422_v34 = vadd.f32 %v1390_v15, %v1340_v60  ;;  %v1423_v48 = vadd.f32 %v1391_v47, %v1341_v12  ;;  %v7597_v60 = vld [vmem:[#allocation45_spill] sm:$0xff]  ;;  %v7602_v15 = vld [vmem:[#allocation51_spill] sm:$0xff]  ;;  %v7603_v18 = vld [vmem:[#allocation52_spill] sm:$0xff]  ;;  %s5863_s1 = sld [smem:[#allocation2 + $0xa]] }
  0xfc   :  { %v1424_v21 = vadd.f32 %v1392_v16, %v1342_v25  ;;  %v1425_v14 = vadd.f32 %v1393_v44, %v1343_v11  ;;  %v1426_v32 = vadd.f32 %v1394_v51, %v1344_v30  ;;  %v1427_v4 = vadd.f32 %v1395_v49, %v1345_v26  ;;  %v7598_v25 = vld [vmem:[#allocation46_spill] sm:$0xff]  ;;  %v7599_v30 = vld [vmem:[#allocation47_spill] sm:$0xff]  ;;  %v7601_v44 = vld [vmem:[#allocation49_spill] sm:$0xff] }
  0xfd   :  { %v5171_v43 = vstv %s5165_s14  ;;  %v1430_v7 = vmul.f32 %v7556_v56, %v1429_v52  ;;  %v1431_v1 = vmul.f32 %v7557_v19, %v1429_v52  ;;  %v1432_v40 = vmul.f32 %v7558_v20, %v1429_v52  ;;  %v7604_v59 = vld [vmem:[#allocation53_spill] sm:$0xff]  ;;  %s5865_s14 = sld [smem:[#allocation4 + $0xa]] }
  0xfe   :  { %v5177_v3 = vstv %s5167_s15  ;;  %v1433_v5 = vmul.f32 %v7595_v17, %v1429_v52  ;;  %v1434_v31 = vmul.f32 %v7596_v41, %v1429_v52  ;;  %v1435_v12 = vmul.f32 %v7597_v60, %v1429_v52  ;;  %s5957_s15 = sld [smem:[#allocation6 + $0xa]] }
  0xff   :  { %v1436_v11 = vmul.f32 %v7598_v25, %v1429_v52  ;;  %v1437_v26 = vmul.f32 %v7599_v30, %v1429_v52  ;;  %v1438_v2 = vmul.f32 %v7600_v57, %v1429_v52  ;;  %v1439_v16 = vmul.f32 %v7601_v44, %v1429_v52 }
 0x100   :  { %v1440_v36 = vmul.f32 %v7602_v15, %v1429_v52  ;;  %v1441_v55 = vmul.f32 %v7603_v18, %v1429_v52  ;;  %v1442_v47 = vmul.f32 %v7604_v59, %v1429_v52  ;;  %v1443_v6 = vmul.f32 %v7605_v35, %v1429_v52 }
 0x101   :  { %v1444_v33 = vmul.f32 %v7606_v8, %v1429_v52  ;;  %v1445_v9 = vmul.f32 %v4871_v22, %v1429_v52  ;;  %v1462_v39 = vrot.slane %v1430_v7, 2  ;;  %v1463_v51 = vrot.slane %v1431_v1, 2 }
 0x102   :  { %v1464_v49 = vrot.slane %v1432_v40, 2  ;;  %v1465_v30 = vrot.slane %v1433_v5, 2  ;;  %v1466_v25 = vrot.slane %v1434_v31, 2  ;;  %v1467_v57 = vrot.slane %v1435_v12, 2 }
 0x103   :  { %v1468_v60 = vrot.slane %v1436_v11, 2  ;;  %v1469_v44 = vrot.slane %v1437_v26, 2  ;;  %v1470_v41 = vrot.slane %v1438_v2, 2  ;;  %v1471_v15 = vrot.slane %v1439_v16, 2 }
 0x104   :  { %v1472_v17 = vrot.slane %v1440_v36, 2  ;;  %v1473_v18 = vrot.slane %v1441_v55, 2  ;;  %v1474_v20 = vrot.slane %v1442_v47, 2  ;;  %v1475_v59 = vrot.slane %v1443_v6, 2 }
 0x105   :  { %v1476_v19 = vrot.slane %v1444_v33, 2  ;;  %v1477_v35 = vrot.slane %v1445_v9, 2  ;;  %v1494_v56 = vadd.f32 %v1462_v39, %v1412_v10  ;;  %v1495_v8 = vadd.f32 %v1463_v51, %v1413_v45 }
 0x106   :  { %v1496_v27 = vadd.f32 %v1464_v49, %v1414_v13  ;;  %v1497_v52 = vadd.f32 %v1465_v30, %v1415_v0  ;;  %v1498_v7 = vadd.f32 %v1466_v25, %v1416_v37  ;;  %v1499_v1 = vadd.f32 %v1467_v57, %v1417_v23  ;;  %v7607_v13 = vld [vmem:[#allocation57_spill] sm:$0xff]  ;;  %v7610_v23 = vld [vmem:[#allocation60_spill] sm:$0xff]  ;;  %v7616_v25 = vld [vmem:[#allocation66_spill] sm:$0xff] }
 0x107   :  { %v1500_v40 = vadd.f32 %v1468_v60, %v1418_v46  ;;  %v1501_v5 = vadd.f32 %v1469_v44, %v1419_v28  ;;  %v1502_v31 = vadd.f32 %v1470_v41, %v1420_v58  ;;  %v1503_v12 = vadd.f32 %v1471_v15, %v1421_v53  ;;  %v7611_v58 = vld [vmem:[#allocation61_spill] sm:$0xff]  ;;  %v7617_v57 = vld [vmem:[#allocation67_spill] sm:$0xff] }
 0x108   :  { %v1504_v11 = vadd.f32 %v1472_v17, %v1422_v34  ;;  %v1505_v26 = vadd.f32 %v1473_v18, %v1423_v48  ;;  %v1506_v2 = vadd.f32 %v1474_v20, %v1424_v21  ;;  %v1507_v16 = vadd.f32 %v1475_v59, %v1425_v14  ;;  %v7608_v20 = vld [vmem:[#allocation58_spill] sm:$0xff]  ;;  %v7613_v14 = vld [vmem:[#allocation63_spill] sm:$0xff]  ;;  %v7615_v41 = vld [vmem:[#allocation65_spill] sm:$0xff] }
 0x109   :  { %v1508_v36 = vadd.f32 %v1476_v19, %v1426_v32  ;;  %v1509_v55 = vadd.f32 %v1477_v35, %v1427_v4  ;;  %v1512_v47 = vmul.f32 %v4926_v61, %v5171_v43  ;;  %v1513_v45 = vmul.f32 %v4933_v38, %v5171_v43  ;;  %v7609_v19 = vld [vmem:[#allocation59_spill] sm:$0xff]  ;;  %v7612_v48 = vld [vmem:[#allocation62_spill] sm:$0xff]  ;;  %v7614_v4 = vld [vmem:[#allocation64_spill] sm:$0xff] }
 0x10a   :  { %v1514_v10 = vmul.f32 %v4940_v42, %v5171_v43  ;;  %v1515_v46 = vmul.f32 %v7571_v54, %v5171_v43  ;;  %v1516_v34 = vmul.f32 %v7607_v13, %v5171_v43  ;;  %v1517_v0 = vmul.f32 %v7608_v20, %v5171_v43 }
 0x10b   :  { %v1518_v37 = vmul.f32 %v7609_v19, %v5171_v43  ;;  %v1519_v28 = vmul.f32 %v7610_v23, %v5171_v43  ;;  %v1520_v53 = vmul.f32 %v7611_v58, %v5171_v43  ;;  %v1521_v21 = vmul.f32 %v7612_v48, %v5171_v43 }
 0x10c   :  { %v1522_v32 = vmul.f32 %v7613_v14, %v5171_v43  ;;  %v1523_v17 = vmul.f32 %v7614_v4, %v5171_v43  ;;  %v1524_v60 = vmul.f32 %v7615_v41, %v5171_v43  ;;  %v1525_v30 = vmul.f32 %v7616_v25, %v5171_v43 }
 0x10d   :  { %v1526_v44 = vmul.f32 %v7617_v57, %v5171_v43  ;;  %v1527_v15 = vmul.f32 %v5035_v63, %v5171_v43  ;;  %v1544_v18 = vrot.slane %v1512_v47, 2  ;;  %v1545_v59 = vrot.slane %v1513_v45, 2 }
 0x10e   :  { %v1546_v35 = vrot.slane %v1514_v10, 2  ;;  %v1547_v6 = vrot.slane %v1515_v46, 2  ;;  %v1548_v33 = vrot.slane %v1516_v34, 2  ;;  %v1549_v9 = vrot.slane %v1517_v0, 2 }
 0x10f   :  { %v1550_v39 = vrot.slane %v1518_v37, 2  ;;  %v1551_v51 = vrot.slane %v1519_v28, 2  ;;  %v1552_v49 = vrot.slane %v1520_v53, 2  ;;  %v1553_v4 = vrot.slane %v1521_v21, 2 }
 0x110   :  { %v1554_v41 = vrot.slane %v1522_v32, 2  ;;  %v1555_v14 = vrot.slane %v1523_v17, 2  ;;  %v1556_v48 = vrot.slane %v1524_v60, 2  ;;  %v1557_v25 = vrot.slane %v1525_v30, 2 }
 0x111   :  { %v1558_v58 = vrot.slane %v1526_v44, 2  ;;  %v1559_v23 = vrot.slane %v1527_v15, 2  ;;  %v1576_v57 = vadd.f32 %v1544_v18, %v1494_v56  ;;  %v1577_v19 = vadd.f32 %v1545_v59, %v1495_v8 }
 0x112   :  { %v1578_v20 = vadd.f32 %v1546_v35, %v1496_v27  ;;  %v1579_v43 = vadd.f32 %v1547_v6, %v1497_v52  ;;  %v1580_v47 = vadd.f32 %v1548_v33, %v1498_v7  ;;  %v1581_v45 = vadd.f32 %v1549_v9, %v1499_v1  ;;  %v7618_v52 = vld [vmem:[#allocation29_spill] sm:$0xff]  ;;  %v7619_v1 = vld [vmem:[#allocation30_spill] sm:$0xff] }
 0x113   :  { %v1582_v10 = vadd.f32 %v1550_v39, %v1500_v40  ;;  %v1583_v46 = vadd.f32 %v1551_v51, %v1501_v5  ;;  %v1584_v34 = vadd.f32 %v1552_v49, %v1502_v31  ;;  %v1585_v0 = vadd.f32 %v1553_v4, %v1503_v12  ;;  %v7620_v5 = vld [vmem:[#allocation31_spill] sm:$0xff] }
 0x114   :  { %v1586_v37 = vadd.f32 %v1554_v41, %v1504_v11  ;;  %v1587_v28 = vadd.f32 %v1555_v14, %v1505_v26  ;;  %v1588_v53 = vadd.f32 %v1556_v48, %v1506_v2  ;;  %v1589_v21 = vadd.f32 %v1557_v25, %v1507_v16  ;;  %v7625_v16 = vld [vmem:[#allocation35_spill] sm:$0xff]  ;;  %v7628_v14 = vld [vmem:[#allocation38_spill] sm:$0xff] }
 0x115   :  { %v1590_v32 = vadd.f32 %v1558_v58, %v1508_v36  ;;  %v1591_v17 = vadd.f32 %v1559_v23, %v1509_v55  ;;  %v1594_v60 = vmul.f32 %v4533_v29, %v5177_v3  ;;  %v1595_v56 = vmul.f32 %v4544_v62, %v5177_v3  ;;  %v7621_v29 = vld [vmem:[#allocation32_spill] sm:$0xff]  ;;  %v7622_v62 = vld [vmem:[#allocation33_spill] sm:$0xff]  ;;  %v7629_v41 = vld [vmem:[#allocation39_spill] sm:$0xff] }
 0x116   :  { %v1596_v27 = vmul.f32 %v4553_v50, %v5177_v3  ;;  %v1597_v8 = vmul.f32 %v7583_v24, %v5177_v3  ;;  %v1598_v7 = vmul.f32 %v7618_v52, %v5177_v3  ;;  %v1599_v40 = vmul.f32 %v7619_v1, %v5177_v3  ;;  %v7623_v50 = vld [vmem:[#allocation34_spill] sm:$0xff]  ;;  %v7626_v55 = vld [vmem:[#allocation36_spill] sm:$0xff]  ;;  %v7627_v58 = vld [vmem:[#allocation37_spill] sm:$0xff] }
 0x117   :  { %v1600_v31 = vmul.f32 %v7620_v5, %v5177_v3  ;;  %v1601_v12 = vmul.f32 %v7621_v29, %v5177_v3  ;;  %v1602_v11 = vmul.f32 %v7622_v62, %v5177_v3  ;;  %v1603_v26 = vmul.f32 %v7623_v50, %v5177_v3  ;;  %v7624_v24 = vld [vmem:[#allocation50_spill] sm:$0xff] }
 0x118   :  { %v1604_v2 = vmul.f32 %v7624_v24, %v5177_v3  ;;  %v1605_v36 = vmul.f32 %v7625_v16, %v5177_v3  ;;  %v1606_v23 = vmul.f32 %v7626_v55, %v5177_v3  ;;  %v1607_v48 = vmul.f32 %v7627_v58, %v5177_v3 }
 0x119   :  { %v1608_v4 = vmul.f32 %v7628_v14, %v5177_v3  ;;  %v1609_v25 = vmul.f32 %v7629_v41, %v5177_v3  ;;  %v1626_v30 = vrot.slane %v1594_v60, 4  ;;  %v1627_v44 = vrot.slane %v1595_v56, 4 }
 0x11a   :  { %v1628_v15 = vrot.slane %v1596_v27, 4  ;;  %v1629_v18 = vrot.slane %v1597_v8, 4  ;;  %v1630_v59 = vrot.slane %v1598_v7, 4  ;;  %v1631_v35 = vrot.slane %v1599_v40, 4 }
 0x11b   :  { %v1632_v6 = vrot.slane %v1600_v31, 4  ;;  %v1633_v33 = vrot.slane %v1601_v12, 4  ;;  %v1634_v9 = vrot.slane %v1602_v11, 4  ;;  %v1635_v39 = vrot.slane %v1603_v26, 4 }
 0x11c   :  { %v1636_v51 = vrot.slane %v1604_v2, 4  ;;  %v1637_v49 = vrot.slane %v1605_v36, 4  ;;  %v1638_v52 = vrot.slane %v1606_v23, 4  ;;  %v1639_v1 = vrot.slane %v1607_v48, 4  ;;  %v7637_v23 = vld [vmem:[#allocation47_spill] sm:$0xff]  ;;  %v7638_v48 = vld [vmem:[#allocation48_spill] sm:$0xff] }
 0x11d   :  { %v1640_v3 = vrot.slane %v1608_v4, 4  ;;  %v1641_v60 = vrot.slane %v1609_v25, 4  ;;  %v1658_v56 = vadd.f32 %v1626_v30, %v1576_v57  ;;  %v1659_v27 = vadd.f32 %v1627_v44, %v1577_v19  ;;  %v7639_v4 = vld [vmem:[#allocation49_spill] sm:$0xff]  ;;  %v7640_v25 = vld [vmem:[#allocation51_spill] sm:$0xff]  ;;  %v7641_v44 = vld [vmem:[#allocation52_spill] sm:$0xff] }
 0x11e   :  { %v1660_v5 = vadd.f32 %v1628_v15, %v1578_v20  ;;  %v1661_v8 = vadd.f32 %v1629_v18, %v1579_v43  ;;  %v1662_v7 = vadd.f32 %v1630_v59, %v1580_v47  ;;  %v1663_v40 = vadd.f32 %v1631_v35, %v1581_v45  ;;  %v7630_v20 = vld [vmem:[#allocation40_spill] sm:$0xff]  ;;  %v7631_v47 = vld [vmem:[#allocation41_spill] sm:$0xff]  ;;  %v7643_v35 = vld [vmem:[#allocation54_spill] sm:$0xff] }
 0x11f   :  { %v1664_v31 = vadd.f32 %v1632_v6, %v1582_v10  ;;  %v1665_v29 = vadd.f32 %v1633_v33, %v1583_v46  ;;  %v1666_v12 = vadd.f32 %v1634_v9, %v1584_v34  ;;  %v1667_v62 = vadd.f32 %v1635_v39, %v1585_v0  ;;  %v7632_v10 = vld [vmem:[#allocation42_spill] sm:$0xff]  ;;  %v7633_v34 = vld [vmem:[#allocation43_spill] sm:$0xff]  ;;  %v7642_v18 = vld [vmem:[#allocation53_spill] sm:$0xff] }
 0x120   :  { %v1675_v11 = vstv %s5246_s0  ;;  %v1668_v50 = vadd.f32 %v1636_v51, %v1586_v37  ;;  %v1669_v26 = vadd.f32 %v1637_v49, %v1587_v28  ;;  %v1670_v24 = vadd.f32 %v1638_v52, %v1588_v53  ;;  %v7634_v37 = vld [vmem:[#allocation44_spill] sm:$0xff]  ;;  %v7635_v53 = vld [vmem:[#allocation45_spill] sm:$0xff]  ;;  %v7644_v33 = vld [vmem:[#allocation55_spill] sm:$0xff]  ;;  %s5959_s0 = sld [smem:[#allocation2 + $0xb]] }
 0x121   :  { %v1671_v2 = vadd.f32 %v1639_v1, %v1589_v21  ;;  %v1672_v16 = vadd.f32 %v1640_v3, %v1590_v32  ;;  %v1673_v36 = vadd.f32 %v1641_v60, %v1591_v17  ;;  %v5266_v57 = vstv %s5260_s2  ;;  %v7636_v32 = vld [vmem:[#allocation46_spill] sm:$0xff]  ;;  %s5971_s2 = sld [smem:[#allocation6 + $0xb]] }
 0x122   :  { %v5269_v19 = vstv %s5256_s16  ;;  %v1676_v43 = vmul.f32 %v7630_v20, %v1675_v11  ;;  %v1677_v45 = vmul.f32 %v7631_v47, %v1675_v11  ;;  %v1678_v55 = vmul.f32 %v7632_v10, %v1675_v11  ;;  %s5961_s16 = sld [smem:[#allocation4 + $0xb]] }
 0x123   :  { %v5275_v46 = vstv %s5262_s17  ;;  %v1679_v0 = vmul.f32 %v7633_v34, %v1675_v11  ;;  %v1680_v28 = vmul.f32 %v7634_v37, %v1675_v11  ;;  %v1681_v21 = vmul.f32 %v7635_v53, %v1675_v11  ;;  %s6085_s17 = sld [smem:[#allocation7 + $0x3]] }
 0x124   :  { %v1682_v17 = vmul.f32 %v7636_v32, %v1675_v11  ;;  %v1683_v58 = vmul.f32 %v7637_v23, %v1675_v11  ;;  %v1684_v14 = vmul.f32 %v7638_v48, %v1675_v11  ;;  %v1685_v41 = vmul.f32 %v7639_v4, %v1675_v11 }
 0x125   :  { %v1686_v30 = vmul.f32 %v7640_v25, %v1675_v11  ;;  %v1687_v15 = vmul.f32 %v7641_v44, %v1675_v11  ;;  %v1688_v59 = vmul.f32 %v7642_v18, %v1675_v11  ;;  %v1689_v6 = vmul.f32 %v7643_v35, %v1675_v11  ;;  %v7654_v35 = vld [vmem:[#allocation67_spill] sm:$0xff] }
 0x126   :  { %v1690_v9 = vmul.f32 %v7644_v33, %v1675_v11  ;;  %v1691_v39 = vmul.f32 %v4871_v22, %v1675_v11  ;;  %v1708_v51 = vrot.slane %v1676_v43, 4  ;;  %v1709_v49 = vrot.slane %v1677_v45, 4 }
 0x127   :  { %v1710_v52 = vrot.slane %v1678_v55, 4  ;;  %v1711_v1 = vrot.slane %v1679_v0, 4  ;;  %v1712_v3 = vrot.slane %v1680_v28, 4  ;;  %v1713_v60 = vrot.slane %v1681_v21, 4 }
 0x128   :  { %v1714_v20 = vrot.slane %v1682_v17, 4  ;;  %v1715_v47 = vrot.slane %v1683_v58, 4  ;;  %v1716_v10 = vrot.slane %v1684_v14, 4  ;;  %v1717_v34 = vrot.slane %v1685_v41, 4 }
 0x129   :  { %v1718_v37 = vrot.slane %v1686_v30, 4  ;;  %v1719_v53 = vrot.slane %v1687_v15, 4  ;;  %v1720_v32 = vrot.slane %v1688_v59, 4  ;;  %v1721_v23 = vrot.slane %v1689_v6, 4 }
 0x12a   :  { %v1722_v48 = vrot.slane %v1690_v9, 4  ;;  %v1723_v4 = vrot.slane %v1691_v39, 4  ;;  %v1740_v25 = vadd.f32 %v1708_v51, %v1658_v56  ;;  %v1741_v44 = vadd.f32 %v1709_v49, %v1659_v27 }
 0x12b   :  { %v1742_v18 = vadd.f32 %v1710_v52, %v1660_v5  ;;  %v1743_v22 = vadd.f32 %v1711_v1, %v1661_v8  ;;  %v1744_v11 = vadd.f32 %v1712_v3, %v1662_v7  ;;  %v1745_v43 = vadd.f32 %v1713_v60, %v1663_v40  ;;  %v7645_v7 = vld [vmem:[#allocation58_spill] sm:$0xff] }
 0x12c   :  { %v1746_v45 = vadd.f32 %v1714_v20, %v1664_v31  ;;  %v1747_v55 = vadd.f32 %v1715_v47, %v1665_v29  ;;  %v1748_v0 = vadd.f32 %v1716_v10, %v1666_v12  ;;  %v1749_v28 = vadd.f32 %v1717_v34, %v1667_v62  ;;  %v7646_v31 = vld [vmem:[#allocation59_spill] sm:$0xff] }
 0x12d   :  { %v1750_v21 = vadd.f32 %v1718_v37, %v1668_v50  ;;  %v1751_v17 = vadd.f32 %v1719_v53, %v1669_v26  ;;  %v1752_v58 = vadd.f32 %v1720_v32, %v1670_v24  ;;  %v1753_v14 = vadd.f32 %v1721_v23, %v1671_v2  ;;  %v7652_v2 = vld [vmem:[#allocation65_spill] sm:$0xff] }
 0x12e   :  { %v1754_v41 = vadd.f32 %v1722_v48, %v1672_v16  ;;  %v1755_v30 = vadd.f32 %v1723_v4, %v1673_v36  ;;  %v1758_v15 = vmul.f32 %v4926_v61, %v5266_v57  ;;  %v1759_v56 = vmul.f32 %v4933_v38, %v5266_v57  ;;  %v7647_v61 = vld [vmem:[#allocation60_spill] sm:$0xff]  ;;  %v7648_v38 = vld [vmem:[#allocation61_spill] sm:$0xff]  ;;  %v7653_v36 = vld [vmem:[#allocation66_spill] sm:$0xff] }
 0x12f   :  { %v1760_v27 = vmul.f32 %v4940_v42, %v5266_v57  ;;  %v1761_v5 = vmul.f32 %v7571_v54, %v5266_v57  ;;  %v1762_v8 = vmul.f32 %v7607_v13, %v5266_v57  ;;  %v1763_v40 = vmul.f32 %v7645_v7, %v5266_v57  ;;  %v7649_v42 = vld [vmem:[#allocation62_spill] sm:$0xff]  ;;  %v7650_v54 = vld [vmem:[#allocation63_spill] sm:$0xff]  ;;  %v7651_v13 = vld [vmem:[#allocation64_spill] sm:$0xff] }
 0x130   :  { %v1764_v29 = vmul.f32 %v7646_v31, %v5266_v57  ;;  %v1765_v12 = vmul.f32 %v7647_v61, %v5266_v57  ;;  %v1766_v62 = vmul.f32 %v7648_v38, %v5266_v57  ;;  %v1767_v50 = vmul.f32 %v7649_v42, %v5266_v57 }
 0x131   :  { %v1768_v26 = vmul.f32 %v7650_v54, %v5266_v57  ;;  %v1769_v24 = vmul.f32 %v7651_v13, %v5266_v57  ;;  %v1770_v16 = vmul.f32 %v7652_v2, %v5266_v57  ;;  %v1771_v59 = vmul.f32 %v7653_v36, %v5266_v57 }
 0x132   :  { %v1772_v6 = vmul.f32 %v7654_v35, %v5266_v57  ;;  %v1773_v33 = vmul.f32 %v5035_v63, %v5266_v57  ;;  %v1790_v9 = vrot.slane %v1758_v15, 4  ;;  %v1791_v39 = vrot.slane %v1759_v56, 4 }
 0x133   :  { %v1792_v51 = vrot.slane %v1760_v27, 4  ;;  %v1793_v49 = vrot.slane %v1761_v5, 4  ;;  %v1794_v52 = vrot.slane %v1762_v8, 4  ;;  %v1795_v1 = vrot.slane %v1763_v40, 4  ;;  %v5400_v40 = vld [vmem:[%s7017_s4 + $0x28] sm:$0xff] }
 0x134   :  { %v1796_v3 = vrot.slane %v1764_v29, 4  ;;  %v1797_v60 = vrot.slane %v1765_v12, 4  ;;  %v1798_v20 = vrot.slane %v1766_v62, 4  ;;  %v1799_v47 = vrot.slane %v1767_v50, 4  ;;  %v5407_v29 = vld [vmem:[%s7017_s4 + $0x30] sm:$0xff]  ;;  %v5414_v12 = vld [vmem:[%s7017_s4 + $0x38] sm:$0xff] }
 0x135   :  { %v1800_v10 = vrot.slane %v1768_v26, 4  ;;  %v1801_v34 = vrot.slane %v1769_v24, 4  ;;  %v1802_v37 = vrot.slane %v1770_v16, 4  ;;  %v1803_v53 = vrot.slane %v1771_v59, 4  ;;  %v5421_v62 = vld [vmem:[%s7017_s4 + $0x40] sm:$0xff]  ;;  %v5428_v50 = vld [vmem:[%s7017_s4 + $0x48] sm:$0xff] }
 0x136   :  { %v1804_v32 = vrot.slane %v1772_v6, 4  ;;  %v1805_v23 = vrot.slane %v1773_v33, 4  ;;  %v5322_v48 = vadd.f32 %v1790_v9, %v1740_v25  ;;  %v5324_v4 = vadd.f32 %v1791_v39, %v1741_v44  ;;  %7671 = vst [vmem:[#allocation41_spill] sm:$0xff] %v5421_v62  ;;  %v5435_v26 = vld [vmem:[%s7017_s4 + $0x50] sm:$0xff]  ;;  %v5442_v24 = vld [vmem:[%s7017_s4 + $0x58] sm:$0xff]  ;;  %v5449_v16 = vld [vmem:[%s7017_s4 + $0x60] sm:$0xff] }
 0x137   :  { %v5326_v63 = vadd.f32 %v1792_v51, %v1742_v18  ;;  %v5328_v57 = vadd.f32 %v1793_v49, %v1743_v22  ;;  %v5330_v15 = vadd.f32 %v1794_v52, %v1744_v11  ;;  %v5332_v56 = vadd.f32 %v1795_v1, %v1745_v43  ;;  %7672 = vst [vmem:[#allocation42_spill] sm:$0xff] %v5428_v50  ;;  %v5456_v59 = vld [vmem:[%s7017_s4 + $0x68] sm:$0xff]  ;;  %v5463_v6 = vld [vmem:[%s7017_s4 + $0x70] sm:$0xff]  ;;  %v5470_v9 = vld [vmem:[%s7017_s4 + $0x78] sm:$0xff] }
 0x138   :  { %7655 = vst [vmem:[#allocation56_spill] sm:$0xff] %v5322_v48  ;;  %v5334_v27 = vadd.f32 %v1796_v3, %v1746_v45  ;;  %v5336_v5 = vadd.f32 %v1797_v60, %v1747_v55  ;;  %v5338_v8 = vadd.f32 %v1798_v20, %v1748_v0  ;;  %v5340_v7 = vadd.f32 %v1799_v47, %v1749_v28  ;;  %v5357_v45 = vld [vmem:[%s7017_s4] sm:$0xff]  ;;  %v5366_v0 = vld [vmem:[%s7017_s4 + $0x8] sm:$0xff] }
 0x139   :  { %7656 = vst [vmem:[#allocation28_spill] sm:$0xff] %v5324_v4  ;;  %v5342_v25 = vadd.f32 %v1800_v10, %v1750_v21  ;;  %v5344_v44 = vadd.f32 %v1801_v34, %v1751_v17  ;;  %v5346_v18 = vadd.f32 %v1802_v37, %v1752_v58  ;;  %v5348_v22 = vadd.f32 %v1803_v53, %v1753_v14  ;;  %v5375_v21 = vld [vmem:[%s7017_s4 + $0x10] sm:$0xff]  ;;  %v5384_v58 = vld [vmem:[%s7017_s4 + $0x18] sm:$0xff] }
 0x13a   :  { %7657 = vst [vmem:[#allocation57_spill] sm:$0xff] %v5326_v63  ;;  %v5350_v11 = vadd.f32 %v1804_v32, %v1754_v41  ;;  %v5352_v43 = vadd.f32 %v1805_v23, %v1755_v30  ;;  %v5361_v55 = vadd.f32 %v5357_v45, %v5269_v19  ;;  %v5370_v28 = vadd.f32 %v5366_v0, %v5269_v19  ;;  %v5393_v41 = vld [vmem:[%s7017_s4 + $0x20] sm:$0xff] }
 0x13b   :  { %7658 = vst [vmem:[#allocation29_spill] sm:$0xff] %v5328_v57  ;;  %v5379_v17 = vadd.f32 %v5375_v21, %v5269_v19  ;;  %v5388_v14 = vadd.f32 %v5384_v58, %v5269_v19  ;;  %v1844_v30 = vadd.f32 %v5393_v41, %v5269_v19  ;;  %v1845_v31 = vadd.f32 %v5400_v40, %v5269_v19 }
 0x13c   :  { %7659 = vst [vmem:[#allocation30_spill] sm:$0xff] %v5330_v15  ;;  %v1846_v61 = vadd.f32 %v5407_v29, %v5269_v19  ;;  %v1847_v38 = vadd.f32 %v5414_v12, %v5269_v19  ;;  %v1848_v42 = vadd.f32 %v5421_v62, %v5269_v19  ;;  %v1849_v54 = vadd.f32 %v5428_v50, %v5269_v19 }
 0x13d   :  { %7660 = vst [vmem:[#allocation31_spill] sm:$0xff] %v5332_v56  ;;  %v1850_v13 = vadd.f32 %v5435_v26, %v5269_v19  ;;  %v1851_v2 = vadd.f32 %v5442_v24, %v5269_v19  ;;  %v1852_v36 = vadd.f32 %v5449_v16, %v5269_v19  ;;  %v1853_v35 = vadd.f32 %v5456_v59, %v5269_v19 }
 0x13e   :  { %7661 = vst [vmem:[#allocation32_spill] sm:$0xff] %v5334_v27  ;;  %v1854_v33 = vadd.f32 %v5463_v6, %v5269_v19  ;;  %v1855_v39 = vadd.f32 %v5470_v9, %v5269_v19  ;;  %v1858_v51 = vmul.f32 %v5357_v45, %v5275_v46  ;;  %v1859_v49 = vmul.f32 %v5366_v0, %v5275_v46 }
 0x13f   :  { %7662 = vst [vmem:[#allocation33_spill] sm:$0xff] %v5336_v5  ;;  %v1860_v52 = vmul.f32 %v5375_v21, %v5275_v46  ;;  %v1861_v1 = vmul.f32 %v5384_v58, %v5275_v46  ;;  %v1862_v3 = vmul.f32 %v5393_v41, %v5275_v46  ;;  %v1863_v60 = vmul.f32 %v5400_v40, %v5275_v46 }
 0x140   :  { %7663 = vst [vmem:[#allocation34_spill] sm:$0xff] %v5338_v8  ;;  %v1864_v19 = vmul.f32 %v5407_v29, %v5275_v46  ;;  %v1865_v20 = vmul.f32 %v5414_v12, %v5275_v46  ;;  %v1866_v47 = vmul.f32 %v5421_v62, %v5275_v46  ;;  %v1867_v10 = vmul.f32 %v5428_v50, %v5275_v46 }
 0x141   :  { %7664 = vst [vmem:[#allocation50_spill] sm:$0xff] %v5340_v7  ;;  %v1868_v34 = vmul.f32 %v5435_v26, %v5275_v46  ;;  %v1869_v37 = vmul.f32 %v5442_v24, %v5275_v46  ;;  %v1870_v53 = vmul.f32 %v5449_v16, %v5275_v46  ;;  %v1871_v32 = vmul.f32 %v5456_v59, %v5275_v46 }
 0x142   :  { %7665 = vst [vmem:[#allocation35_spill] sm:$0xff] %v5342_v25  ;;  %v1872_v23 = vmul.f32 %v5463_v6, %v5275_v46  ;;  %v1894_v25 = vrot.slane %v1862_v3, 4  ;;  %v1895_v7 = vrot.slane %v1863_v60, 4  ;;  %v1896_v8 = vrot.slane %v1864_v19, 4 }
 0x143   :  { %7666 = vst [vmem:[#allocation36_spill] sm:$0xff] %v5344_v44  ;;  %v1893_v44 = vrot.slane %v1861_v1, 4  ;;  %v1897_v5 = vrot.slane %v1865_v20, 4  ;;  %v1898_v27 = vrot.slane %v1866_v47, 4  ;;  %v1899_v56 = vrot.slane %v1867_v10, 4  ;;  %v5624_v20 = vld [vmem:[%s7018_s5 + $0x58] sm:$0xff] }
 0x144   :  { %7667 = vst [vmem:[#allocation37_spill] sm:$0xff] %v5346_v18  ;;  %v1892_v18 = vrot.slane %v1860_v52, 4  ;;  %v1900_v15 = vrot.slane %v1868_v34, 4  ;;  %v1901_v57 = vrot.slane %v1869_v37, 4  ;;  %v1902_v63 = vrot.slane %v1870_v53, 4  ;;  %v5630_v10 = vld [vmem:[%s7018_s5 + $0x60] sm:$0xff] }
 0x145   :  { %7668 = vst [vmem:[#allocation38_spill] sm:$0xff] %v5348_v22  ;;  %v1891_v22 = vrot.slane %v1859_v49, 4  ;;  %v1903_v4 = vrot.slane %v1871_v32, 4  ;;  %v1904_v48 = vrot.slane %v1872_v23, 4  ;;  %v5522_v52 = vadd.f32 %v1893_v44, %v5388_v14  ;;  %v5636_v37 = vld [vmem:[%s7018_s5 + $0x68] sm:$0xff]  ;;  %v5642_v32 = vld [vmem:[%s7018_s5 + $0x70] sm:$0xff] }
 0x146   :  { %7669 = vst [vmem:[#allocation39_spill] sm:$0xff] %v5350_v11  ;;  %v1890_v11 = vrot.slane %v1858_v51, 4  ;;  %v5519_v49 = vadd.f32 %v1892_v18, %v5379_v17  ;;  %v5524_v1 = vadd.f32 %v1894_v25, %v1844_v30  ;;  %v5526_v3 = vadd.f32 %v1895_v7, %v1845_v31  ;;  %v5582_v30 = vld [vmem:[%s7018_s5 + $0x20] sm:$0xff] }
 0x147   :  { %7670 = vst [vmem:[#allocation40_spill] sm:$0xff] %v5352_v43  ;;  %v1873_v43 = vmul.f32 %v5470_v9, %v5275_v46  ;;  %v5516_v51 = vadd.f32 %v1891_v22, %v5370_v28  ;;  %v5528_v60 = vadd.f32 %v1896_v8, %v1846_v61  ;;  %v5534_v22 = vadd.f32 %v1899_v56, %v1849_v54  ;;  %v5558_v56 = vld [vmem:[%s7018_s5] sm:$0xff]  ;;  %v5588_v61 = vld [vmem:[%s7018_s5 + $0x28] sm:$0xff] }
 0x148   :  { %7673 = vst [vmem:[#allocation43_spill] sm:$0xff] %v5435_v26  ;;  %v5513_v46 = vadd.f32 %v1890_v11, %v5361_v55  ;;  %v5532_v11 = vadd.f32 %v1898_v27, %v1848_v42  ;;  %v1939_v55 = vstv %s5496_s24  ;;  %v5537_v28 = vadd.f32 %v1900_v15, %v1850_v13  ;;  %v5576_v27 = vld [vmem:[%s7018_s5 + $0x18] sm:$0xff]  ;;  %v5594_v42 = vld [vmem:[%s7018_s5 + $0x30] sm:$0xff] }
 0x149   :  { %7674 = vst [vmem:[#allocation44_spill] sm:$0xff] %v5442_v24  ;;  %v5539_v18 = vadd.f32 %v1901_v57, %v1851_v2  ;;  %v5541_v17 = vadd.f32 %v1902_v63, %v1852_v36  ;;  %v5543_v44 = vadd.f32 %v1903_v4, %v1853_v35  ;;  %v5545_v25 = vadd.f32 %v1904_v48, %v1854_v33  ;;  %v5564_v4 = vld [vmem:[%s7018_s5 + $0x8] sm:$0xff]  ;;  %v5570_v63 = vld [vmem:[%s7018_s5 + $0x10] sm:$0xff]  ;;  %v5600_v13 = vld [vmem:[%s7018_s5 + $0x38] sm:$0xff] }
 0x14a   :  { %7675 = vst [vmem:[#allocation45_spill] sm:$0xff] %v5449_v16  ;;  %v5550_v8 = vstv %s5506_s22  ;;  %v1940_v57 = vmul.f32 %v5558_v56, %v1939_v55  ;;  %v1941_v48 = vmul.f32 %v5564_v4, %v1939_v55  ;;  %v1942_v15 = vmul.f32 %v5570_v63, %v1939_v55  ;;  %v5606_v36 = vld [vmem:[%s7018_s5 + $0x40] sm:$0xff] }
 0x14b   :  { %7676 = vst [vmem:[#allocation46_spill] sm:$0xff] %v5456_v59  ;;  %v1943_v14 = vmul.f32 %v5576_v27, %v1939_v55  ;;  %v1944_v31 = vmul.f32 %v5582_v30, %v1939_v55  ;;  %v1946_v54 = vmul.f32 %v5594_v42, %v1939_v55  ;;  %v1947_v2 = vmul.f32 %v5600_v13, %v1939_v55 }
 0x14c   :  { %7677 = vst [vmem:[#allocation47_spill] sm:$0xff] %v5463_v6  ;;  %v1905_v6 = vrot.slane %v1873_v43, 4  ;;  %v5530_v43 = vadd.f32 %v1897_v5, %v1847_v38  ;;  %v5553_v5 = vstv %s5510_s23  ;;  %v1945_v38 = vmul.f32 %v5588_v61, %v1939_v55 }
 0x14d   :  { %7678 = vst [vmem:[#allocation48_spill] sm:$0xff] %v5470_v9  ;;  %v1948_v35 = vmul.f32 %v5606_v36, %v1939_v55  ;;  %v1951_v47 = vmul.f32 %v5624_v20, %v1939_v55  ;;  %v1952_v34 = vmul.f32 %v5630_v10, %v1939_v55  ;;  %v1953_v53 = vmul.f32 %v5636_v37, %v1939_v55 }
 0x14e   :  { %v5547_v7 = vadd.f32 %v1905_v6, %v1855_v39  ;;  %7679 = vst [vmem:[#allocation49_spill] sm:$0xff] %v5558_v56  ;;  %v5612_v6 = vld [vmem:[%s7018_s5 + $0x48] sm:$0xff]  ;;  %v5618_v39 = vld [vmem:[%s7018_s5 + $0x50] sm:$0xff]  ;;  %v1954_v23 = vmul.f32 %v5642_v32, %v1939_v55 }
 0x14f   :  { %7680 = vst [vmem:[#allocation51_spill] sm:$0xff] %v5564_v4  ;;  %v1949_v33 = vmul.f32 %v5612_v6, %v1939_v55  ;;  %v1950_v19 = vmul.f32 %v5618_v39, %v1939_v55  ;;  %v1983_v56 = vrot.slane %v1951_v47, 4  ;;  %v1985_v9 = vrot.slane %v1953_v53, 4 }
 0x150   :  { %7681 = vst [vmem:[#allocation52_spill] sm:$0xff] %v5570_v63  ;;  %v1986_v59 = vrot.slane %v1954_v23, 4 }
 0x151   :  { %7682 = vst [vmem:[#allocation53_spill] sm:$0xff] %v5576_v27  ;;  %v1980_v27 = vrot.slane %v1948_v35, 4  ;;  %v1981_v63 = vrot.slane %v1949_v33, 4  ;;  %v1982_v4 = vrot.slane %v1950_v19, 4  ;;  %v5779_v35 = vld [vmem:[%s7019_s6 + $0x58] sm:$0xff]  ;;  %v5786_v33 = vld [vmem:[%s7019_s6 + $0x60] sm:$0xff] }
 0x152   :  { %7683 = vst [vmem:[#allocation54_spill] sm:$0xff] %v5582_v30  ;;  %v1979_v30 = vrot.slane %v1947_v2, 4  ;;  %v5772_v2 = vld [vmem:[%s7019_s6 + $0x50] sm:$0xff]  ;;  %v5793_v19 = vld [vmem:[%s7019_s6 + $0x68] sm:$0xff] }
 0x153   :  { %7684 = vst [vmem:[#allocation55_spill] sm:$0xff] %v5588_v61  ;;  %v1978_v61 = vrot.slane %v1946_v54, 4  ;;  %v5765_v54 = vld [vmem:[%s7019_s6 + $0x48] sm:$0xff]  ;;  %v2035_v47 = vmul.f32 %v5793_v19, %v5550_v8 }
 0x154   :  { %7685 = vst [vmem:[#allocation58_spill] sm:$0xff] %v5594_v42  ;;  %v1976_v42 = vrot.slane %v1944_v31, 4 }
 0x155   :  { %7686 = vst [vmem:[#allocation59_spill] sm:$0xff] %v5600_v13  ;;  %v1975_v13 = vrot.slane %v1943_v14, 4  ;;  %v5670_v31 = vadd.f32 %v1978_v61, %v5528_v60  ;;  %v5691_v60 = vadd.f32 %v1985_v9, %v5543_v44 }
 0x156   :  { %7687 = vst [vmem:[#allocation60_spill] sm:$0xff] %v5606_v36  ;;  %v1974_v36 = vrot.slane %v1942_v15, 4  ;;  %v5664_v15 = vadd.f32 %v1976_v42, %v5524_v1  ;;  %v5685_v1 = vadd.f32 %v1983_v56, %v5539_v18  ;;  %v5709_v18 = vld [vmem:[%s7019_s6 + $0x8] sm:$0xff] }
 0x157   :  { %7688 = vst [vmem:[#allocation61_spill] sm:$0xff] %v5612_v6  ;;  %v1973_v6 = vrot.slane %v1941_v48, 4  ;;  %v5661_v48 = vadd.f32 %v1975_v13, %v5522_v52  ;;  %v5682_v52 = vadd.f32 %v1982_v4, %v5537_v28  ;;  %v5737_v56 = vld [vmem:[%s7019_s6 + $0x28] sm:$0xff]  ;;  %v2031_v13 = vmul.f32 %v5765_v54, %v5550_v8 }
 0x158   :  { %7689 = vst [vmem:[#allocation62_spill] sm:$0xff] %v5618_v39  ;;  %v1972_v39 = vrot.slane %v1940_v57, 4  ;;  %v5658_v57 = vadd.f32 %v1974_v36, %v5519_v49  ;;  %v5679_v49 = vadd.f32 %v1981_v63, %v5534_v22  ;;  %v5702_v22 = vld [vmem:[%s7019_s6] sm:$0xff]  ;;  %v2027_v4 = vmul.f32 %v5737_v56, %v5550_v8  ;;  %v5744_v63 = vld [vmem:[%s7019_s6 + $0x30] sm:$0xff] }
 0x159   :  { %7690 = vst [vmem:[#allocation63_spill] sm:$0xff] %v5624_v20  ;;  %v5648_v20 = vld [vmem:[%s7018_s5 + $0x78] sm:$0xff]  ;;  %v2022_v28 = vmul.f32 %v5702_v22, %v5550_v8  ;;  %v2032_v36 = vmul.f32 %v5772_v2, %v5550_v8 }
 0x15a   :  { %7691 = vst [vmem:[#allocation64_spill] sm:$0xff] %v5630_v10  ;;  %v1955_v10 = vmul.f32 %v5648_v20, %v1939_v55  ;;  %v5652_v24 = vadd.f32 %v1972_v39, %v5513_v46  ;;  %v5655_v55 = vadd.f32 %v1973_v6, %v5516_v51  ;;  %v5673_v46 = vadd.f32 %v1979_v30, %v5530_v43  ;;  %v5751_v30 = vld [vmem:[%s7019_s6 + $0x38] sm:$0xff] }
 0x15b   :  { %7692 = vst [vmem:[#allocation65_spill] sm:$0xff] %v5636_v37  ;;  %v1977_v37 = vrot.slane %v1945_v38, 4  ;;  %v5676_v51 = vadd.f32 %v1980_v27, %v5532_v11  ;;  %v5694_v43 = vadd.f32 %v1986_v59, %v5545_v25  ;;  %v2023_v59 = vmul.f32 %v5709_v18, %v5550_v8  ;;  %v5730_v25 = vld [vmem:[%s7019_s6 + $0x20] sm:$0xff] }
 0x15c   :  { %7693 = vst [vmem:[#allocation66_spill] sm:$0xff] %v5642_v32  ;;  %v1984_v32 = vrot.slane %v1952_v34, 4  ;;  %v1987_v16 = vrot.slane %v1955_v10, 4  ;;  %v2028_v27 = vmul.f32 %v5744_v63, %v5550_v8  ;;  %v2029_v61 = vmul.f32 %v5751_v30, %v5550_v8  ;;  %v5758_v38 = vld [vmem:[%s7019_s6 + $0x40] sm:$0xff]  ;;  %v5800_v10 = vld [vmem:[%s7019_s6 + $0x70] sm:$0xff] }
 0x15d   :  { %7694 = vst [vmem:[#allocation67_spill] sm:$0xff] %v5648_v20  ;;  %v5667_v14 = vadd.f32 %v1977_v37, %v5526_v3  ;;  %v2030_v42 = vmul.f32 %v5758_v38, %v5550_v8  ;;  %v2033_v6 = vmul.f32 %v5779_v35, %v5550_v8  ;;  %v2034_v39 = vmul.f32 %v5786_v33, %v5550_v8  ;;  %v5807_v37 = vld [vmem:[%s7019_s6 + $0x78] sm:$0xff] }
 0x15e   :  { %v5688_v3 = vadd.f32 %v1984_v32, %v5541_v17  ;;  %v5697_v11 = vadd.f32 %v1987_v16, %v5547_v7  ;;  %7695 = vst [vmem:[#allocation68_spill] sm:$0xff] %v5702_v22  ;;  %v5716_v16 = vld [vmem:[%s7019_s6 + $0x10] sm:$0xff]  ;;  %v5723_v17 = vld [vmem:[%s7019_s6 + $0x18] sm:$0xff]  ;;  %v2026_v7 = vmul.f32 %v5730_v25, %v5550_v8  ;;  %v2036_v34 = vmul.f32 %v5800_v10, %v5550_v8 }
 0x15f   :  { %7696 = vst [vmem:[#allocation69_spill] sm:$0xff] %v5709_v18  ;;  %v2024_v9 = vmul.f32 %v5716_v16, %v5550_v8  ;;  %v2025_v44 = vmul.f32 %v5723_v17, %v5550_v8  ;;  %v2037_v53 = vmul.f32 %v5807_v37, %v5550_v8  ;;  %v2054_v32 = vrot.slane %v2022_v28, 4 }
 0x160   :  { %7697 = vst [vmem:[#allocation70_spill] sm:$0xff] %v5716_v16  ;;  %v2055_v23 = vrot.slane %v2023_v59, 4  ;;  %v2068_v16 = vrot.slane %v2036_v34, 4 }
 0x161   :  { %7698 = vst [vmem:[#allocation71_spill] sm:$0xff] %v5723_v17  ;;  %v2067_v17 = vrot.slane %v2035_v47, 4  ;;  %v2069_v18 = vrot.slane %v2037_v53, 4  ;;  %v2086_v22 = vadd.f32 %v2054_v32, %v5652_v24 }
 0x162   :  { %7699 = vst [vmem:[#allocation72_spill] sm:$0xff] %v5730_v25  ;;  %v2066_v25 = vrot.slane %v2034_v39, 4  ;;  %v2087_v8 = vadd.f32 %v2055_v23, %v5655_v55 }
 0x163   :  { %7700 = vst [vmem:[#allocation73_spill] sm:$0xff] %v5737_v56  ;;  %v2064_v56 = vrot.slane %v2032_v36, 4 }
 0x164   :  { %7701 = vst [vmem:[#allocation74_spill] sm:$0xff] %v5744_v63  ;;  %v2063_v63 = vrot.slane %v2031_v13, 4 }
 0x165   :  { %7702 = vst [vmem:[#allocation75_spill] sm:$0xff] %v5751_v30  ;;  %v2062_v30 = vrot.slane %v2030_v42, 4  ;;  %v2096_v24 = vadd.f32 %v2064_v56, %v5682_v52  ;;  %v2108_v52 = vmul.f32 %v5393_v41, %v5553_v5 }
 0x166   :  { %7703 = vst [vmem:[#allocation76_spill] sm:$0xff] %v5758_v38  ;;  %v2061_v38 = vrot.slane %v2029_v61, 4  ;;  %v2095_v61 = vadd.f32 %v2063_v63, %v5679_v49  ;;  %v2107_v49 = vmul.f32 %v5384_v58, %v5553_v5  ;;  %v7712_v63 = vld [vmem:[#allocation46_spill] sm:$0xff] }
 0x167   :  { %7704 = vst [vmem:[#allocation77_spill] sm:$0xff] %v5765_v54  ;;  %v2060_v54 = vrot.slane %v2028_v27, 4  ;;  %v2094_v27 = vadd.f32 %v2062_v30, %v5676_v51  ;;  %v2106_v51 = vmul.f32 %v5375_v21, %v5553_v5  ;;  %v2117_v30 = vmul.f32 %v7712_v63, %v5553_v5 }
 0x168   :  { %7705 = vst [vmem:[#allocation78_spill] sm:$0xff] %v5772_v2  ;;  %v2059_v2 = vrot.slane %v2027_v4, 4  ;;  %v2093_v4 = vadd.f32 %v2061_v38, %v5673_v46  ;;  %v2105_v46 = vmul.f32 %v5366_v0, %v5553_v5  ;;  %v7713_v38 = vld [vmem:[#allocation47_spill] sm:$0xff] }
 0x169   :  { %7706 = vst [vmem:[#allocation79_spill] sm:$0xff] %v5779_v35  ;;  %v2058_v35 = vrot.slane %v2026_v7, 4  ;;  %v2092_v7 = vadd.f32 %v2060_v54, %v5670_v31  ;;  %v2104_v31 = vmul.f32 %v5357_v45, %v5553_v5  ;;  %v2118_v42 = vmul.f32 %v7713_v38, %v5553_v5  ;;  %v7714_v54 = vld [vmem:[#allocation48_spill] sm:$0xff] }
 0x16a   :  { %7707 = vst [vmem:[#allocation80_spill] sm:$0xff] %v5786_v33  ;;  %v2056_v33 = vrot.slane %v2024_v9, 4  ;;  %v2119_v13 = vmul.f32 %v7714_v54, %v5553_v5  ;;  %v2137_v36 = vrot.slane %v2105_v46, 6  ;;  %v2149_v38 = vrot.slane %v2117_v30, 6 }
 0x16b   :  { %7708 = vst [vmem:[#allocation81_spill] sm:$0xff] %v5793_v19  ;;  %v2057_v19 = vrot.slane %v2025_v44, 4  ;;  %v2090_v9 = vadd.f32 %v2058_v35, %v5664_v15  ;;  %v2091_v44 = vadd.f32 %v2059_v2, %v5667_v14  ;;  %v2100_v15 = vadd.f32 %v2068_v16, %v5694_v43  ;;  %v7710_v16 = vld [vmem:[#allocation44_spill] sm:$0xff] }
 0x16c   :  { %7709 = vst [vmem:[#allocation82_spill] sm:$0xff] %v5800_v10  ;;  %v2065_v10 = vrot.slane %v2033_v6, 4  ;;  %v2088_v28 = vadd.f32 %v2056_v33, %v5658_v57  ;;  %v2098_v57 = vadd.f32 %v2066_v25, %v5688_v3  ;;  %v2101_v14 = vadd.f32 %v2069_v18, %v5697_v11  ;;  %v7711_v25 = vld [vmem:[#allocation45_spill] sm:$0xff] }
 0x16d   :  { %v2089_v59 = vadd.f32 %v2057_v19, %v5661_v48  ;;  %v2099_v48 = vadd.f32 %v2067_v17, %v5691_v60  ;;  %v2110_v3 = vmul.f32 %v5407_v29, %v5553_v5  ;;  %v2111_v60 = vmul.f32 %v5414_v12, %v5553_v5 }
 0x16e   :  { %v2097_v55 = vadd.f32 %v2065_v10, %v5685_v1  ;;  %v2109_v1 = vmul.f32 %v5400_v40, %v5553_v5  ;;  %v2112_v43 = vmul.f32 %v5421_v62, %v5553_v5  ;;  %v2113_v11 = vmul.f32 %v5428_v50, %v5553_v5 }
 0x16f   :  { %v2114_v18 = vmul.f32 %v5435_v26, %v5553_v5  ;;  %v2115_v17 = vmul.f32 %v7710_v16, %v5553_v5  ;;  %v2116_v56 = vmul.f32 %v7711_v25, %v5553_v5  ;;  %v2136_v2 = vrot.slane %v2104_v31, 6 }
 0x170   :  { %v2138_v35 = vrot.slane %v2106_v51, 6  ;;  %v2139_v6 = vrot.slane %v2107_v49, 6  ;;  %v2140_v33 = vrot.slane %v2108_v52, 6  ;;  %v2141_v39 = vrot.slane %v2109_v1, 6 }
 0x171   :  { %v2142_v19 = vrot.slane %v2110_v3, 6  ;;  %v2143_v47 = vrot.slane %v2111_v60, 6  ;;  %v2144_v10 = vrot.slane %v2112_v43, 6  ;;  %v2145_v34 = vrot.slane %v2113_v11, 6 }
 0x172   :  { %v2146_v53 = vrot.slane %v2114_v18, 6  ;;  %v2147_v32 = vrot.slane %v2115_v17, 6  ;;  %v2148_v23 = vrot.slane %v2116_v56, 6  ;;  %v2150_v5 = vrot.slane %v2118_v42, 6 }
 0x173   :  { %v2151_v54 = vrot.slane %v2119_v13, 6  ;;  %v2168_v63 = vadd.f32 %v2136_v2, %v2086_v22  ;;  %v2169_v31 = vadd.f32 %v2137_v36, %v2087_v8  ;;  %v2170_v46 = vadd.f32 %v2138_v35, %v2088_v28  ;;  %v7720_v2 = vld [vmem:[#allocation54_spill] sm:$0xff]  ;;  %v7724_v36 = vld [vmem:[#allocation60_spill] sm:$0xff] }
 0x174   :  { %v2171_v51 = vadd.f32 %v2139_v6, %v2089_v59  ;;  %v2172_v49 = vadd.f32 %v2140_v33, %v2090_v9  ;;  %v2173_v52 = vadd.f32 %v2141_v39, %v2091_v44  ;;  %v2174_v1 = vadd.f32 %v2142_v19, %v2092_v7  ;;  %v7716_v59 = vld [vmem:[#allocation49_spill] sm:$0xff]  ;;  %v7717_v44 = vld [vmem:[#allocation51_spill] sm:$0xff]  ;;  %v7726_v39 = vld [vmem:[#allocation62_spill] sm:$0xff] }
 0x175   :  { %v2175_v3 = vadd.f32 %v2143_v47, %v2093_v4  ;;  %v2176_v60 = vadd.f32 %v2144_v10, %v2094_v27  ;;  %v2177_v43 = vadd.f32 %v2145_v34, %v2095_v61  ;;  %v2178_v11 = vadd.f32 %v2146_v53, %v2096_v24  ;;  %v7718_v4 = vld [vmem:[#allocation52_spill] sm:$0xff]  ;;  %v7719_v61 = vld [vmem:[#allocation53_spill] sm:$0xff]  ;;  %v7727_v47 = vld [vmem:[#allocation63_spill] sm:$0xff] }
 0x176   :  { %v2185_v18 = vstv %s5843_s12  ;;  %v2179_v17 = vadd.f32 %v2147_v32, %v2097_v55  ;;  %v2180_v56 = vadd.f32 %v2148_v23, %v2098_v57  ;;  %v2181_v30 = vadd.f32 %v2149_v38, %v2099_v48  ;;  %v7721_v57 = vld [vmem:[#allocation55_spill] sm:$0xff]  ;;  %v7725_v6 = vld [vmem:[#allocation61_spill] sm:$0xff]  ;;  %v7728_v34 = vld [vmem:[#allocation64_spill] sm:$0xff]  ;;  %s6758_s12 = sld [smem:[#allocation2 + $0xf]] }
 0x177   :  { %v2182_v42 = vadd.f32 %v2150_v5, %v2100_v15  ;;  %v2183_v13 = vadd.f32 %v2151_v54, %v2101_v14  ;;  %v5869_v22 = vstv %s5853_s13  ;;  %v5872_v8 = vstv %s5863_s1  ;;  %v7722_v15 = vld [vmem:[#allocation58_spill] sm:$0xff]  ;;  %v7723_v38 = vld [vmem:[#allocation59_spill] sm:$0xff]  ;;  %v7729_v32 = vld [vmem:[#allocation65_spill] sm:$0xff]  ;;  %s6772_s13 = sld [smem:[#allocation4 + $0xf]] }
 0x178   :  { %v5875_v28 = vstv %s5865_s14  ;;  %v2186_v9 = vmul.f32 %v7716_v59, %v2185_v18  ;;  %v2187_v7 = vmul.f32 %v7717_v44, %v2185_v18  ;;  %v2188_v27 = vmul.f32 %v7718_v4, %v2185_v18  ;;  %v7730_v5 = vld [vmem:[#allocation66_spill] sm:$0xff]  ;;  %s6774_s1 = sld [smem:[#allocation6 + $0xf]] }
 0x179   :  { %7715 = vst [vmem:[#allocation83_spill] sm:$0xff] %v5875_v28  ;;  %v2189_v24 = vmul.f32 %v7719_v61, %v2185_v18  ;;  %v2190_v55 = vmul.f32 %v7720_v2, %v2185_v18  ;;  %v2191_v48 = vmul.f32 %v7721_v57, %v2185_v18  ;;  %v2192_v14 = vmul.f32 %v7722_v15, %v2185_v18 }
 0x17a   :  { %v2193_v54 = vmul.f32 %v7723_v38, %v2185_v18  ;;  %v2194_v35 = vmul.f32 %v7724_v36, %v2185_v18  ;;  %v2195_v33 = vmul.f32 %v7725_v6, %v2185_v18  ;;  %v2196_v19 = vmul.f32 %v7726_v39, %v2185_v18 }
 0x17b   :  { %v2197_v10 = vmul.f32 %v7727_v47, %v2185_v18  ;;  %v2198_v53 = vmul.f32 %v7728_v34, %v2185_v18  ;;  %v2199_v23 = vmul.f32 %v7729_v32, %v2185_v18  ;;  %v2200_v2 = vmul.f32 %v7730_v5, %v2185_v18 }
 0x17c   :  { %v2201_v57 = vmul.f32 %v5648_v20, %v2185_v18  ;;  %v2218_v61 = vrot.slane %v2186_v9, 6  ;;  %v2219_v15 = vrot.slane %v2187_v7, 6  ;;  %v2220_v4 = vrot.slane %v2188_v27, 6 }
 0x17d   :  { %v2221_v38 = vrot.slane %v2189_v24, 6  ;;  %v2222_v44 = vrot.slane %v2190_v55, 6  ;;  %v2223_v36 = vrot.slane %v2191_v48, 6  ;;  %v2224_v59 = vrot.slane %v2192_v14, 6 }
 0x17e   :  { %v2225_v6 = vrot.slane %v2193_v54, 6  ;;  %v2226_v28 = vrot.slane %v2194_v35, 6  ;;  %v2227_v39 = vrot.slane %v2195_v33, 6  ;;  %v2228_v25 = vrot.slane %v2196_v19, 6 }
 0x17f   :  { %v2229_v47 = vrot.slane %v2197_v10, 6  ;;  %v2230_v16 = vrot.slane %v2198_v53, 6  ;;  %v2231_v34 = vrot.slane %v2199_v23, 6  ;;  %v2232_v26 = vrot.slane %v2200_v2, 6  ;;  %v7731_v53 = vld [vmem:[#allocation68_spill] sm:$0xff] }
 0x180   :  { %v2233_v32 = vrot.slane %v2201_v57, 6  ;;  %v2250_v50 = vadd.f32 %v2218_v61, %v2168_v63  ;;  %v2251_v5 = vadd.f32 %v2219_v15, %v2169_v31  ;;  %v2252_v62 = vadd.f32 %v2220_v4, %v2170_v46  ;;  %v7732_v63 = vld [vmem:[#allocation69_spill] sm:$0xff]  ;;  %v7733_v46 = vld [vmem:[#allocation70_spill] sm:$0xff]  ;;  %v7743_v4 = vld [vmem:[#allocation80_spill] sm:$0xff] }
 0x181   :  { %v2253_v18 = vadd.f32 %v2221_v38, %v2171_v51  ;;  %v2254_v9 = vadd.f32 %v2222_v44, %v2172_v49  ;;  %v2255_v7 = vadd.f32 %v2223_v36, %v2173_v52  ;;  %v2256_v27 = vadd.f32 %v2224_v59, %v2174_v1  ;;  %v7734_v49 = vld [vmem:[#allocation71_spill] sm:$0xff]  ;;  %v7735_v1 = vld [vmem:[#allocation72_spill] sm:$0xff]  ;;  %v7744_v57 = vld [vmem:[#allocation81_spill] sm:$0xff] }
 0x182   :  { %v2257_v24 = vadd.f32 %v2225_v6, %v2175_v3  ;;  %v2258_v55 = vadd.f32 %v2226_v28, %v2176_v60  ;;  %v2259_v48 = vadd.f32 %v2227_v39, %v2177_v43  ;;  %v2260_v14 = vadd.f32 %v2228_v25, %v2178_v11  ;;  %v7738_v43 = vld [vmem:[#allocation75_spill] sm:$0xff]  ;;  %v7745_v38 = vld [vmem:[#allocation82_spill] sm:$0xff] }
 0x183   :  { %v2261_v54 = vadd.f32 %v2229_v47, %v2179_v17  ;;  %v2262_v35 = vadd.f32 %v2230_v16, %v2180_v56  ;;  %v2263_v33 = vadd.f32 %v2231_v34, %v2181_v30  ;;  %v2264_v19 = vadd.f32 %v2232_v26, %v2182_v42  ;;  %v7736_v16 = vld [vmem:[#allocation73_spill] sm:$0xff]  ;;  %v7737_v26 = vld [vmem:[#allocation74_spill] sm:$0xff]  ;;  %v7739_v17 = vld [vmem:[#allocation76_spill] sm:$0xff] }
 0x184   :  { %v2265_v10 = vadd.f32 %v2233_v32, %v2183_v13  ;;  %v2268_v2 = vmul.f32 %v7731_v53, %v5869_v22  ;;  %v2269_v31 = vmul.f32 %v7732_v63, %v5869_v22  ;;  %v2270_v51 = vmul.f32 %v7733_v46, %v5869_v22  ;;  %v7740_v30 = vld [vmem:[#allocation77_spill] sm:$0xff]  ;;  %v7741_v13 = vld [vmem:[#allocation78_spill] sm:$0xff]  ;;  %v7742_v59 = vld [vmem:[#allocation79_spill] sm:$0xff] }
 0x185   :  { %v2271_v52 = vmul.f32 %v7734_v49, %v5869_v22  ;;  %v2272_v25 = vmul.f32 %v7735_v1, %v5869_v22  ;;  %v2273_v3 = vmul.f32 %v7736_v16, %v5869_v22  ;;  %v2274_v60 = vmul.f32 %v7737_v26, %v5869_v22 }
 0x186   :  { %v2275_v11 = vmul.f32 %v7738_v43, %v5869_v22  ;;  %v2276_v56 = vmul.f32 %v7739_v17, %v5869_v22  ;;  %v2277_v42 = vmul.f32 %v7740_v30, %v5869_v22  ;;  %v2278_v28 = vmul.f32 %v7741_v13, %v5869_v22 }
 0x187   :  { %v2279_v44 = vmul.f32 %v7742_v59, %v5869_v22  ;;  %v2280_v61 = vmul.f32 %v7743_v4, %v5869_v22  ;;  %v2281_v15 = vmul.f32 %v7744_v57, %v5869_v22  ;;  %v2282_v36 = vmul.f32 %v7745_v38, %v5869_v22 }
 0x188   :  { %v2283_v6 = vmul.f32 %v5807_v37, %v5869_v22  ;;  %v2300_v39 = vrot.slane %v2268_v2, 6  ;;  %v2301_v47 = vrot.slane %v2269_v31, 6  ;;  %v2302_v34 = vrot.slane %v2270_v51, 6 }
 0x189   :  { %v2303_v32 = vrot.slane %v2271_v52, 6  ;;  %v2304_v23 = vrot.slane %v2272_v25, 6  ;;  %v2305_v13 = vrot.slane %v2273_v3, 6  ;;  %v2306_v30 = vrot.slane %v2274_v60, 6 }
 0x18a   :  { %v2307_v59 = vrot.slane %v2275_v11, 6  ;;  %v2308_v17 = vrot.slane %v2276_v56, 6  ;;  %v2309_v43 = vrot.slane %v2277_v42, 6  ;;  %v2310_v4 = vrot.slane %v2278_v28, 6 }
 0x18b   :  { %v2311_v26 = vrot.slane %v2279_v44, 6  ;;  %v2312_v16 = vrot.slane %v2280_v61, 6  ;;  %v2313_v57 = vrot.slane %v2281_v15, 6  ;;  %v2314_v1 = vrot.slane %v2282_v36, 6 }
 0x18c   :  { %v2315_v49 = vrot.slane %v2283_v6, 6  ;;  %v2332_v38 = vadd.f32 %v2300_v39, %v2250_v50  ;;  %v2333_v46 = vadd.f32 %v2301_v47, %v2251_v5  ;;  %v2334_v63 = vadd.f32 %v2302_v34, %v2252_v62 }
 0x18d   :  { %v2335_v22 = vadd.f32 %v2303_v32, %v2253_v18  ;;  %v2336_v2 = vadd.f32 %v2304_v23, %v2254_v9  ;;  %v2337_v31 = vadd.f32 %v2305_v13, %v2255_v7  ;;  %v2338_v51 = vadd.f32 %v2306_v30, %v2256_v27 }
 0x18e   :  { %v2339_v52 = vadd.f32 %v2307_v59, %v2257_v24  ;;  %v2340_v25 = vadd.f32 %v2308_v17, %v2258_v55  ;;  %v2341_v3 = vadd.f32 %v2309_v43, %v2259_v48  ;;  %v2342_v60 = vadd.f32 %v2310_v4, %v2260_v14  ;;  %v7746_v24 = vld [vmem:[#allocation41_spill] sm:$0xff]  ;;  %v7747_v48 = vld [vmem:[#allocation42_spill] sm:$0xff]  ;;  %v7753_v17 = vld [vmem:[#allocation48_spill] sm:$0xff] }
 0x18f   :  { %v2343_v11 = vadd.f32 %v2311_v26, %v2261_v54  ;;  %v2344_v56 = vadd.f32 %v2312_v16, %v2262_v35  ;;  %v2345_v42 = vadd.f32 %v2313_v57, %v2263_v33  ;;  %v2346_v28 = vadd.f32 %v2314_v1, %v2264_v19  ;;  %v7748_v54 = vld [vmem:[#allocation43_spill] sm:$0xff]  ;;  %v7749_v33 = vld [vmem:[#allocation44_spill] sm:$0xff]  ;;  %v7751_v1 = vld [vmem:[#allocation46_spill] sm:$0xff] }
 0x190   :  { %v2347_v44 = vadd.f32 %v2315_v49, %v2265_v10  ;;  %v2350_v61 = vmul.f32 %v5357_v45, %v5872_v8  ;;  %v2351_v50 = vmul.f32 %v5366_v0, %v5872_v8  ;;  %v2352_v62 = vmul.f32 %v5375_v21, %v5872_v8  ;;  %v7750_v10 = vld [vmem:[#allocation45_spill] sm:$0xff]  ;;  %v7752_v26 = vld [vmem:[#allocation47_spill] sm:$0xff] }
 0x191   :  { %v2353_v5 = vmul.f32 %v5384_v58, %v5872_v8  ;;  %v2354_v18 = vmul.f32 %v5393_v41, %v5872_v8  ;;  %v2355_v9 = vmul.f32 %v5400_v40, %v5872_v8  ;;  %v2356_v7 = vmul.f32 %v5407_v29, %v5872_v8 }
 0x192   :  { %v2357_v27 = vmul.f32 %v5414_v12, %v5872_v8  ;;  %v2358_v55 = vmul.f32 %v7746_v24, %v5872_v8  ;;  %v2359_v14 = vmul.f32 %v7747_v48, %v5872_v8  ;;  %v2360_v35 = vmul.f32 %v7748_v54, %v5872_v8 }
 0x193   :  { %v2361_v19 = vmul.f32 %v7749_v33, %v5872_v8  ;;  %v2362_v49 = vmul.f32 %v7750_v10, %v5872_v8  ;;  %v2363_v16 = vmul.f32 %v7751_v1, %v5872_v8  ;;  %v2364_v43 = vmul.f32 %v7752_v26, %v5872_v8 }
 0x194   :  { %v2365_v30 = vmul.f32 %v7753_v17, %v5872_v8  ;;  %v2366_v13 = vadd.f32 %v2350_v61, %v2332_v38  ;;  %v2367_v59 = vadd.f32 %v2351_v50, %v2333_v46  ;;  %v2368_v4 = vadd.f32 %v2352_v62, %v2334_v63  ;;  %v7754_v63 = vld [vmem:[#allocation83_spill] sm:$0xff]  ;;  %v7755_v46 = vld [vmem:[#allocation49_spill] sm:$0xff]  ;;  %v7763_v50 = vld [vmem:[#allocation60_spill] sm:$0xff] }
 0x195   :  { %v2369_v57 = vadd.f32 %v2353_v5, %v2335_v22  ;;  %v2370_v15 = vadd.f32 %v2354_v18, %v2336_v2  ;;  %v2371_v36 = vadd.f32 %v2355_v9, %v2337_v31  ;;  %v2372_v6 = vadd.f32 %v2356_v7, %v2338_v51  ;;  %v7756_v22 = vld [vmem:[#allocation51_spill] sm:$0xff]  ;;  %v7757_v31 = vld [vmem:[#allocation52_spill] sm:$0xff]  ;;  %v7764_v5 = vld [vmem:[#allocation61_spill] sm:$0xff] }
 0x196   :  { %v2373_v39 = vadd.f32 %v2357_v27, %v2339_v52  ;;  %v2374_v47 = vadd.f32 %v2358_v55, %v2340_v25  ;;  %v2375_v34 = vadd.f32 %v2359_v14, %v2341_v3  ;;  %v2376_v32 = vadd.f32 %v2360_v35, %v2342_v60  ;;  %v7758_v52 = vld [vmem:[#allocation53_spill] sm:$0xff]  ;;  %v7759_v3 = vld [vmem:[#allocation54_spill] sm:$0xff]  ;;  %v7766_v27 = vld [vmem:[#allocation63_spill] sm:$0xff] }
 0x197   :  { %v2377_v23 = vadd.f32 %v2361_v19, %v2343_v11  ;;  %v2378_v26 = vadd.f32 %v2362_v49, %v2344_v56  ;;  %v2379_v1 = vadd.f32 %v2363_v16, %v2345_v42  ;;  %v2380_v10 = vadd.f32 %v2364_v43, %v2346_v28  ;;  %v7760_v11 = vld [vmem:[#allocation55_spill] sm:$0xff]  ;;  %v7761_v42 = vld [vmem:[#allocation58_spill] sm:$0xff]  ;;  %v7767_v14 = vld [vmem:[#allocation64_spill] sm:$0xff] }
 0x198   :  { %v2381_v8 = vadd.f32 %v2365_v30, %v2347_v44  ;;  %v2384_v38 = vmul.f32 %v7755_v46, %v7754_v63  ;;  %v2385_v2 = vmul.f32 %v7756_v22, %v7754_v63  ;;  %v2386_v51 = vmul.f32 %v7757_v31, %v7754_v63  ;;  %v7762_v44 = vld [vmem:[#allocation59_spill] sm:$0xff]  ;;  %v7765_v9 = vld [vmem:[#allocation62_spill] sm:$0xff]  ;;  %v7768_v19 = vld [vmem:[#allocation65_spill] sm:$0xff] }
 0x199   :  { %v2387_v25 = vmul.f32 %v7758_v52, %v7754_v63  ;;  %v2388_v60 = vmul.f32 %v7759_v3, %v7754_v63  ;;  %v2389_v56 = vmul.f32 %v7760_v11, %v7754_v63  ;;  %v2390_v28 = vmul.f32 %v7761_v42, %v7754_v63  ;;  %v7769_v16 = vld [vmem:[#allocation66_spill] sm:$0xff] }
 0x19a   :  { %v2391_v61 = vmul.f32 %v7762_v44, %v7754_v63  ;;  %v2392_v62 = vmul.f32 %v7763_v50, %v7754_v63  ;;  %v2393_v18 = vmul.f32 %v7764_v5, %v7754_v63  ;;  %v2394_v7 = vmul.f32 %v7765_v9, %v7754_v63 }
 0x19b   :  { %v2395_v55 = vmul.f32 %v7766_v27, %v7754_v63  ;;  %v2396_v35 = vmul.f32 %v7767_v14, %v7754_v63  ;;  %v2397_v49 = vmul.f32 %v7768_v19, %v7754_v63  ;;  %v2398_v43 = vmul.f32 %v7769_v16, %v7754_v63 }
 0x19c   :  { %v2399_v30 = vmul.f32 %v5648_v20, %v7754_v63  ;;  %v2400_v5 = vadd.f32 %v2384_v38, %v2366_v13  ;;  %v2401_v50 = vadd.f32 %v2385_v2, %v2367_v59  ;;  %v2402_v9 = vadd.f32 %v2386_v51, %v2368_v4  ;;  %v7779_v51 = vld [vmem:[#allocation76_spill] sm:$0xff] }
 0x19d   :  { %v2403_v44 = vadd.f32 %v2387_v25, %v2369_v57  ;;  %v2404_v27 = vadd.f32 %v2388_v60, %v2370_v15  ;;  %v2405_v42 = vadd.f32 %v2389_v56, %v2371_v36  ;;  %v2406_v11 = vadd.f32 %v2390_v28, %v2372_v6  ;;  %v7772_v15 = vld [vmem:[#allocation69_spill] sm:$0xff]  ;;  %v7773_v6 = vld [vmem:[#allocation70_spill] sm:$0xff] }
 0x19e   :  { %v2407_v14 = vadd.f32 %v2391_v61, %v2373_v39  ;;  %v2408_v3 = vadd.f32 %v2392_v62, %v2374_v47  ;;  %v2409_v52 = vadd.f32 %v2393_v18, %v2375_v34  ;;  %v2410_v19 = vadd.f32 %v2394_v7, %v2376_v32  ;;  %v7774_v47 = vld [vmem:[#allocation71_spill] sm:$0xff]  ;;  %v7775_v32 = vld [vmem:[#allocation72_spill] sm:$0xff]  ;;  %v7780_v60 = vld [vmem:[#allocation77_spill] sm:$0xff] }
 0x19f   :  { %v2417_v31 = vstv %s5957_s15  ;;  %v2411_v22 = vadd.f32 %v2395_v55, %v2377_v23  ;;  %v2412_v16 = vadd.f32 %v2396_v35, %v2378_v26  ;;  %v2413_v46 = vadd.f32 %v2397_v49, %v2379_v1  ;;  %v7776_v23 = vld [vmem:[#allocation73_spill] sm:$0xff]  ;;  %v7777_v1 = vld [vmem:[#allocation74_spill] sm:$0xff]  ;;  %v7782_v62 = vld [vmem:[#allocation79_spill] sm:$0xff] }
 0x1a0   :  { %v2414_v17 = vadd.f32 %v2398_v43, %v2380_v10  ;;  %v2415_v63 = vadd.f32 %v2399_v30, %v2381_v8  ;;  %v2451_v13 = vstv %s5959_s0  ;;  %v6000_v59 = vstv %s5961_s16  ;;  %v7778_v8 = vld [vmem:[#allocation75_spill] sm:$0xff]  ;;  %v7781_v28 = vld [vmem:[#allocation78_spill] sm:$0xff]  ;;  %v7783_v7 = vld [vmem:[#allocation80_spill] sm:$0xff] }
 0x1a1   :  { %7770 = vst [vmem:[#allocation41_spill] sm:$0xff] %v6000_v59  ;;  %v6003_v4 = vstv %s5971_s2  ;;  %v2418_v57 = vmul.f32 %v7731_v53, %v2417_v31  ;;  %v2419_v36 = vmul.f32 %v7772_v15, %v2417_v31  ;;  %v2420_v39 = vmul.f32 %v7773_v6, %v2417_v31  ;;  %v7784_v35 = vld [vmem:[#allocation81_spill] sm:$0xff]  ;;  %v7785_v43 = vld [vmem:[#allocation82_spill] sm:$0xff] }
 0x1a2   :  { %7771 = vst [vmem:[#allocation42_spill] sm:$0xff] %v6003_v4  ;;  %v2421_v34 = vmul.f32 %v7774_v47, %v2417_v31  ;;  %v2422_v38 = vmul.f32 %v7775_v32, %v2417_v31  ;;  %v2423_v26 = vmul.f32 %v7776_v23, %v2417_v31  ;;  %v2424_v10 = vmul.f32 %v7777_v1, %v2417_v31 }
 0x1a3   :  { %v2425_v2 = vmul.f32 %v7778_v8, %v2417_v31  ;;  %v2426_v25 = vmul.f32 %v7779_v51, %v2417_v31  ;;  %v2427_v56 = vmul.f32 %v7780_v60, %v2417_v31  ;;  %v2428_v61 = vmul.f32 %v7781_v28, %v2417_v31 }
 0x1a4   :  { %v2429_v18 = vmul.f32 %v7782_v62, %v2417_v31  ;;  %v2430_v55 = vmul.f32 %v7783_v7, %v2417_v31  ;;  %v2431_v49 = vmul.f32 %v7784_v35, %v2417_v31  ;;  %v2432_v30 = vmul.f32 %v7785_v43, %v2417_v31 }
 0x1a5   :  { %v2433_v23 = vmul.f32 %v5807_v37, %v2417_v31  ;;  %v2434_v32 = vadd.f32 %v2418_v57, %v2400_v5  ;;  %v2435_v1 = vadd.f32 %v2419_v36, %v2401_v50  ;;  %v2436_v47 = vadd.f32 %v2420_v39, %v2402_v9  ;;  %v7787_v5 = vld [vmem:[#allocation46_spill] sm:$0xff]  ;;  %v7788_v9 = vld [vmem:[#allocation47_spill] sm:$0xff] }
 0x1a6   :  { %v2437_v8 = vadd.f32 %v2421_v34, %v2403_v44  ;;  %v2438_v6 = vadd.f32 %v2422_v38, %v2404_v27  ;;  %v2439_v51 = vadd.f32 %v2423_v26, %v2405_v42  ;;  %v2440_v15 = vadd.f32 %v2424_v10, %v2406_v11  ;;  %v7789_v27 = vld [vmem:[#allocation48_spill] sm:$0xff] }
 0x1a7   :  { %v2441_v60 = vadd.f32 %v2425_v2, %v2407_v14  ;;  %v2442_v53 = vadd.f32 %v2426_v25, %v2408_v3  ;;  %v2443_v28 = vadd.f32 %v2427_v56, %v2409_v52  ;;  %v2444_v4 = vadd.f32 %v2428_v61, %v2410_v19  ;;  %v7786_v3 = vld [vmem:[#allocation45_spill] sm:$0xff] }
 0x1a8   :  { %v2445_v62 = vadd.f32 %v2429_v18, %v2411_v22  ;;  %v2446_v20 = vadd.f32 %v2430_v55, %v2412_v16  ;;  %v2447_v7 = vadd.f32 %v2431_v49, %v2413_v46  ;;  %v2448_v59 = vadd.f32 %v2432_v30, %v2414_v17 }
 0x1a9   :  { %v2449_v35 = vadd.f32 %v2433_v23, %v2415_v63  ;;  %v2452_v43 = vmul.f32 %v5357_v45, %v2451_v13  ;;  %v2453_v31 = vmul.f32 %v5366_v0, %v2451_v13  ;;  %v2454_v50 = vmul.f32 %v5375_v21, %v2451_v13 }
 0x1aa   :  { %v2455_v44 = vmul.f32 %v5384_v58, %v2451_v13  ;;  %v2456_v42 = vmul.f32 %v5393_v41, %v2451_v13  ;;  %v2457_v11 = vmul.f32 %v5400_v40, %v2451_v13  ;;  %v2458_v52 = vmul.f32 %v5407_v29, %v2451_v13 }
 0x1ab   :  { %v2459_v22 = vmul.f32 %v5414_v12, %v2451_v13  ;;  %v2460_v46 = vmul.f32 %v7746_v24, %v2451_v13  ;;  %v2461_v17 = vmul.f32 %v7747_v48, %v2451_v13  ;;  %v2462_v45 = vmul.f32 %v7748_v54, %v2451_v13 }
 0x1ac   :  { %v2463_v0 = vmul.f32 %v7749_v33, %v2451_v13  ;;  %v2464_v21 = vmul.f32 %v7786_v3, %v2451_v13  ;;  %v2465_v58 = vmul.f32 %v7787_v5, %v2451_v13  ;;  %v2466_v41 = vmul.f32 %v7788_v9, %v2451_v13  ;;  %v7802_v3 = vld [vmem:[#allocation63_spill] sm:$0xff]  ;;  %v7803_v5 = vld [vmem:[#allocation64_spill] sm:$0xff]  ;;  %v7804_v9 = vld [vmem:[#allocation65_spill] sm:$0xff] }
 0x1ad   :  { %v2467_v40 = vmul.f32 %v7789_v27, %v2451_v13  ;;  %v2484_v14 = vrot.slane %v2452_v43, 2  ;;  %v2485_v29 = vrot.slane %v2453_v31, 2  ;;  %v2486_v19 = vrot.slane %v2454_v50, 2  ;;  %v7805_v27 = vld [vmem:[#allocation66_spill] sm:$0xff] }
 0x1ae   :  { %v2487_v12 = vrot.slane %v2455_v44, 2  ;;  %v2488_v16 = vrot.slane %v2456_v42, 2  ;;  %v2489_v24 = vrot.slane %v2457_v11, 2  ;;  %v2490_v63 = vrot.slane %v2458_v52, 2  ;;  %v7790_v11 = vld [vmem:[#allocation41_spill] sm:$0xff] }
 0x1af   :  { %v2491_v48 = vrot.slane %v2459_v22, 2  ;;  %v2492_v57 = vrot.slane %v2460_v46, 2  ;;  %v2493_v54 = vrot.slane %v2461_v17, 2  ;;  %v2494_v36 = vrot.slane %v2462_v45, 2  ;;  %v7791_v52 = vld [vmem:[#allocation49_spill] sm:$0xff]  ;;  %v7801_v45 = vld [vmem:[#allocation62_spill] sm:$0xff] }
 0x1b0   :  { %v2495_v33 = vrot.slane %v2463_v0, 2  ;;  %v2496_v39 = vrot.slane %v2464_v21, 2  ;;  %v2497_v34 = vrot.slane %v2465_v58, 2  ;;  %v2498_v38 = vrot.slane %v2466_v41, 2  ;;  %v7800_v46 = vld [vmem:[#allocation61_spill] sm:$0xff] }
 0x1b1   :  { %v2499_v23 = vrot.slane %v2467_v40, 2  ;;  %v2516_v26 = vadd.f32 %v2484_v14, %v2434_v32  ;;  %v2517_v10 = vadd.f32 %v2485_v29, %v2435_v1  ;;  %v2518_v2 = vadd.f32 %v2486_v19, %v2436_v47  ;;  %v7792_v32 = vld [vmem:[#allocation51_spill] sm:$0xff]  ;;  %v7793_v47 = vld [vmem:[#allocation52_spill] sm:$0xff] }
 0x1b2   :  { %v2519_v13 = vadd.f32 %v2487_v12, %v2437_v8  ;;  %v2520_v25 = vadd.f32 %v2488_v16, %v2438_v6  ;;  %v2521_v56 = vadd.f32 %v2489_v24, %v2439_v51  ;;  %v2522_v61 = vadd.f32 %v2490_v63, %v2440_v15  ;;  %v7794_v15 = vld [vmem:[#allocation53_spill] sm:$0xff]  ;;  %v7806_v14 = vld [vmem:[#allocation67_spill] sm:$0xff] }
 0x1b3   :  { %v2523_v18 = vadd.f32 %v2491_v48, %v2441_v60  ;;  %v2524_v55 = vadd.f32 %v2492_v57, %v2442_v53  ;;  %v2525_v49 = vadd.f32 %v2493_v54, %v2443_v28  ;;  %v2526_v43 = vadd.f32 %v2494_v36, %v2444_v4  ;;  %v7795_v53 = vld [vmem:[#allocation54_spill] sm:$0xff]  ;;  %v7798_v28 = vld [vmem:[#allocation59_spill] sm:$0xff] }
 0x1b4   :  { %v2527_v30 = vadd.f32 %v2495_v33, %v2445_v62  ;;  %v2528_v31 = vadd.f32 %v2496_v39, %v2446_v20  ;;  %v2529_v50 = vadd.f32 %v2497_v34, %v2447_v7  ;;  %v2530_v44 = vadd.f32 %v2498_v38, %v2448_v59  ;;  %v7796_v20 = vld [vmem:[#allocation55_spill] sm:$0xff]  ;;  %v7797_v59 = vld [vmem:[#allocation58_spill] sm:$0xff]  ;;  %v7799_v7 = vld [vmem:[#allocation60_spill] sm:$0xff] }
 0x1b5   :  { %v2531_v42 = vadd.f32 %v2499_v23, %v2449_v35  ;;  %v2534_v22 = vmul.f32 %v7791_v52, %v7790_v11  ;;  %v2535_v1 = vmul.f32 %v7792_v32, %v7790_v11  ;;  %v2536_v6 = vmul.f32 %v7793_v47, %v7790_v11 }
 0x1b6   :  { %v2537_v8 = vmul.f32 %v7794_v15, %v7790_v11  ;;  %v2538_v4 = vmul.f32 %v7795_v53, %v7790_v11  ;;  %v2539_v51 = vmul.f32 %v7796_v20, %v7790_v11  ;;  %v2540_v60 = vmul.f32 %v7797_v59, %v7790_v11 }
 0x1b7   :  { %v2541_v62 = vmul.f32 %v7798_v28, %v7790_v11  ;;  %v2542_v35 = vmul.f32 %v7799_v7, %v7790_v11  ;;  %v2543_v17 = vmul.f32 %v7800_v46, %v7790_v11  ;;  %v2544_v0 = vmul.f32 %v7801_v45, %v7790_v11  ;;  %v7808_v46 = vld [vmem:[#allocation68_spill] sm:$0xff]  ;;  %v7817_v45 = vld [vmem:[#allocation77_spill] sm:$0xff] }
 0x1b8   :  { %v2545_v21 = vmul.f32 %v7802_v3, %v7790_v11  ;;  %v2546_v58 = vmul.f32 %v7803_v5, %v7790_v11  ;;  %v2547_v41 = vmul.f32 %v7804_v9, %v7790_v11  ;;  %v2548_v40 = vmul.f32 %v7805_v27, %v7790_v11  ;;  %v7818_v3 = vld [vmem:[#allocation78_spill] sm:$0xff]  ;;  %v7819_v5 = vld [vmem:[#allocation79_spill] sm:$0xff]  ;;  %v7820_v9 = vld [vmem:[#allocation80_spill] sm:$0xff] }
 0x1b9   :  { %v2549_v29 = vmul.f32 %v7806_v14, %v7790_v11  ;;  %v2566_v19 = vrot.slane %v2534_v22, 2  ;;  %v2567_v12 = vrot.slane %v2535_v1, 2  ;;  %v2568_v16 = vrot.slane %v2536_v6, 2  ;;  %v7821_v27 = vld [vmem:[#allocation81_spill] sm:$0xff]  ;;  %v7822_v14 = vld [vmem:[#allocation82_spill] sm:$0xff] }
 0x1ba   :  { %v2569_v24 = vrot.slane %v2537_v8, 2  ;;  %v2570_v63 = vrot.slane %v2538_v4, 2  ;;  %v2571_v48 = vrot.slane %v2539_v51, 2  ;;  %v2572_v57 = vrot.slane %v2540_v60, 2 }
 0x1bb   :  { %v2573_v54 = vrot.slane %v2541_v62, 2  ;;  %v2574_v36 = vrot.slane %v2542_v35, 2  ;;  %v2575_v33 = vrot.slane %v2543_v17, 2  ;;  %v2576_v39 = vrot.slane %v2544_v0, 2  ;;  %v7807_v35 = vld [vmem:[#allocation42_spill] sm:$0xff] }
 0x1bc   :  { %v2577_v34 = vrot.slane %v2545_v21, 2  ;;  %v2578_v38 = vrot.slane %v2546_v58, 2  ;;  %v2579_v23 = vrot.slane %v2547_v41, 2  ;;  %v2580_v52 = vrot.slane %v2548_v40, 2 }
 0x1bd   :  { %v2581_v32 = vrot.slane %v2549_v29, 2  ;;  %v2598_v47 = vadd.f32 %v2566_v19, %v2516_v26  ;;  %v2599_v15 = vadd.f32 %v2567_v12, %v2517_v10  ;;  %v2600_v53 = vadd.f32 %v2568_v16, %v2518_v2  ;;  %v7809_v26 = vld [vmem:[#allocation69_spill] sm:$0xff]  ;;  %v7810_v2 = vld [vmem:[#allocation70_spill] sm:$0xff] }
 0x1be   :  { %v2601_v11 = vadd.f32 %v2569_v24, %v2519_v13  ;;  %v2602_v22 = vadd.f32 %v2570_v63, %v2520_v25  ;;  %v2603_v1 = vadd.f32 %v2571_v48, %v2521_v56  ;;  %v2604_v6 = vadd.f32 %v2572_v57, %v2522_v61  ;;  %v7811_v25 = vld [vmem:[#allocation71_spill] sm:$0xff]  ;;  %v7812_v61 = vld [vmem:[#allocation72_spill] sm:$0xff] }
 0x1bf   :  { %v2605_v8 = vadd.f32 %v2573_v54, %v2523_v18  ;;  %v2606_v4 = vadd.f32 %v2574_v36, %v2524_v55  ;;  %v2607_v20 = vadd.f32 %v2575_v33, %v2525_v49  ;;  %v2608_v51 = vadd.f32 %v2576_v39, %v2526_v43  ;;  %v7813_v55 = vld [vmem:[#allocation73_spill] sm:$0xff]  ;;  %v7814_v43 = vld [vmem:[#allocation74_spill] sm:$0xff] }
 0x1c0   :  { %v2609_v59 = vadd.f32 %v2577_v34, %v2527_v30  ;;  %v2610_v60 = vadd.f32 %v2578_v38, %v2528_v31  ;;  %v2611_v28 = vadd.f32 %v2579_v23, %v2529_v50  ;;  %v2612_v62 = vadd.f32 %v2580_v52, %v2530_v44  ;;  %v7815_v31 = vld [vmem:[#allocation75_spill] sm:$0xff]  ;;  %v7816_v44 = vld [vmem:[#allocation76_spill] sm:$0xff] }
 0x1c1   :  { %v2613_v7 = vadd.f32 %v2581_v32, %v2531_v42  ;;  %v2616_v17 = vmul.f32 %v7808_v46, %v7807_v35  ;;  %v2617_v10 = vmul.f32 %v7809_v26, %v7807_v35  ;;  %v2618_v13 = vmul.f32 %v7810_v2, %v7807_v35 }
 0x1c2   :  { %v2619_v56 = vmul.f32 %v7811_v25, %v7807_v35  ;;  %v2620_v18 = vmul.f32 %v7812_v61, %v7807_v35  ;;  %v2621_v49 = vmul.f32 %v7813_v55, %v7807_v35  ;;  %v2622_v30 = vmul.f32 %v7814_v43, %v7807_v35 }
 0x1c3   :  { %v2623_v50 = vmul.f32 %v7815_v31, %v7807_v35  ;;  %v2624_v42 = vmul.f32 %v7816_v44, %v7807_v35  ;;  %v2625_v0 = vmul.f32 %v7817_v45, %v7807_v35  ;;  %v2626_v21 = vmul.f32 %v7818_v3, %v7807_v35 }
 0x1c4   :  { %v2627_v58 = vmul.f32 %v7819_v5, %v7807_v35  ;;  %v2628_v41 = vmul.f32 %v7820_v9, %v7807_v35  ;;  %v2629_v40 = vmul.f32 %v7821_v27, %v7807_v35  ;;  %v2630_v29 = vmul.f32 %v7822_v14, %v7807_v35 }
 0x1c5   :  { %v2631_v19 = vmul.f32 %v5807_v37, %v7807_v35  ;;  %v2648_v12 = vrot.slane %v2616_v17, 2  ;;  %v2649_v16 = vrot.slane %v2617_v10, 2  ;;  %v2650_v24 = vrot.slane %v2618_v13, 2 }
 0x1c6   :  { %v2651_v63 = vrot.slane %v2619_v56, 2  ;;  %v2652_v48 = vrot.slane %v2620_v18, 2  ;;  %v2653_v57 = vrot.slane %v2621_v49, 2  ;;  %v2654_v54 = vrot.slane %v2622_v30, 2  ;;  %v6178_v49 = vld [vmem:[%s7017_s4 + $0x20] sm:$0xff]  ;;  %v6184_v30 = vld [vmem:[%s7017_s4 + $0x28] sm:$0xff] }
 0x1c7   :  { %v2655_v36 = vrot.slane %v2623_v50, 2  ;;  %v2656_v33 = vrot.slane %v2624_v42, 2  ;;  %v2657_v39 = vrot.slane %v2625_v0, 2  ;;  %v2658_v34 = vrot.slane %v2626_v21, 2  ;;  %7842 = vst [vmem:[#allocation63_spill] sm:$0xff] %v6178_v49  ;;  %v6190_v50 = vld [vmem:[%s7017_s4 + $0x30] sm:$0xff] }
 0x1c8   :  { %v2659_v38 = vrot.slane %v2627_v58, 2  ;;  %v2660_v23 = vrot.slane %v2628_v41, 2  ;;  %v2661_v52 = vrot.slane %v2629_v40, 2  ;;  %v2662_v37 = vrot.slane %v2630_v29, 2  ;;  %7843 = vst [vmem:[#allocation64_spill] sm:$0xff] %v6184_v30  ;;  %v6196_v42 = vld [vmem:[%s7017_s4 + $0x38] sm:$0xff] }
 0x1c9   :  { %v2663_v32 = vrot.slane %v2631_v19, 2  ;;  %v6109_v35 = vadd.f32 %v2648_v12, %v2598_v47  ;;  %v6111_v46 = vadd.f32 %v2649_v16, %v2599_v15  ;;  %v6113_v17 = vadd.f32 %v2650_v24, %v2600_v53  ;;  %7844 = vst [vmem:[#allocation65_spill] sm:$0xff] %v6190_v50  ;;  %v6202_v0 = vld [vmem:[%s7017_s4 + $0x40] sm:$0xff]  ;;  %v6208_v21 = vld [vmem:[%s7017_s4 + $0x48] sm:$0xff]  ;;  %v6214_v58 = vld [vmem:[%s7017_s4 + $0x50] sm:$0xff] }
 0x1ca   :  { %v6115_v26 = vadd.f32 %v2651_v63, %v2601_v11  ;;  %v6117_v10 = vadd.f32 %v2652_v48, %v2602_v22  ;;  %v6119_v2 = vadd.f32 %v2653_v57, %v2603_v1  ;;  %v6121_v13 = vadd.f32 %v2654_v54, %v2604_v6  ;;  %7845 = vst [vmem:[#allocation66_spill] sm:$0xff] %v6196_v42  ;;  %v6220_v41 = vld [vmem:[%s7017_s4 + $0x58] sm:$0xff]  ;;  %v6226_v40 = vld [vmem:[%s7017_s4 + $0x60] sm:$0xff]  ;;  %v6232_v29 = vld [vmem:[%s7017_s4 + $0x68] sm:$0xff] }
 0x1cb   :  { %7823 = vst [vmem:[#allocation43_spill] sm:$0xff] %v6109_v35  ;;  %v6123_v25 = vadd.f32 %v2655_v36, %v2605_v8  ;;  %v6125_v56 = vadd.f32 %v2656_v33, %v2606_v4  ;;  %v6127_v47 = vadd.f32 %v2657_v39, %v2607_v20  ;;  %v6129_v15 = vadd.f32 %v2658_v34, %v2608_v51  ;;  %v6152_v20 = vld [vmem:[%s7017_s4] sm:$0xff]  ;;  %v6238_v12 = vld [vmem:[%s7017_s4 + $0x70] sm:$0xff]  ;;  %v6244_v24 = vld [vmem:[%s7017_s4 + $0x78] sm:$0xff] }
 0x1cc   :  { %7824 = vst [vmem:[#allocation44_spill] sm:$0xff] %v6111_v46  ;;  %v2697_v53 = vstv %s6085_s17  ;;  %v6132_v61 = vadd.f32 %v2659_v38, %v2609_v59  ;;  %v6134_v11 = vadd.f32 %v2660_v23, %v2610_v60  ;;  %v6136_v18 = vadd.f32 %v2661_v52, %v2611_v28  ;;  %v6160_v59 = vld [vmem:[%s7017_s4 + $0x8] sm:$0xff]  ;;  %v6166_v28 = vld [vmem:[%s7017_s4 + $0x10] sm:$0xff]  ;;  %s6512_s17 = sld [smem:[#allocation2 + $0xd]] }
 0x1cd   :  { %7825 = vst [vmem:[#allocation83_spill] sm:$0xff] %v6113_v17  ;;  %v6138_v22 = vadd.f32 %v2662_v37, %v2612_v62  ;;  %v6140_v1 = vadd.f32 %v2663_v32, %v2613_v7  ;;  %v2715_v6 = vstv %s6095_s3  ;;  %v6144_v8 = vstv %s6105_s18  ;;  %v6172_v7 = vld [vmem:[%s7017_s4 + $0x18] sm:$0xff] }
 0x1ce   :  { %7826 = vst [vmem:[#allocation45_spill] sm:$0xff] %v6115_v26  ;;  %v6147_v4 = vstv %s6107_s19  ;;  %v6155_v51 = vadd.f32 %v6152_v20, %v2697_v53  ;;  %v2699_v60 = vadd.f32 %v6160_v59, %v2697_v53  ;;  %v2700_v62 = vadd.f32 %v6166_v28, %v2697_v53 }
 0x1cf   :  { %7827 = vst [vmem:[#allocation46_spill] sm:$0xff] %v6117_v10  ;;  %v2701_v55 = vadd.f32 %v6172_v7, %v2697_v53  ;;  %v2702_v43 = vadd.f32 %v6178_v49, %v2697_v53  ;;  %v2703_v31 = vadd.f32 %v6184_v30, %v2697_v53  ;;  %v2704_v44 = vadd.f32 %v6190_v50, %v2697_v53 }
 0x1d0   :  { %7828 = vst [vmem:[#allocation47_spill] sm:$0xff] %v6119_v2  ;;  %v2705_v45 = vadd.f32 %v6196_v42, %v2697_v53  ;;  %v2706_v3 = vadd.f32 %v6202_v0, %v2697_v53  ;;  %v2707_v5 = vadd.f32 %v6208_v21, %v2697_v53  ;;  %v2708_v9 = vadd.f32 %v6214_v58, %v2697_v53 }
 0x1d1   :  { %7829 = vst [vmem:[#allocation48_spill] sm:$0xff] %v6121_v13  ;;  %v2709_v27 = vadd.f32 %v6220_v41, %v2697_v53  ;;  %v2710_v14 = vadd.f32 %v6226_v40, %v2697_v53  ;;  %v2711_v19 = vadd.f32 %v6232_v29, %v2697_v53  ;;  %v2712_v16 = vadd.f32 %v6238_v12, %v2697_v53 }
 0x1d2   :  { %7830 = vst [vmem:[#allocation41_spill] sm:$0xff] %v6123_v25  ;;  %v2713_v63 = vadd.f32 %v6244_v24, %v2697_v53  ;;  %v2716_v48 = vmul.f32 %v6152_v20, %v2715_v6  ;;  %v2717_v57 = vmul.f32 %v6160_v59, %v2715_v6  ;;  %v2718_v54 = vmul.f32 %v6166_v28, %v2715_v6 }
 0x1d3   :  { %7831 = vst [vmem:[#allocation49_spill] sm:$0xff] %v6125_v56  ;;  %v2719_v36 = vmul.f32 %v6172_v7, %v2715_v6  ;;  %v2720_v33 = vmul.f32 %v6178_v49, %v2715_v6  ;;  %v2721_v39 = vmul.f32 %v6184_v30, %v2715_v6  ;;  %v2722_v34 = vmul.f32 %v6190_v50, %v2715_v6 }
 0x1d4   :  { %7832 = vst [vmem:[#allocation51_spill] sm:$0xff] %v6127_v47  ;;  %v2723_v38 = vmul.f32 %v6196_v42, %v2715_v6  ;;  %v2724_v23 = vmul.f32 %v6202_v0, %v2715_v6  ;;  %v2725_v52 = vmul.f32 %v6208_v21, %v2715_v6  ;;  %v2726_v37 = vmul.f32 %v6214_v58, %v2715_v6 }
 0x1d5   :  { %7833 = vst [vmem:[#allocation52_spill] sm:$0xff] %v6129_v15  ;;  %v2727_v32 = vmul.f32 %v6220_v41, %v2715_v6  ;;  %v2728_v53 = vmul.f32 %v6226_v40, %v2715_v6  ;;  %v2750_v15 = vrot.slane %v2718_v54, 2  ;;  %v2751_v47 = vrot.slane %v2719_v36, 2 }
 0x1d6   :  { %7834 = vst [vmem:[#allocation53_spill] sm:$0xff] %v6132_v61  ;;  %v2749_v61 = vrot.slane %v2717_v57, 2  ;;  %v2752_v56 = vrot.slane %v2720_v33, 2  ;;  %v2753_v25 = vrot.slane %v2721_v39, 2  ;;  %v2754_v13 = vrot.slane %v2722_v34, 2 }
 0x1d7   :  { %7835 = vst [vmem:[#allocation54_spill] sm:$0xff] %v6134_v11  ;;  %v2748_v11 = vrot.slane %v2716_v48, 2  ;;  %v2755_v2 = vrot.slane %v2723_v38, 2  ;;  %v2756_v10 = vrot.slane %v2724_v23, 2  ;;  %v2757_v26 = vrot.slane %v2725_v52, 2  ;;  %v6397_v38 = vld [vmem:[%s7018_s5 + $0x70] sm:$0xff] }
 0x1d8   :  { %7836 = vst [vmem:[#allocation55_spill] sm:$0xff] %v6136_v18  ;;  %v2731_v18 = vmul.f32 %v6244_v24, %v2715_v6  ;;  %v2758_v17 = vrot.slane %v2726_v37, 2  ;;  %v2759_v46 = vrot.slane %v2727_v32, 2  ;;  %v2760_v35 = vrot.slane %v2728_v53, 2  ;;  %v6404_v52 = vld [vmem:[%s7018_s5 + $0x78] sm:$0xff] }
 0x1d9   :  { %7837 = vst [vmem:[#allocation58_spill] sm:$0xff] %v6138_v22  ;;  %v2730_v22 = vmul.f32 %v6238_v12, %v2715_v6  ;;  %v6268_v48 = vadd.f32 %v2750_v15, %v2700_v62  ;;  %v6270_v57 = vadd.f32 %v2751_v47, %v2701_v55  ;;  %v6272_v54 = vadd.f32 %v2752_v56, %v2702_v43  ;;  %v6334_v62 = vld [vmem:[%s7018_s5 + $0x28] sm:$0xff]  ;;  %v6341_v43 = vld [vmem:[%s7018_s5 + $0x30] sm:$0xff] }
 0x1da   :  { %7838 = vst [vmem:[#allocation59_spill] sm:$0xff] %v6140_v1  ;;  %v2729_v1 = vmul.f32 %v6232_v29, %v2715_v6  ;;  %v6266_v6 = vadd.f32 %v2749_v61, %v2699_v60  ;;  %v6274_v36 = vadd.f32 %v2753_v25, %v2703_v31  ;;  %v6276_v33 = vadd.f32 %v2754_v13, %v2704_v44  ;;  %v6320_v13 = vld [vmem:[%s7018_s5 + $0x18] sm:$0xff] }
 0x1db   :  { %7839 = vst [vmem:[#allocation60_spill] sm:$0xff] %v6160_v59  ;;  %v6278_v39 = vadd.f32 %v2755_v2, %v2705_v45  ;;  %v6286_v61 = vadd.f32 %v2759_v46, %v2709_v27  ;;  %v6288_v15 = vadd.f32 %v2760_v35, %v2710_v14  ;;  %v6299_v2 = vld [vmem:[%s7018_s5] sm:$0xff]  ;;  %v6306_v46 = vld [vmem:[%s7018_s5 + $0x8] sm:$0xff]  ;;  %v2803_v55 = vmul.f32 %v6334_v62, %v6144_v8  ;;  %v6348_v44 = vld [vmem:[%s7018_s5 + $0x38] sm:$0xff] }
 0x1dc   :  { %7840 = vst [vmem:[#allocation61_spill] sm:$0xff] %v6166_v28  ;;  %v2799_v35 = vmul.f32 %v6306_v46, %v6144_v8  ;;  %v2804_v31 = vmul.f32 %v6341_v43, %v6144_v8  ;;  %v2805_v45 = vmul.f32 %v6348_v44, %v6144_v8  ;;  %v6369_v27 = vld [vmem:[%s7018_s5 + $0x50] sm:$0xff]  ;;  %v6376_v14 = vld [vmem:[%s7018_s5 + $0x58] sm:$0xff]  ;;  %v2812_v23 = vmul.f32 %v6397_v38, %v6144_v8 }
 0x1dd   :  { %7841 = vst [vmem:[#allocation62_spill] sm:$0xff] %v6172_v7  ;;  %v2813_v37 = vmul.f32 %v6404_v52, %v6144_v8 }
 0x1de   :  { %7846 = vst [vmem:[#allocation67_spill] sm:$0xff] %v6202_v0  ;;  %v2831_v53 = vrot.slane %v2799_v35, 2 }
 0x1df   :  { %7847 = vst [vmem:[#allocation42_spill] sm:$0xff] %v6208_v21 }
 0x1e0   :  { %7848 = vst [vmem:[#allocation68_spill] sm:$0xff] %v6214_v58 }
 0x1e1   :  { %7849 = vst [vmem:[#allocation69_spill] sm:$0xff] %v6220_v41  ;;  %v2762_v41 = vrot.slane %v2730_v22, 2  ;;  %v2801_v22 = vmul.f32 %v6320_v13, %v6144_v8 }
 0x1e2   :  { %7850 = vst [vmem:[#allocation70_spill] sm:$0xff] %v6226_v40  ;;  %v2761_v40 = vrot.slane %v2729_v1, 2  ;;  %v6280_v1 = vadd.f32 %v2756_v10, %v2706_v3  ;;  %v6355_v3 = vld [vmem:[%s7018_s5 + $0x40] sm:$0xff] }
 0x1e3   :  { %7851 = vst [vmem:[#allocation71_spill] sm:$0xff] %v6232_v29  ;;  %v2763_v29 = vrot.slane %v2731_v18, 2  ;;  %v6282_v18 = vadd.f32 %v2757_v26, %v2707_v5  ;;  %v6292_v56 = vadd.f32 %v2762_v41, %v2712_v16  ;;  %v2798_v26 = vmul.f32 %v6299_v2, %v6144_v8 }
 0x1e4   :  { %7852 = vst [vmem:[#allocation72_spill] sm:$0xff] %v6238_v12  ;;  %v6264_v12 = vadd.f32 %v2748_v11, %v6155_v51  ;;  %v6284_v11 = vadd.f32 %v2758_v17, %v2708_v9  ;;  %v6290_v47 = vadd.f32 %v2761_v40, %v2711_v19  ;;  %v6313_v17 = vld [vmem:[%s7018_s5 + $0x10] sm:$0xff]  ;;  %v6327_v51 = vld [vmem:[%s7018_s5 + $0x20] sm:$0xff]  ;;  %v2806_v5 = vmul.f32 %v6355_v3, %v6144_v8  ;;  %v6362_v9 = vld [vmem:[%s7018_s5 + $0x48] sm:$0xff] }
 0x1e5   :  { %v6294_v25 = vadd.f32 %v2763_v29, %v2713_v63  ;;  %7853 = vst [vmem:[#allocation73_spill] sm:$0xff] %v6299_v2  ;;  %v2800_v10 = vmul.f32 %v6313_v17, %v6144_v8  ;;  %v2802_v60 = vmul.f32 %v6327_v51, %v6144_v8  ;;  %v2807_v41 = vmul.f32 %v6362_v9, %v6144_v8  ;;  %v6383_v19 = vld [vmem:[%s7018_s5 + $0x60] sm:$0xff]  ;;  %v6390_v63 = vld [vmem:[%s7018_s5 + $0x68] sm:$0xff] }
 0x1e6   :  { %7854 = vst [vmem:[#allocation74_spill] sm:$0xff] %v6306_v46  ;;  %v2808_v40 = vmul.f32 %v6369_v27, %v6144_v8  ;;  %v2809_v29 = vmul.f32 %v6376_v14, %v6144_v8  ;;  %v2810_v16 = vmul.f32 %v6383_v19, %v6144_v8  ;;  %v2811_v34 = vmul.f32 %v6390_v63, %v6144_v8 }
 0x1e7   :  { %7855 = vst [vmem:[#allocation75_spill] sm:$0xff] %v6313_v17  ;;  %v2830_v32 = vrot.slane %v2798_v26, 2  ;;  %v2844_v17 = vrot.slane %v2812_v23, 2  ;;  %v2845_v46 = vrot.slane %v2813_v37, 2  ;;  %v6412_v8 = vadd.f32 %v2831_v53, %v6266_v6  ;;  %v6566_v23 = vld [vmem:[%s7019_s6 + $0x78] sm:$0xff] }
 0x1e8   :  { %7856 = vst [vmem:[#allocation76_spill] sm:$0xff] %v6320_v13  ;;  %v2843_v13 = vrot.slane %v2811_v34, 2  ;;  %v6559_v34 = vld [vmem:[%s7019_s6 + $0x70] sm:$0xff]  ;;  %v2895_v37 = vmul.f32 %v6566_v23, %v6147_v4 }
 0x1e9   :  { %7857 = vst [vmem:[#allocation77_spill] sm:$0xff] %v6327_v51  ;;  %v2842_v51 = vrot.slane %v2810_v16, 2  ;;  %v6409_v2 = vadd.f32 %v2830_v32, %v6264_v12  ;;  %v6552_v16 = vld [vmem:[%s7019_s6 + $0x68] sm:$0xff] }
 0x1ea   :  { %7858 = vst [vmem:[#allocation78_spill] sm:$0xff] %v6334_v62  ;;  %v2840_v62 = vrot.slane %v2808_v40, 2  ;;  %v6538_v40 = vld [vmem:[%s7019_s6 + $0x58] sm:$0xff] }
 0x1eb   :  { %7859 = vst [vmem:[#allocation79_spill] sm:$0xff] %v6341_v43  ;;  %v2839_v43 = vrot.slane %v2807_v41, 2  ;;  %v6531_v41 = vld [vmem:[%s7019_s6 + $0x50] sm:$0xff] }
 0x1ec   :  { %7860 = vst [vmem:[#allocation80_spill] sm:$0xff] %v6348_v44  ;;  %v2838_v44 = vrot.slane %v2806_v5, 2  ;;  %v6524_v5 = vld [vmem:[%s7019_s6 + $0x48] sm:$0xff] }
 0x1ed   :  { %7861 = vst [vmem:[#allocation81_spill] sm:$0xff] %v6355_v3  ;;  %v2837_v3 = vrot.slane %v2805_v45, 2  ;;  %v6517_v45 = vld [vmem:[%s7019_s6 + $0x40] sm:$0xff] }
 0x1ee   :  { %7862 = vst [vmem:[#allocation82_spill] sm:$0xff] %v6362_v9  ;;  %v2836_v9 = vrot.slane %v2804_v31, 2  ;;  %v6433_v6 = vadd.f32 %v2838_v44, %v6280_v1  ;;  %v6454_v1 = vadd.f32 %v2845_v46, %v6294_v25  ;;  %v6480_v25 = vld [vmem:[%s7019_s6 + $0x18] sm:$0xff] }
 0x1ef   :  { %7863 = vst [vmem:[#allocation84_spill] sm:$0xff] %v6369_v27  ;;  %v2835_v27 = vrot.slane %v2803_v55, 2  ;;  %v6430_v12 = vadd.f32 %v2837_v3, %v6278_v39  ;;  %v6451_v39 = vadd.f32 %v2844_v17, %v6292_v56  ;;  %v2883_v46 = vmul.f32 %v6480_v25, %v6147_v4  ;;  %v6487_v17 = vld [vmem:[%s7019_s6 + $0x20] sm:$0xff]  ;;  %v6501_v55 = vld [vmem:[%s7019_s6 + $0x30] sm:$0xff]  ;;  %v6508_v31 = vld [vmem:[%s7019_s6 + $0x38] sm:$0xff] }
 0x1f0   :  { %7864 = vst [vmem:[#allocation85_spill] sm:$0xff] %v6376_v14  ;;  %v2834_v14 = vrot.slane %v2802_v60, 2  ;;  %v6427_v60 = vadd.f32 %v2836_v9, %v6276_v33  ;;  %v6448_v33 = vadd.f32 %v2843_v13, %v6290_v47  ;;  %v6473_v47 = vld [vmem:[%s7019_s6 + $0x10] sm:$0xff]  ;;  %v2884_v13 = vmul.f32 %v6487_v17, %v6147_v4 }
 0x1f1   :  { %7865 = vst [vmem:[#allocation86_spill] sm:$0xff] %v6383_v19  ;;  %v2832_v19 = vrot.slane %v2800_v10, 2  ;;  %v2882_v56 = vmul.f32 %v6473_v47, %v6147_v4  ;;  %v2887_v44 = vmul.f32 %v6508_v31, %v6147_v4  ;;  %v2888_v3 = vmul.f32 %v6517_v45, %v6147_v4 }
 0x1f2   :  { %7866 = vst [vmem:[#allocation87_spill] sm:$0xff] %v6390_v63  ;;  %v2833_v63 = vrot.slane %v2801_v22, 2  ;;  %v6421_v10 = vadd.f32 %v2834_v14, %v6272_v54  ;;  %v6424_v22 = vadd.f32 %v2835_v27, %v6274_v36  ;;  %v6445_v36 = vadd.f32 %v2842_v51, %v6288_v15  ;;  %v6494_v51 = vld [vmem:[%s7019_s6 + $0x28] sm:$0xff] }
 0x1f3   :  { %7867 = vst [vmem:[#allocation88_spill] sm:$0xff] %v6397_v38  ;;  %v2841_v38 = vrot.slane %v2809_v29, 2  ;;  %v6415_v26 = vadd.f32 %v2832_v19, %v6268_v48  ;;  %v6436_v48 = vadd.f32 %v2839_v43, %v6282_v18  ;;  %v6459_v18 = vld [vmem:[%s7019_s6] sm:$0xff]  ;;  %v2886_v43 = vmul.f32 %v6501_v55, %v6147_v4 }
 0x1f4   :  { %v6418_v35 = vadd.f32 %v2833_v63, %v6270_v57  ;;  %v6439_v57 = vadd.f32 %v2840_v62, %v6284_v11  ;;  %v2880_v11 = vmul.f32 %v6459_v18, %v6147_v4  ;;  %7868 = vst [vmem:[#allocation89_spill] sm:$0xff] %v6480_v25  ;;  %v2885_v62 = vmul.f32 %v6494_v51, %v6147_v4  ;;  %v6545_v29 = vld [vmem:[%s7019_s6 + $0x60] sm:$0xff] }
 0x1f5   :  { %v6442_v54 = vadd.f32 %v2841_v38, %v6286_v61  ;;  %v6466_v61 = vld [vmem:[%s7019_s6 + $0x8] sm:$0xff]  ;;  %7869 = vst [vmem:[#allocation90_spill] sm:$0xff] %v6487_v17  ;;  %v2889_v9 = vmul.f32 %v6524_v5, %v6147_v4  ;;  %v2890_v27 = vmul.f32 %v6531_v41, %v6147_v4  ;;  %v2891_v14 = vmul.f32 %v6538_v40, %v6147_v4  ;;  %s6663_s6 = sld [smem:[#allocation2 + $0xe]] }
 0x1f6   :  { %v2881_v15 = vmul.f32 %v6466_v61, %v6147_v4  ;;  %7870 = vst [vmem:[#allocation91_spill] sm:$0xff] %v6494_v51  ;;  %v2892_v19 = vmul.f32 %v6545_v29, %v6147_v4  ;;  %v2893_v63 = vmul.f32 %v6552_v16, %v6147_v4  ;;  %v2894_v38 = vmul.f32 %v6559_v34, %v6147_v4 }
 0x1f7   :  { %7871 = vst [vmem:[#allocation92_spill] sm:$0xff] %v6501_v55  ;;  %v2912_v32 = vrot.slane %v2880_v11, 2  ;;  %v2922_v55 = vrot.slane %v2890_v27, 2  ;;  %v2923_v51 = vrot.slane %v2891_v14, 2  ;;  %v7884_v14 = vld [vmem:[#allocation72_spill] sm:$0xff] }
 0x1f8   :  { %7872 = vst [vmem:[#allocation93_spill] sm:$0xff] %v6508_v31  ;;  %v2913_v53 = vrot.slane %v2881_v15, 2  ;;  %v2921_v31 = vrot.slane %v2889_v9, 2  ;;  %v2924_v17 = vrot.slane %v2892_v19, 2  ;;  %v2925_v25 = vrot.slane %v2893_v63, 2 }
 0x1f9   :  { %7873 = vst [vmem:[#allocation94_spill] sm:$0xff] %v6517_v45  ;;  %v2920_v45 = vrot.slane %v2888_v3, 2  ;;  %v2926_v4 = vrot.slane %v2894_v38, 2  ;;  %v2944_v11 = vadd.f32 %v2912_v32, %v6409_v2 }
 0x1fa   :  { %7874 = vst [vmem:[#allocation95_spill] sm:$0xff] %v6524_v5  ;;  %v2918_v5 = vrot.slane %v2886_v43, 2  ;;  %v2945_v15 = vadd.f32 %v2913_v53, %v6412_v8  ;;  %v2953_v2 = vadd.f32 %v2921_v31, %v6436_v48  ;;  %v2954_v8 = vadd.f32 %v2922_v55, %v6439_v57  ;;  %v7882_v31 = vld [vmem:[#allocation70_spill] sm:$0xff] }
 0x1fb   :  { %7875 = vst [vmem:[#allocation96_spill] sm:$0xff] %v6531_v41  ;;  %v2917_v41 = vrot.slane %v2885_v62, 2  ;;  %v2952_v9 = vadd.f32 %v2920_v45, %v6433_v6  ;;  %v2957_v27 = vadd.f32 %v2925_v25, %v6448_v33 }
 0x1fc   :  { %7876 = vst [vmem:[#allocation97_spill] sm:$0xff] %v6538_v40  ;;  %v2916_v40 = vrot.slane %v2884_v13, 2  ;;  %v2950_v43 = vadd.f32 %v2918_v5, %v6427_v60  ;;  %v6593_v5 = vstv %s6570_s8 }
 0x1fd   :  { %7877 = vst [vmem:[#allocation98_spill] sm:$0xff] %v6545_v29  ;;  %v2915_v29 = vrot.slane %v2883_v46, 2  ;;  %v2949_v62 = vadd.f32 %v2917_v41, %v6424_v22  ;;  %v7883_v41 = vld [vmem:[#allocation71_spill] sm:$0xff] }
 0x1fe   :  { %7878 = vst [vmem:[#allocation99_spill] sm:$0xff] %v6552_v16  ;;  %v2914_v16 = vrot.slane %v2882_v56, 2  ;;  %v2948_v13 = vadd.f32 %v2916_v40, %v6421_v10  ;;  %v2958_v10 = vadd.f32 %v2926_v4, %v6451_v39 }
 0x1ff   :  { %7879 = vst [vmem:[#allocation100_spill] sm:$0xff] %v6559_v34  ;;  %v2919_v34 = vrot.slane %v2887_v44, 2  ;;  %v2947_v46 = vadd.f32 %v2915_v29, %v6418_v35  ;;  %v2961_v44 = vstv %s6512_s17  ;;  %v2956_v35 = vadd.f32 %v2924_v17, %v6445_v36 }
 0x200   :  { %7880 = vst [vmem:[#allocation101_spill] sm:$0xff] %v6566_v23  ;;  %v2927_v23 = vrot.slane %v2895_v37, 2  ;;  %v2946_v56 = vadd.f32 %v2914_v16, %v6415_v26  ;;  %v2955_v26 = vadd.f32 %v2923_v51, %v6442_v54  ;;  %v2962_v60 = vmul.f32 %v6152_v20, %v2961_v44  ;;  %v7881_v51 = vld [vmem:[#allocation69_spill] sm:$0xff] }
 0x201   :  { %v2951_v3 = vadd.f32 %v2919_v34, %v6430_v12  ;;  %v6596_v12 = vstv %s6572_s9  ;;  %v2963_v6 = vmul.f32 %v6160_v59, %v2961_v44  ;;  %v2964_v48 = vmul.f32 %v6166_v28, %v2961_v44 }
 0x202   :  { %v2959_v22 = vadd.f32 %v2927_v23, %v6454_v1  ;;  %v2965_v57 = vmul.f32 %v6172_v7, %v2961_v44  ;;  %v2966_v54 = vmul.f32 %v6178_v49, %v2961_v44  ;;  %v2967_v36 = vmul.f32 %v6184_v30, %v2961_v44 }
 0x203   :  { %v2968_v33 = vmul.f32 %v6190_v50, %v2961_v44  ;;  %v2969_v39 = vmul.f32 %v6196_v42, %v2961_v44  ;;  %v2970_v1 = vmul.f32 %v6202_v0, %v2961_v44  ;;  %v2971_v25 = vmul.f32 %v6208_v21, %v2961_v44 }
 0x204   :  { %v2972_v17 = vmul.f32 %v6214_v58, %v2961_v44  ;;  %v2973_v55 = vmul.f32 %v7881_v51, %v2961_v44  ;;  %v2974_v45 = vmul.f32 %v7882_v31, %v2961_v44  ;;  %v2975_v40 = vmul.f32 %v7883_v41, %v2961_v44 }
 0x205   :  { %v2976_v29 = vmul.f32 %v7884_v14, %v2961_v44  ;;  %v2977_v19 = vmul.f32 %v6244_v24, %v2961_v44  ;;  %v2994_v16 = vrot.slane %v2962_v60, 4  ;;  %v2995_v63 = vrot.slane %v2963_v6, 4 }
 0x206   :  { %v2996_v34 = vrot.slane %v2964_v48, 4  ;;  %v2997_v38 = vrot.slane %v2965_v57, 4  ;;  %v2998_v23 = vrot.slane %v2966_v54, 4  ;;  %v2999_v37 = vrot.slane %v2967_v36, 4 }
 0x207   :  { %v3000_v32 = vrot.slane %v2968_v33, 4  ;;  %v3001_v53 = vrot.slane %v2969_v39, 4  ;;  %v3002_v4 = vrot.slane %v2970_v1, 4  ;;  %v3003_v58 = vrot.slane %v2971_v25, 4 }
 0x208   :  { %v3004_v21 = vrot.slane %v2972_v17, 4  ;;  %v3005_v51 = vrot.slane %v2973_v55, 4  ;;  %v3006_v0 = vrot.slane %v2974_v45, 4  ;;  %v3007_v31 = vrot.slane %v2975_v40, 4  ;;  %v7885_v45 = vld [vmem:[#allocation73_spill] sm:$0xff] }
 0x209   :  { %v3008_v42 = vrot.slane %v2976_v29, 4  ;;  %v3009_v41 = vrot.slane %v2977_v19, 4  ;;  %v3026_v50 = vadd.f32 %v2994_v16, %v2944_v11  ;;  %v3027_v14 = vadd.f32 %v2995_v63, %v2945_v15  ;;  %v7886_v11 = vld [vmem:[#allocation74_spill] sm:$0xff]  ;;  %v7898_v19 = vld [vmem:[#allocation87_spill] sm:$0xff]  ;;  %v7899_v63 = vld [vmem:[#allocation88_spill] sm:$0xff] }
 0x20a   :  { %v3028_v30 = vadd.f32 %v2996_v34, %v2946_v56  ;;  %v3029_v44 = vadd.f32 %v2997_v38, %v2947_v46  ;;  %v3030_v60 = vadd.f32 %v2998_v23, %v2948_v13  ;;  %v3031_v6 = vadd.f32 %v2999_v37, %v2949_v62  ;;  %v7887_v56 = vld [vmem:[#allocation75_spill] sm:$0xff]  ;;  %v7888_v13 = vld [vmem:[#allocation76_spill] sm:$0xff] }
 0x20b   :  { %v3032_v48 = vadd.f32 %v3000_v32, %v2950_v43  ;;  %v3033_v57 = vadd.f32 %v3001_v53, %v2951_v3  ;;  %v3034_v54 = vadd.f32 %v3002_v4, %v2952_v9  ;;  %v3035_v36 = vadd.f32 %v3003_v58, %v2953_v2  ;;  %v7889_v58 = vld [vmem:[#allocation77_spill] sm:$0xff]  ;;  %v7892_v9 = vld [vmem:[#allocation80_spill] sm:$0xff] }
 0x20c   :  { %v3036_v33 = vadd.f32 %v3004_v21, %v2954_v8  ;;  %v3037_v39 = vadd.f32 %v3005_v51, %v2955_v26  ;;  %v3038_v1 = vadd.f32 %v3006_v0, %v2956_v35  ;;  %v3039_v25 = vadd.f32 %v3007_v31, %v2957_v27  ;;  %v7890_v0 = vld [vmem:[#allocation78_spill] sm:$0xff]  ;;  %v7893_v8 = vld [vmem:[#allocation81_spill] sm:$0xff] }
 0x20d   :  { %v3040_v17 = vadd.f32 %v3008_v42, %v2958_v10  ;;  %v3041_v55 = vadd.f32 %v3009_v41, %v2959_v22  ;;  %v3044_v40 = vmul.f32 %v7885_v45, %v6593_v5  ;;  %v3045_v15 = vmul.f32 %v7886_v11, %v6593_v5  ;;  %v7891_v42 = vld [vmem:[#allocation79_spill] sm:$0xff]  ;;  %v7894_v35 = vld [vmem:[#allocation82_spill] sm:$0xff]  ;;  %v7895_v10 = vld [vmem:[#allocation84_spill] sm:$0xff] }
 0x20e   :  { %v3046_v46 = vmul.f32 %v7887_v56, %v6593_v5  ;;  %v3047_v62 = vmul.f32 %v7888_v13, %v6593_v5  ;;  %v3048_v21 = vmul.f32 %v7889_v58, %v6593_v5  ;;  %v3049_v43 = vmul.f32 %v7890_v0, %v6593_v5  ;;  %v7896_v51 = vld [vmem:[#allocation85_spill] sm:$0xff]  ;;  %v7897_v41 = vld [vmem:[#allocation86_spill] sm:$0xff] }
 0x20f   :  { %v3050_v3 = vmul.f32 %v7891_v42, %v6593_v5  ;;  %v3051_v2 = vmul.f32 %v7892_v9, %v6593_v5  ;;  %v3052_v26 = vmul.f32 %v7893_v8, %v6593_v5  ;;  %v3053_v27 = vmul.f32 %v7894_v35, %v6593_v5 }
 0x210   :  { %v3054_v22 = vmul.f32 %v7895_v10, %v6593_v5  ;;  %v3055_v31 = vmul.f32 %v7896_v51, %v6593_v5  ;;  %v3056_v29 = vmul.f32 %v7897_v41, %v6593_v5  ;;  %v3057_v16 = vmul.f32 %v7898_v19, %v6593_v5 }
 0x211   :  { %v3058_v34 = vmul.f32 %v7899_v63, %v6593_v5  ;;  %v3059_v38 = vmul.f32 %v6404_v52, %v6593_v5  ;;  %v3076_v23 = vrot.slane %v3044_v40, 4  ;;  %v3077_v37 = vrot.slane %v3045_v15, 4 }
 0x212   :  { %v3078_v32 = vrot.slane %v3046_v46, 4  ;;  %v3079_v53 = vrot.slane %v3047_v62, 4  ;;  %v3080_v4 = vrot.slane %v3048_v21, 4  ;;  %v3081_v10 = vrot.slane %v3049_v43, 4 }
 0x213   :  { %v3082_v35 = vrot.slane %v3050_v3, 4  ;;  %v3083_v51 = vrot.slane %v3051_v2, 4  ;;  %v3084_v8 = vrot.slane %v3052_v26, 4  ;;  %v3085_v9 = vrot.slane %v3053_v27, 4 }
 0x214   :  { %v3086_v41 = vrot.slane %v3054_v22, 4  ;;  %v3087_v42 = vrot.slane %v3055_v31, 4  ;;  %v3088_v0 = vrot.slane %v3056_v29, 4  ;;  %v3089_v19 = vrot.slane %v3057_v16, 4 }
 0x215   :  { %v3090_v58 = vrot.slane %v3058_v34, 4  ;;  %v3091_v13 = vrot.slane %v3059_v38, 4  ;;  %v3108_v63 = vadd.f32 %v3076_v23, %v3026_v50  ;;  %v3109_v56 = vadd.f32 %v3077_v37, %v3027_v14  ;;  %v7900_v14 = vld [vmem:[#allocation89_spill] sm:$0xff] }
 0x216   :  { %v3110_v11 = vadd.f32 %v3078_v32, %v3028_v30  ;;  %v3111_v5 = vadd.f32 %v3079_v53, %v3029_v44  ;;  %v3112_v40 = vadd.f32 %v3080_v4, %v3030_v60  ;;  %v3113_v15 = vadd.f32 %v3081_v10, %v3031_v6  ;;  %v7901_v60 = vld [vmem:[#allocation90_spill] sm:$0xff] }
 0x217   :  { %v3114_v46 = vadd.f32 %v3082_v35, %v3032_v48  ;;  %v3115_v62 = vadd.f32 %v3083_v51, %v3033_v57  ;;  %v3116_v21 = vadd.f32 %v3084_v8, %v3034_v54  ;;  %v3117_v43 = vadd.f32 %v3085_v9, %v3035_v36  ;;  %v7902_v48 = vld [vmem:[#allocation91_spill] sm:$0xff]  ;;  %v7903_v54 = vld [vmem:[#allocation92_spill] sm:$0xff]  ;;  %v7909_v9 = vld [vmem:[#allocation98_spill] sm:$0xff] }
 0x218   :  { %v3118_v3 = vadd.f32 %v3086_v41, %v3036_v33  ;;  %v3119_v2 = vadd.f32 %v3087_v42, %v3037_v39  ;;  %v3120_v26 = vadd.f32 %v3088_v0, %v3038_v1  ;;  %v3121_v27 = vadd.f32 %v3089_v19, %v3039_v25  ;;  %v7904_v33 = vld [vmem:[#allocation93_spill] sm:$0xff]  ;;  %v7905_v1 = vld [vmem:[#allocation94_spill] sm:$0xff]  ;;  %v7910_v35 = vld [vmem:[#allocation99_spill] sm:$0xff] }
 0x219   :  { %v3122_v22 = vadd.f32 %v3090_v58, %v3040_v17  ;;  %v3123_v31 = vadd.f32 %v3091_v13, %v3041_v55  ;;  %v3126_v29 = vmul.f32 %v6459_v18, %v6596_v12  ;;  %v3127_v50 = vmul.f32 %v6466_v61, %v6596_v12  ;;  %v7906_v17 = vld [vmem:[#allocation95_spill] sm:$0xff]  ;;  %v7907_v13 = vld [vmem:[#allocation96_spill] sm:$0xff]  ;;  %v7908_v0 = vld [vmem:[#allocation97_spill] sm:$0xff] }
 0x21a   :  { %v3128_v30 = vmul.f32 %v6473_v47, %v6596_v12  ;;  %v3129_v44 = vmul.f32 %v7900_v14, %v6596_v12  ;;  %v3130_v6 = vmul.f32 %v7901_v60, %v6596_v12  ;;  %v3131_v57 = vmul.f32 %v7902_v48, %v6596_v12  ;;  %v7911_v51 = vld [vmem:[#allocation100_spill] sm:$0xff]  ;;  %v7912_v19 = vld [vmem:[#allocation101_spill] sm:$0xff] }
 0x21b   :  { %v3132_v36 = vmul.f32 %v7903_v54, %v6596_v12  ;;  %v3133_v39 = vmul.f32 %v7904_v33, %v6596_v12  ;;  %v3134_v25 = vmul.f32 %v7905_v1, %v6596_v12  ;;  %v3135_v55 = vmul.f32 %v7906_v17, %v6596_v12 }
 0x21c   :  { %v3136_v58 = vmul.f32 %v7907_v13, %v6596_v12  ;;  %v3137_v42 = vmul.f32 %v7908_v0, %v6596_v12  ;;  %v3138_v8 = vmul.f32 %v7909_v9, %v6596_v12  ;;  %v3139_v10 = vmul.f32 %v7910_v35, %v6596_v12 }
 0x21d   :  { %v3140_v41 = vmul.f32 %v7911_v51, %v6596_v12  ;;  %v3141_v16 = vmul.f32 %v7912_v19, %v6596_v12  ;;  %v3158_v34 = vrot.slane %v3126_v29, 4  ;;  %v3159_v38 = vrot.slane %v3127_v50, 4 }
 0x21e   :  { %v3160_v23 = vrot.slane %v3128_v30, 4  ;;  %v3161_v37 = vrot.slane %v3129_v44, 4  ;;  %v3162_v32 = vrot.slane %v3130_v6, 4  ;;  %v3163_v53 = vrot.slane %v3131_v57, 4 }
 0x21f   :  { %v3164_v4 = vrot.slane %v3132_v36, 4  ;;  %v3165_v9 = vrot.slane %v3133_v39, 4  ;;  %v3166_v0 = vrot.slane %v3134_v25, 4  ;;  %v3167_v35 = vrot.slane %v3135_v55, 4 }
 0x220   :  { %v3168_v13 = vrot.slane %v3136_v58, 4  ;;  %v3169_v51 = vrot.slane %v3137_v42, 4  ;;  %v3170_v17 = vrot.slane %v3138_v8, 4  ;;  %v3171_v1 = vrot.slane %v3139_v10, 4 }
 0x221   :  { %v3172_v12 = vrot.slane %v3140_v41, 4  ;;  %v3173_v29 = vrot.slane %v3141_v16, 4  ;;  %v3190_v19 = vadd.f32 %v3158_v34, %v3108_v63  ;;  %v3191_v33 = vadd.f32 %v3159_v38, %v3109_v56  ;;  %v7921_v16 = vld [vmem:[#allocation71_spill] sm:$0xff]  ;;  %v7922_v38 = vld [vmem:[#allocation72_spill] sm:$0xff] }
 0x222   :  { %v3192_v50 = vadd.f32 %v3160_v23, %v3110_v11  ;;  %v3193_v30 = vadd.f32 %v3161_v37, %v3111_v5  ;;  %v3194_v44 = vadd.f32 %v3162_v32, %v3112_v40  ;;  %v3195_v6 = vadd.f32 %v3163_v53, %v3113_v15 }
 0x223   :  { %v3196_v57 = vadd.f32 %v3164_v4, %v3114_v46  ;;  %v3197_v36 = vadd.f32 %v3165_v9, %v3115_v62  ;;  %v3207_v39 = vstv %s6663_s6  ;;  %v3198_v25 = vadd.f32 %v3166_v0, %v3116_v21  ;;  %v7913_v62 = vld [vmem:[#allocation64_spill] sm:$0xff]  ;;  %v7919_v0 = vld [vmem:[#allocation69_spill] sm:$0xff] }
 0x224   :  { %v3199_v54 = vadd.f32 %v3167_v35, %v3117_v43  ;;  %v3200_v55 = vadd.f32 %v3168_v13, %v3118_v3  ;;  %v3201_v58 = vadd.f32 %v3169_v51, %v3119_v2  ;;  %v3202_v42 = vadd.f32 %v3170_v17, %v3120_v26  ;;  %v7914_v43 = vld [vmem:[#allocation65_spill] sm:$0xff]  ;;  %v7915_v2 = vld [vmem:[#allocation66_spill] sm:$0xff]  ;;  %v7918_v17 = vld [vmem:[#allocation68_spill] sm:$0xff] }
 0x225   :  { %v3203_v8 = vadd.f32 %v3171_v1, %v3121_v27  ;;  %v3204_v10 = vadd.f32 %v3172_v12, %v3122_v22  ;;  %v3205_v41 = vadd.f32 %v3173_v29, %v3123_v31  ;;  %v3208_v63 = vmul.f32 %v6152_v20, %v3207_v39  ;;  %v7916_v27 = vld [vmem:[#allocation67_spill] sm:$0xff]  ;;  %v7917_v31 = vld [vmem:[#allocation42_spill] sm:$0xff] }
 0x226   :  { %v3209_v11 = vmul.f32 %v6160_v59, %v3207_v39  ;;  %v6687_v56 = vstv %s6679_s10  ;;  %v6690_v5 = vstv %s6681_s11  ;;  %v3210_v40 = vmul.f32 %v6166_v28, %v3207_v39  ;;  %v7920_v35 = vld [vmem:[#allocation70_spill] sm:$0xff] }
 0x227   :  { %v3211_v15 = vmul.f32 %v6172_v7, %v3207_v39  ;;  %v3212_v46 = vmul.f32 %v6178_v49, %v3207_v39  ;;  %v3213_v21 = vmul.f32 %v7913_v62, %v3207_v39  ;;  %v3214_v3 = vmul.f32 %v7914_v43, %v3207_v39 }
 0x228   :  { %v3215_v26 = vmul.f32 %v7915_v2, %v3207_v39  ;;  %v3216_v22 = vmul.f32 %v7916_v27, %v3207_v39  ;;  %v3217_v1 = vmul.f32 %v7917_v31, %v3207_v39  ;;  %v3218_v13 = vmul.f32 %v7918_v17, %v3207_v39 }
 0x229   :  { %v3219_v9 = vmul.f32 %v7919_v0, %v3207_v39  ;;  %v3220_v51 = vmul.f32 %v7920_v35, %v3207_v39  ;;  %v3221_v34 = vmul.f32 %v7921_v16, %v3207_v39  ;;  %v3222_v23 = vmul.f32 %v7922_v38, %v3207_v39 }
 0x22a   :  { %v3223_v37 = vmul.f32 %v6244_v24, %v3207_v39  ;;  %v3240_v32 = vrot.slane %v3208_v63, 6  ;;  %v3241_v53 = vrot.slane %v3209_v11, 6  ;;  %v3242_v4 = vrot.slane %v3210_v40, 6 }
 0x22b   :  { %v3243_v12 = vrot.slane %v3211_v15, 6  ;;  %v3244_v29 = vrot.slane %v3212_v46, 6  ;;  %v3245_v27 = vrot.slane %v3213_v21, 6  ;;  %v3246_v2 = vrot.slane %v3214_v3, 6 }
 0x22c   :  { %v3247_v31 = vrot.slane %v3215_v26, 6  ;;  %v3248_v43 = vrot.slane %v3216_v22, 6  ;;  %v3249_v17 = vrot.slane %v3217_v1, 6  ;;  %v3250_v62 = vrot.slane %v3218_v13, 6 }
 0x22d   :  { %v3251_v0 = vrot.slane %v3219_v9, 6  ;;  %v3252_v49 = vrot.slane %v3220_v51, 6  ;;  %v3253_v35 = vrot.slane %v3221_v34, 6  ;;  %v3254_v7 = vrot.slane %v3222_v23, 6 }
 0x22e   :  { %v3255_v16 = vrot.slane %v3223_v37, 6  ;;  %v3272_v28 = vadd.f32 %v3240_v32, %v3190_v19  ;;  %v3273_v38 = vadd.f32 %v3241_v53, %v3191_v33  ;;  %v3274_v59 = vadd.f32 %v3242_v4, %v3192_v50  ;;  %v7923_v19 = vld [vmem:[#allocation74_spill] sm:$0xff]  ;;  %v7924_v50 = vld [vmem:[#allocation75_spill] sm:$0xff] }
 0x22f   :  { %v3275_v39 = vadd.f32 %v3243_v12, %v3193_v30  ;;  %v3276_v63 = vadd.f32 %v3244_v29, %v3194_v44  ;;  %v3277_v11 = vadd.f32 %v3245_v27, %v3195_v6  ;;  %v3278_v40 = vadd.f32 %v3246_v2, %v3196_v57  ;;  %v7925_v44 = vld [vmem:[#allocation76_spill] sm:$0xff]  ;;  %v7933_v2 = vld [vmem:[#allocation85_spill] sm:$0xff] }
 0x230   :  { %v3279_v15 = vadd.f32 %v3247_v31, %v3197_v36  ;;  %v3280_v46 = vadd.f32 %v3248_v43, %v3198_v25  ;;  %v3281_v21 = vadd.f32 %v3249_v17, %v3199_v54  ;;  %v3282_v3 = vadd.f32 %v3250_v62, %v3200_v55  ;;  %v7926_v54 = vld [vmem:[#allocation77_spill] sm:$0xff]  ;;  %v7929_v55 = vld [vmem:[#allocation80_spill] sm:$0xff]  ;;  %v7934_v31 = vld [vmem:[#allocation86_spill] sm:$0xff] }
 0x231   :  { %v3283_v26 = vadd.f32 %v3251_v0, %v3201_v58  ;;  %v3284_v22 = vadd.f32 %v3252_v49, %v3202_v42  ;;  %v3285_v1 = vadd.f32 %v3253_v35, %v3203_v8  ;;  %v3286_v13 = vadd.f32 %v3254_v7, %v3204_v10  ;;  %v7927_v49 = vld [vmem:[#allocation78_spill] sm:$0xff]  ;;  %v7928_v7 = vld [vmem:[#allocation79_spill] sm:$0xff]  ;;  %v7930_v42 = vld [vmem:[#allocation81_spill] sm:$0xff] }
 0x232   :  { %v3287_v9 = vadd.f32 %v3255_v16, %v3205_v41  ;;  %v3290_v51 = vmul.f32 %v7885_v45, %v6687_v56  ;;  %v3291_v33 = vmul.f32 %v7923_v19, %v6687_v56  ;;  %v3292_v30 = vmul.f32 %v7924_v50, %v6687_v56  ;;  %v7931_v10 = vld [vmem:[#allocation82_spill] sm:$0xff]  ;;  %v7932_v62 = vld [vmem:[#allocation84_spill] sm:$0xff]  ;;  %v7935_v0 = vld [vmem:[#allocation87_spill] sm:$0xff] }
 0x233   :  { %v3293_v6 = vmul.f32 %v7925_v44, %v6687_v56  ;;  %v3294_v57 = vmul.f32 %v7926_v54, %v6687_v56  ;;  %v3295_v36 = vmul.f32 %v7927_v49, %v6687_v56  ;;  %v3296_v25 = vmul.f32 %v7928_v7, %v6687_v56  ;;  %v7936_v16 = vld [vmem:[#allocation88_spill] sm:$0xff] }
 0x234   :  { %v3297_v58 = vmul.f32 %v7929_v55, %v6687_v56  ;;  %v3298_v8 = vmul.f32 %v7930_v42, %v6687_v56  ;;  %v3299_v41 = vmul.f32 %v7931_v10, %v6687_v56  ;;  %v3300_v43 = vmul.f32 %v7932_v62, %v6687_v56 }
 0x235   :  { %v3301_v27 = vmul.f32 %v7933_v2, %v6687_v56  ;;  %v3302_v17 = vmul.f32 %v7934_v31, %v6687_v56  ;;  %v3303_v35 = vmul.f32 %v7935_v0, %v6687_v56  ;;  %v3304_v34 = vmul.f32 %v7936_v16, %v6687_v56 }
 0x236   :  { %v3305_v23 = vmul.f32 %v6404_v52, %v6687_v56  ;;  %v3322_v37 = vrot.slane %v3290_v51, 6  ;;  %v3323_v32 = vrot.slane %v3291_v33, 6  ;;  %v3324_v53 = vrot.slane %v3292_v30, 6 }
 0x237   :  { %v3325_v4 = vrot.slane %v3293_v6, 6  ;;  %v3326_v12 = vrot.slane %v3294_v57, 6  ;;  %v3327_v29 = vrot.slane %v3295_v36, 6  ;;  %v3328_v62 = vrot.slane %v3296_v25, 6 }
 0x238   :  { %v3329_v2 = vrot.slane %v3297_v58, 6  ;;  %v3330_v10 = vrot.slane %v3298_v8, 6  ;;  %v3331_v42 = vrot.slane %v3299_v41, 6  ;;  %v3332_v31 = vrot.slane %v3300_v43, 6 }
 0x239   :  { %v3333_v55 = vrot.slane %v3301_v27, 6  ;;  %v3334_v7 = vrot.slane %v3302_v17, 6  ;;  %v3335_v0 = vrot.slane %v3303_v35, 6  ;;  %v3336_v49 = vrot.slane %v3304_v34, 6 }
 0x23a   :  { %v3337_v54 = vrot.slane %v3305_v23, 6  ;;  %v3354_v16 = vadd.f32 %v3322_v37, %v3272_v28  ;;  %v3355_v44 = vadd.f32 %v3323_v32, %v3273_v38  ;;  %v3356_v50 = vadd.f32 %v3324_v53, %v3274_v59 }
 0x23b   :  { %v3357_v56 = vadd.f32 %v3325_v4, %v3275_v39  ;;  %v3358_v51 = vadd.f32 %v3326_v12, %v3276_v63  ;;  %v3359_v33 = vadd.f32 %v3327_v29, %v3277_v11  ;;  %v3360_v30 = vadd.f32 %v3328_v62, %v3278_v40  ;;  %v7937_v11 = vld [vmem:[#allocation92_spill] sm:$0xff] }
 0x23c   :  { %v3361_v6 = vadd.f32 %v3329_v2, %v3279_v15  ;;  %v3362_v57 = vadd.f32 %v3330_v10, %v3280_v46  ;;  %v3363_v36 = vadd.f32 %v3331_v42, %v3281_v21  ;;  %v3364_v25 = vadd.f32 %v3332_v31, %v3282_v3  ;;  %v7938_v15 = vld [vmem:[#allocation93_spill] sm:$0xff]  ;;  %v7939_v21 = vld [vmem:[#allocation94_spill] sm:$0xff]  ;;  %v7945_v10 = vld [vmem:[#allocation100_spill] sm:$0xff] }
 0x23d   :  { %v3365_v58 = vadd.f32 %v3333_v55, %v3283_v26  ;;  %v3366_v8 = vadd.f32 %v3334_v7, %v3284_v22  ;;  %v3367_v41 = vadd.f32 %v3335_v0, %v3285_v1  ;;  %v3368_v43 = vadd.f32 %v3336_v49, %v3286_v13  ;;  %v7940_v26 = vld [vmem:[#allocation95_spill] sm:$0xff]  ;;  %v7941_v1 = vld [vmem:[#allocation96_spill] sm:$0xff]  ;;  %v7943_v49 = vld [vmem:[#allocation98_spill] sm:$0xff] }
 0x23e   :  { %v3369_v27 = vadd.f32 %v3337_v54, %v3287_v9  ;;  %v3372_v17 = vmul.f32 %v6459_v18, %v6690_v5  ;;  %v3373_v28 = vmul.f32 %v6466_v61, %v6690_v5  ;;  %v3374_v59 = vmul.f32 %v6473_v47, %v6690_v5  ;;  %v7942_v9 = vld [vmem:[#allocation97_spill] sm:$0xff]  ;;  %v7944_v55 = vld [vmem:[#allocation99_spill] sm:$0xff] }
 0x23f   :  { %v3375_v38 = vmul.f32 %v7900_v14, %v6690_v5  ;;  %v3376_v39 = vmul.f32 %v7901_v60, %v6690_v5  ;;  %v3377_v63 = vmul.f32 %v7902_v48, %v6690_v5  ;;  %v3378_v40 = vmul.f32 %v7937_v11, %v6690_v5  ;;  %v7946_v2 = vld [vmem:[#allocation101_spill] sm:$0xff] }
 0x240   :  { %v3379_v46 = vmul.f32 %v7938_v15, %v6690_v5  ;;  %v3380_v3 = vmul.f32 %v7939_v21, %v6690_v5  ;;  %v3381_v22 = vmul.f32 %v7940_v26, %v6690_v5  ;;  %v3382_v13 = vmul.f32 %v7941_v1, %v6690_v5 }
 0x241   :  { %v3383_v54 = vmul.f32 %v7942_v9, %v6690_v5  ;;  %v3384_v7 = vmul.f32 %v7943_v49, %v6690_v5  ;;  %v3385_v42 = vmul.f32 %v7944_v55, %v6690_v5  ;;  %v3386_v62 = vmul.f32 %v7945_v10, %v6690_v5 }
 0x242   :  { %v3387_v31 = vmul.f32 %v7946_v2, %v6690_v5  ;;  %v3404_v0 = vrot.slane %v3372_v17, 6  ;;  %v3405_v35 = vrot.slane %v3373_v28, 6  ;;  %v3406_v34 = vrot.slane %v3374_v59, 6 }
 0x243   :  { %v3407_v23 = vrot.slane %v3375_v38, 6  ;;  %v3408_v37 = vrot.slane %v3376_v39, 6  ;;  %v3409_v32 = vrot.slane %v3377_v63, 6  ;;  %v3410_v53 = vrot.slane %v3378_v40, 6 }
 0x244   :  { %v3411_v4 = vrot.slane %v3379_v46, 6  ;;  %v3412_v12 = vrot.slane %v3380_v3, 6  ;;  %v3413_v29 = vrot.slane %v3381_v22, 6  ;;  %v3414_v55 = vrot.slane %v3382_v13, 6 }
 0x245   :  { %v3415_v10 = vrot.slane %v3383_v54, 6  ;;  %v3416_v49 = vrot.slane %v3384_v7, 6  ;;  %v3417_v9 = vrot.slane %v3385_v42, 6  ;;  %v3418_v5 = vrot.slane %v3386_v62, 6 }
 0x246   :  { %v3419_v17 = vrot.slane %v3387_v31, 6  ;;  %v3436_v28 = vadd.f32 %v3404_v0, %v3354_v16  ;;  %v3437_v2 = vadd.f32 %v3405_v35, %v3355_v44  ;;  %v3438_v59 = vadd.f32 %v3406_v34, %v3356_v50  ;;  %v7947_v16 = vld [vmem:[#allocation60_spill] sm:$0xff]  ;;  %v7957_v35 = vld [vmem:[#allocation69_spill] sm:$0xff] }
 0x247   :  { %v3439_v38 = vadd.f32 %v3407_v23, %v3357_v56  ;;  %v3440_v39 = vadd.f32 %v3408_v37, %v3358_v51  ;;  %v3441_v63 = vadd.f32 %v3409_v32, %v3359_v33  ;;  %v3442_v1 = vadd.f32 %v3410_v53, %v3360_v30  ;;  %v7948_v56 = vld [vmem:[#allocation61_spill] sm:$0xff]  ;;  %v7949_v30 = vld [vmem:[#allocation62_spill] sm:$0xff]  ;;  %v7959_v32 = vld [vmem:[#allocation71_spill] sm:$0xff] }
 0x248   :  { %v3443_v40 = vadd.f32 %v3411_v4, %v3361_v6  ;;  %v3444_v46 = vadd.f32 %v3412_v12, %v3362_v57  ;;  %v3453_v3 = vstv %s6758_s12  ;;  %v3445_v22 = vadd.f32 %v3413_v29, %v3363_v36  ;;  %v7950_v57 = vld [vmem:[#allocation63_spill] sm:$0xff]  ;;  %v7951_v36 = vld [vmem:[#allocation64_spill] sm:$0xff]  ;;  %v7958_v23 = vld [vmem:[#allocation70_spill] sm:$0xff] }
 0x249   :  { %v3446_v26 = vadd.f32 %v3414_v55, %v3364_v25  ;;  %v3447_v13 = vadd.f32 %v3415_v10, %v3365_v58  ;;  %v3448_v54 = vadd.f32 %v3416_v49, %v3366_v8  ;;  %v3449_v7 = vadd.f32 %v3417_v9, %v3367_v41  ;;  %v7952_v58 = vld [vmem:[#allocation65_spill] sm:$0xff]  ;;  %v7953_v41 = vld [vmem:[#allocation66_spill] sm:$0xff]  ;;  %v7956_v55 = vld [vmem:[#allocation68_spill] sm:$0xff] }
 0x24a   :  { %v3450_v42 = vadd.f32 %v3418_v5, %v3368_v43  ;;  %v3451_v62 = vadd.f32 %v3419_v17, %v3369_v27  ;;  %v3487_v31 = vstv %s6772_s13  ;;  %v3454_v44 = vmul.f32 %v6152_v20, %v3453_v3  ;;  %v7954_v27 = vld [vmem:[#allocation67_spill] sm:$0xff]  ;;  %v7955_v49 = vld [vmem:[#allocation42_spill] sm:$0xff]  ;;  %v7960_v4 = vld [vmem:[#allocation72_spill] sm:$0xff] }
 0x24b   :  { %v3455_v50 = vmul.f32 %v7947_v16, %v3453_v3  ;;  %v3456_v51 = vmul.f32 %v7948_v56, %v3453_v3  ;;  %v6782_v33 = vstv %s6774_s1  ;;  %v3457_v6 = vmul.f32 %v7949_v30, %v3453_v3 }
 0x24c   :  { %v3458_v0 = vmul.f32 %v7950_v57, %v3453_v3  ;;  %v3459_v25 = vmul.f32 %v7951_v36, %v3453_v3  ;;  %v3460_v8 = vmul.f32 %v7952_v58, %v3453_v3  ;;  %v3461_v43 = vmul.f32 %v7953_v41, %v3453_v3 }
 0x24d   :  { %v3462_v9 = vmul.f32 %v7954_v27, %v3453_v3  ;;  %v3463_v20 = vmul.f32 %v7955_v49, %v3453_v3  ;;  %v3464_v10 = vmul.f32 %v7956_v55, %v3453_v3  ;;  %v3465_v34 = vmul.f32 %v7957_v35, %v3453_v3 }
 0x24e   :  { %v3466_v37 = vmul.f32 %v7958_v23, %v3453_v3  ;;  %v3467_v53 = vmul.f32 %v7959_v32, %v3453_v3  ;;  %v3468_v12 = vmul.f32 %v7960_v4, %v3453_v3  ;;  %v3469_v29 = vmul.f32 %v6244_v24, %v3453_v3 }
 0x24f   :  { %v3470_v5 = vadd.f32 %v3454_v44, %v3436_v28  ;;  %v3471_v17 = vadd.f32 %v3455_v50, %v3437_v2  ;;  %v3472_v16 = vadd.f32 %v3456_v51, %v3438_v59  ;;  %v3473_v56 = vadd.f32 %v3457_v6, %v3439_v38  ;;  %v7961_v28 = vld [vmem:[#allocation75_spill] sm:$0xff]  ;;  %v7962_v59 = vld [vmem:[#allocation76_spill] sm:$0xff]  ;;  %v7971_v50 = vld [vmem:[#allocation86_spill] sm:$0xff] }
 0x250   :  { %v3474_v30 = vadd.f32 %v3458_v0, %v3440_v39  ;;  %v3475_v57 = vadd.f32 %v3459_v25, %v3441_v63  ;;  %v3476_v36 = vadd.f32 %v3460_v8, %v3442_v1  ;;  %v3477_v58 = vadd.f32 %v3461_v43, %v3443_v40  ;;  %v7963_v39 = vld [vmem:[#allocation77_spill] sm:$0xff]  ;;  %v7964_v1 = vld [vmem:[#allocation78_spill] sm:$0xff]  ;;  %v7972_v6 = vld [vmem:[#allocation87_spill] sm:$0xff] }
 0x251   :  { %v3478_v41 = vadd.f32 %v3462_v9, %v3444_v46  ;;  %v3479_v27 = vadd.f32 %v3463_v20, %v3445_v22  ;;  %v3480_v49 = vadd.f32 %v3464_v10, %v3446_v26  ;;  %v3481_v55 = vadd.f32 %v3465_v34, %v3447_v13  ;;  %v7965_v46 = vld [vmem:[#allocation79_spill] sm:$0xff]  ;;  %v7966_v26 = vld [vmem:[#allocation80_spill] sm:$0xff]  ;;  %v7967_v13 = vld [vmem:[#allocation81_spill] sm:$0xff] }
 0x252   :  { %v3482_v35 = vadd.f32 %v3466_v37, %v3448_v54  ;;  %v3483_v23 = vadd.f32 %v3467_v53, %v3449_v7  ;;  %v3484_v21 = vadd.f32 %v3468_v12, %v3450_v42  ;;  %v3485_v32 = vadd.f32 %v3469_v29, %v3451_v62  ;;  %v7968_v7 = vld [vmem:[#allocation82_spill] sm:$0xff]  ;;  %v7973_v25 = vld [vmem:[#allocation88_spill] sm:$0xff] }
 0x253   :  { %v3488_v4 = vmul.f32 %v7885_v45, %v3487_v31  ;;  %v3489_v24 = vmul.f32 %v7923_v19, %v3487_v31  ;;  %v3490_v2 = vmul.f32 %v7961_v28, %v3487_v31  ;;  %v3491_v38 = vmul.f32 %v7962_v59, %v3487_v31  ;;  %v7969_v45 = vld [vmem:[#allocation84_spill] sm:$0xff]  ;;  %v7970_v19 = vld [vmem:[#allocation85_spill] sm:$0xff] }
 0x254   :  { %v3492_v63 = vmul.f32 %v7963_v39, %v3487_v31  ;;  %v3493_v40 = vmul.f32 %v7964_v1, %v3487_v31  ;;  %v3494_v3 = vmul.f32 %v7965_v46, %v3487_v31  ;;  %v3495_v22 = vmul.f32 %v7966_v26, %v3487_v31 }
 0x255   :  { %v3496_v54 = vmul.f32 %v7967_v13, %v3487_v31  ;;  %v3497_v42 = vmul.f32 %v7968_v7, %v3487_v31  ;;  %v3498_v62 = vmul.f32 %v7969_v45, %v3487_v31  ;;  %v3499_v44 = vmul.f32 %v7970_v19, %v3487_v31  ;;  %v7989_v45 = vld [vmem:[#allocation15_spill] sm:$0xff] }
 0x256   :  { %v3500_v51 = vmul.f32 %v7971_v50, %v3487_v31  ;;  %v3501_v0 = vmul.f32 %v7972_v6, %v3487_v31  ;;  %v3502_v8 = vmul.f32 %v7973_v25, %v3487_v31  ;;  %v3503_v43 = vmul.f32 %v6404_v52, %v3487_v31  ;;  %v7991_v50 = vld [vmem:[#allocation16_spill] sm:$0xff]  ;;  %v7992_v6 = vld [vmem:[#allocation31_spill] sm:$0xff] }
 0x257   :  { %v3504_v9 = vadd.f32 %v3488_v4, %v3470_v5  ;;  %v3505_v20 = vadd.f32 %v3489_v24, %v3471_v17  ;;  %v3506_v10 = vadd.f32 %v3490_v2, %v3472_v16  ;;  %v3507_v34 = vadd.f32 %v3491_v38, %v3473_v56  ;;  %v7983_v4 = vld [vmem:[#allocation12_spill] sm:$0xff]  ;;  %v7985_v38 = vld [vmem:[#allocation13_spill] sm:$0xff] }
 0x258   :  { %v3508_v37 = vadd.f32 %v3492_v63, %v3474_v30  ;;  %v3509_v53 = vadd.f32 %v3493_v40, %v3475_v57  ;;  %v3510_v12 = vadd.f32 %v3494_v3, %v3476_v36  ;;  %v3511_v29 = vadd.f32 %v3495_v22, %v3477_v58  ;;  %v7984_v2 = vld [vmem:[#allocation28_spill] sm:$0xff]  ;;  %v7986_v40 = vld [vmem:[#allocation57_spill] sm:$0xff]  ;;  %v7987_v3 = vld [vmem:[#allocation14_spill] sm:$0xff] }
 0x259   :  { %v3512_v28 = vadd.f32 %v3496_v54, %v3478_v41  ;;  %v3513_v59 = vadd.f32 %v3497_v42, %v3479_v27  ;;  %v6813_v39 = vadd.f32 %v3498_v62, %v3480_v49  ;;  %v6815_v1 = vadd.f32 %v3499_v44, %v3481_v55  ;;  %v7988_v42 = vld [vmem:[#allocation29_spill] sm:$0xff]  ;;  %v7990_v44 = vld [vmem:[#allocation30_spill] sm:$0xff] }
 0x25a   :  { %v6817_v46 = vadd.f32 %v3500_v51, %v3482_v35  ;;  %v6819_v26 = vadd.f32 %v3501_v0, %v3483_v23  ;;  %v6821_v13 = vadd.f32 %v3502_v8, %v3484_v21  ;;  %v6823_v52 = vadd.f32 %v3503_v43, %v3485_v32  ;;  %v7981_v35 = vld [vmem:[#allocation101_spill] sm:$0xff]  ;;  %v7982_v32 = vld [vmem:[#allocation56_spill] sm:$0xff]  ;;  %v7994_v8 = vld [vmem:[#allocation43_spill] sm:$0xff] }
 0x25b   :  { %v3522_v31 = vmul.f32 %v6459_v18, %v6782_v33  ;;  %v3523_v5 = vmul.f32 %v6466_v61, %v6782_v33  ;;  %v3524_v17 = vmul.f32 %v6473_v47, %v6782_v33  ;;  %v3525_v16 = vmul.f32 %v7900_v14, %v6782_v33  ;;  %v7974_v61 = vld [vmem:[#allocation94_spill] sm:$0xff]  ;;  %v7975_v47 = vld [vmem:[#allocation95_spill] sm:$0xff]  ;;  %v7976_v14 = vld [vmem:[#allocation96_spill] sm:$0xff] }
 0x25c   :  { %v3526_v56 = vmul.f32 %v7901_v60, %v6782_v33  ;;  %v3527_v21 = vmul.f32 %v7902_v48, %v6782_v33  ;;  %v3528_v30 = vmul.f32 %v7937_v11, %v6782_v33  ;;  %v3529_v18 = vmul.f32 %v7938_v15, %v6782_v33  ;;  %v7977_v60 = vld [vmem:[#allocation97_spill] sm:$0xff]  ;;  %v7978_v48 = vld [vmem:[#allocation98_spill] sm:$0xff]  ;;  %v7979_v11 = vld [vmem:[#allocation99_spill] sm:$0xff] }
 0x25d   :  { %v3530_v57 = vmul.f32 %v7974_v61, %v6782_v33  ;;  %v3531_v36 = vmul.f32 %v7975_v47, %v6782_v33  ;;  %v3532_v58 = vmul.f32 %v7976_v14, %v6782_v33  ;;  %v3533_v41 = vmul.f32 %v7977_v60, %v6782_v33  ;;  %v7980_v15 = vld [vmem:[#allocation100_spill] sm:$0xff]  ;;  %v7993_v0 = vld [vmem:[#allocation17_spill] sm:$0xff] }
 0x25e   :  { %v3534_v27 = vmul.f32 %v7978_v48, %v6782_v33  ;;  %v3535_v49 = vmul.f32 %v7979_v11, %v6782_v33  ;;  %v6855_v55 = vmul.f32 %v7980_v15, %v6782_v33  ;;  %v6859_v23 = vmul.f32 %v7981_v35, %v6782_v33  ;;  %v7999_v47 = vld [vmem:[#allocation45_spill] sm:$0xff]  ;;  %v8002_v35 = vld [vmem:[#allocation34_spill] sm:$0xff] }
 0x25f   :  { %v3555_v24 = vsel %vm3554_vm0, %v7983_v4, %v7982_v32  ;;  %v3556_v63 = vsel %vm3554_vm0, %v7985_v38, %v7984_v2  ;;  %v3557_v22 = vsel %vm3554_vm0, %v7987_v3, %v7986_v40  ;;  %v3538_v54 = vadd.f32 %v3522_v31, %v3504_v9  ;;  %v7995_v9 = vld [vmem:[#allocation44_spill] sm:$0xff]  ;;  %v7996_v31 = vld [vmem:[#allocation83_spill] sm:$0xff]  ;;  %v8000_v48 = vld [vmem:[#allocation33_spill] sm:$0xff] }
 0x260   :  { %v3539_v7 = vadd.f32 %v3523_v5, %v3505_v20  ;;  %v3558_v62 = vsel %vm3554_vm0, %v7989_v45, %v7988_v42  ;;  %v3540_v33 = vadd.f32 %v3524_v17, %v3506_v10  ;;  %v3541_v19 = vadd.f32 %v3525_v16, %v3507_v34  ;;  %v7997_v17 = vld [vmem:[#allocation32_spill] sm:$0xff]  ;;  %v7998_v16 = vld [vmem:[#allocation18_spill] sm:$0xff]  ;;  %v8001_v11 = vld [vmem:[#allocation25_spill] sm:$0xff] }
 0x261   :  { %v3559_v51 = vsel %vm3554_vm0, %v7991_v50, %v7990_v44  ;;  %v3560_v25 = vsel %vm3554_vm0, %v7993_v0, %v7992_v6  ;;  %v3572_v43 = vsel %vm3571_vm1, %v3555_v24, %v7994_v8  ;;  %v3573_v20 = vsel %vm3571_vm1, %v3556_v63, %v7995_v9  ;;  %v8003_v32 = vld [vmem:[#allocation19_spill] sm:$0xff]  ;;  %v8004_v24 = vld [vmem:[#allocation46_spill] sm:$0xff]  ;;  %v8007_v63 = vld [vmem:[#allocation20_spill] sm:$0xff] }
 0x262   :  { %v3574_v5 = vsel %vm3571_vm1, %v3557_v22, %v7996_v31  ;;  %v3542_v10 = vadd.f32 %v3526_v56, %v3508_v37  ;;  %v3543_v34 = vadd.f32 %v3527_v21, %v3509_v53  ;;  %v3561_v61 = vsel %vm3554_vm0, %v7998_v16, %v7997_v17  ;;  %v8005_v53 = vld [vmem:[#allocation47_spill] sm:$0xff]  ;;  %v8006_v38 = vld [vmem:[#allocation50_spill] sm:$0xff]  ;;  %v8008_v3 = vld [vmem:[#allocation48_spill] sm:$0xff] }
 0x263   :  { %v3575_v14 = vsel %vm3571_vm1, %v3558_v62, %v7999_v47  ;;  %v3544_v60 = vadd.f32 %v3528_v30, %v3510_v12  ;;  %v3562_v15 = vsel %vm3554_vm0, %v8001_v11, %v8000_v48  ;;  %v3563_v4 = vsel %vm3554_vm0, %v8003_v32, %v8002_v35  ;;  %v8010_v62 = vld [vmem:[#allocation21_spill] sm:$0xff]  ;;  %v8013_v50 = vld [vmem:[#allocation22_spill] sm:$0xff]  ;;  %v8016_v8 = vld [vmem:[#allocation23_spill] sm:$0xff] }
 0x264   :  { %v3576_v37 = vsel %vm3571_vm1, %v3559_v51, %v8004_v24  ;;  %v3577_v56 = vsel %vm3571_vm1, %v3560_v25, %v8005_v53  ;;  %v3589_v21 = vsel %vm3588_vm2, %v3572_v43, %v3538_v54  ;;  %v3590_v2 = vsel %vm3588_vm2, %v3573_v20, %v3539_v7  ;;  %v8009_v54 = vld [vmem:[#allocation35_spill] sm:$0xff]  ;;  %v8014_v6 = vld [vmem:[#allocation49_spill] sm:$0xff]  ;;  %v8018_v31 = vld [vmem:[#allocation38_spill] sm:$0xff] }
 0x265   :  { %v3591_v12 = vsel %vm3588_vm2, %v3574_v5, %v3540_v33  ;;  %v3545_v30 = vadd.f32 %v3529_v18, %v3511_v29  ;;  %v3564_v40 = vsel %vm3554_vm0, %v8007_v63, %v8006_v38  ;;  %v3578_v22 = vsel %vm3571_vm1, %v3561_v61, %v8008_v3  ;;  %3605 = vst [vmem:[%s7020_s7] sm:$0xff] %v3589_v21  ;;  %v8011_v33 = vld [vmem:[#allocation41_spill] sm:$0xff]  ;;  %v8019_v5 = vld [vmem:[#allocation24_spill] sm:$0xff]  ;;  %v8021_v16 = vld [vmem:[#allocation39_spill] sm:$0xff] }
 0x266   :  { %v3592_v42 = vsel %vm3588_vm2, %v3575_v14, %v3541_v19  ;;  %v3546_v45 = vadd.f32 %v3530_v57, %v3512_v28  ;;  %v3565_v7 = vsel %vm3554_vm0, %v8010_v62, %v8009_v54  ;;  %v3579_v29 = vsel %vm3571_vm1, %v3562_v15, %v8011_v33  ;;  %3606 = vst [vmem:[%s7020_s7 + $0x8] sm:$0xff] %v3590_v2  ;;  %v8012_v19 = vld [vmem:[#allocation36_spill] sm:$0xff]  ;;  %v8015_v25 = vld [vmem:[#allocation37_spill] sm:$0xff]  ;;  %v8022_v61 = vld [vmem:[#allocation26_spill] sm:$0xff] }
 0x267   :  { %v3593_v18 = vsel %vm3588_vm2, %v3576_v37, %v3542_v10  ;;  %v3547_v44 = vadd.f32 %v3531_v36, %v3513_v59  ;;  %v3566_v51 = vsel %vm3554_vm0, %v8013_v50, %v8012_v19  ;;  %v3580_v28 = vsel %vm3571_vm1, %v3563_v4, %v8014_v6  ;;  %3607 = vst [vmem:[%s7020_s7 + $0x10] sm:$0xff] %v3591_v12  ;;  %v8017_v59 = vld [vmem:[#allocation51_spill] sm:$0xff]  ;;  %v8024_v48 = vld [vmem:[#allocation40_spill] sm:$0xff]  ;;  %v8028_v37 = vld [vmem:[#allocation58_spill] sm:$0xff] }
 0x268   :  { %v3594_v57 = vsel %vm3588_vm2, %v3577_v56, %v3543_v34  ;;  %v3548_v0 = vadd.f32 %v3532_v58, %v6813_v39  ;;  %v3567_v43 = vsel %vm3554_vm0, %v8016_v8, %v8015_v25  ;;  %v3581_v36 = vsel %vm3571_vm1, %v3564_v40, %v8017_v59  ;;  %3608 = vst [vmem:[%s7020_s7 + $0x18] sm:$0xff] %v3592_v42  ;;  %v8020_v39 = vld [vmem:[#allocation52_spill] sm:$0xff]  ;;  %v8025_v11 = vld [vmem:[#allocation27_spill] sm:$0xff] }
 0x269   :  { %v3595_v9 = vsel %vm3588_vm2, %v3578_v22, %v3544_v60  ;;  %v3549_v20 = vadd.f32 %v3533_v41, %v6815_v1  ;;  %v3568_v10 = vsel %vm3554_vm0, %v8019_v5, %v8018_v31  ;;  %v3582_v58 = vsel %vm3571_vm1, %v3565_v7, %v8020_v39  ;;  %3609 = vst [vmem:[%s7020_s7 + $0x20] sm:$0xff] %v3593_v18  ;;  %v8023_v1 = vld [vmem:[#allocation53_spill] sm:$0xff]  ;;  %v8027_v4 = vld [vmem:[#allocation55_spill] sm:$0xff] }
 0x26a   :  { %v3596_v34 = vsel %vm3588_vm2, %v3579_v29, %v3545_v30  ;;  %v3550_v17 = vadd.f32 %v3534_v27, %v6817_v46  ;;  %v3569_v47 = vsel %vm3554_vm0, %v8022_v61, %v8021_v16  ;;  %v3583_v41 = vsel %vm3571_vm1, %v3566_v51, %v8023_v1  ;;  %3610 = vst [vmem:[%s7020_s7 + $0x28] sm:$0xff] %v3594_v57  ;;  %v8026_v46 = vld [vmem:[#allocation54_spill] sm:$0xff] }
 0x26b   :  { %v3597_v14 = vsel %vm3588_vm2, %v3580_v28, %v3546_v45  ;;  %v3551_v60 = vadd.f32 %v3535_v49, %v6819_v26  ;;  %v3570_v15 = vsel %vm3554_vm0, %v8025_v11, %v8024_v48  ;;  %v3584_v27 = vsel %vm3571_vm1, %v3567_v43, %v8026_v46  ;;  %3611 = vst [vmem:[%s7020_s7 + $0x30] sm:$0xff] %v3595_v9 }
 0x26c   :  { %v3598_v35 = vsel %vm3588_vm2, %v3581_v36, %v3547_v44  ;;  %v3552_v32 = vadd.f32 %v6855_v55, %v6821_v13  ;;  %v3585_v24 = vsel %vm3571_vm1, %v3568_v10, %v8027_v4  ;;  %v3599_v26 = vsel %vm3588_vm2, %v3582_v58, %v3548_v0  ;;  %3612 = vst [vmem:[%s7020_s7 + $0x38] sm:$0xff] %v3596_v34  ;;  %v8029_v13 = vld [vmem:[#allocation59_spill] sm:$0xff] }
 0x26d   :  { %v3553_v49 = vadd.f32 %v6859_v23, %v6823_v52  ;;  %v3586_v53 = vsel %vm3571_vm1, %v3569_v47, %v8028_v37  ;;  %v3600_v56 = vsel %vm3588_vm2, %v3583_v41, %v3549_v20  ;;  %3613 = vst [vmem:[%s7020_s7 + $0x40] sm:$0xff] %v3597_v14  ;;  %v3587_v55 = vsel %vm3571_vm1, %v3570_v15, %v8029_v13 }
 0x26e   :  { %v3601_v21 = vsel %vm3588_vm2, %v3584_v27, %v3550_v17  ;;  %3614 = vst [vmem:[%s7020_s7 + $0x48] sm:$0xff] %v3598_v35  ;;  %v3602_v52 = vsel %vm3588_vm2, %v3585_v24, %v3551_v60  ;;  %v3603_v23 = vsel %vm3588_vm2, %v3586_v53, %v3552_v32 }
 0x26f   :  { %3615 = vst [vmem:[%s7020_s7 + $0x50] sm:$0xff] %v3599_v26  ;;  %v3604_v2 = vsel %vm3588_vm2, %v3587_v55, %v3553_v49 }
 0x270   :  { %3616 = vst [vmem:[%s7020_s7 + $0x58] sm:$0xff] %v3600_v56 }
 0x271   :  { %3617 = vst [vmem:[%s7020_s7 + $0x60] sm:$0xff] %v3601_v21 }
 0x272   :  { %3618 = vst [vmem:[%s7020_s7 + $0x68] sm:$0xff] %v3602_v52 }
 0x273   :  { %3619 = vst [vmem:[%s7020_s7 + $0x70] sm:$0xff] %v3603_v23 }
 0x274   :  { %3620 = vst [vmem:[%s7020_s7 + $0x78] sm:$0xff] %v3604_v2 }
 0x275   :  { %3625 = vsyncpa [#allocation3], 1 }
 0x276   :  { %3626 = vsyncpa [#allocation5], 1 }
 0x277   :  { %3627 = vsyncpa [#allocation8], 1 }

</bundles_post_ra>
